<compile_context>
chip_gen: v7x
topology: tpu7x:2x2x1
jax: 0.10.0
libtpu: 0.0.40
codegen_flags: <defaults>
</compile_context>

<pallas_src>
import math

import jax
import jax.numpy as jnp
from jax.experimental import pallas as pl
from jax.experimental.pallas import tpu as pltpu

# ----------------------------- model config (small) -----------------------------
VOCAB = 100
MAX_POS = 16
TYPE_VOCAB = 2
HIDDEN = 32
NUM_HEADS = 4
HEAD_DIM = HIDDEN // NUM_HEADS
INTERMEDIATE = 64
NUM_LAYERS = 2
NUM_CLASSES = 2
LN_EPS = 1e-12

B = 2      # batch
S = 8      # sequence length
BS = B * S


# ----------------------------- in-kernel helpers ---------------------------------

def _layer_norm(x, g, b, eps=LN_EPS):
    mean = jnp.mean(x, axis=-1, keepdims=True)
    xc = x - mean
    var = jnp.mean(xc * xc, axis=-1, keepdims=True)
    return xc * jax.lax.rsqrt(var + eps) * g + b


def _gelu(x):
    return 0.5 * x * (1.0 + jax.lax.erf(x * (1.0 / math.sqrt(2.0))))


# ----------------------------- fused forward kernel ------------------------------

def _bert_fused_kernel(ids_ref, amask_ref, hm_ref,
                       word_ref, pos_ref, type_ref, eg_ref, eb_ref,
                       qkvw_ref, qkvb_ref, aow_ref, aob_ref, g1_ref, b1_ref,
                       iw_ref, ib_ref, ow_ref, ob_ref, g2_ref, b2_ref,
                       fcw_ref, fcb_ref, cw_ref, cb_ref, o_ref):
    # ---- embeddings: one-hot @ word_emb on the MXU (in-kernel "gather") ----
    ids = ids_ref[...]                                                  # (BS, 1) int32
    vocab_iota = jax.lax.broadcasted_iota(jnp.int32, (BS, VOCAB), 1)    # (BS, V)
    onehot = (vocab_iota == ids).astype(jnp.float32)
    x = jnp.dot(onehot, word_ref[...], preferred_element_type=jnp.float32)  # (BS, H)

    pos = pos_ref[0:S, :]                                               # (S, H)
    x = x + jnp.concatenate([pos] * B, axis=0)                          # broadcast over batch
    x = x + type_ref[0:1, :]                                            # token_type_ids == 0
    x = _layer_norm(x, eg_ref[...], eb_ref[...])

    # ---- additive attention mask: 0 attended, -1e4 masked -> (B, 1, S) ----
    amask = amask_ref[...]                                              # (B, S) f32
    add_mask = ((1.0 - amask) * -10000.0).reshape(B, 1, S)

    scale = 1.0 / math.sqrt(HEAD_DIM)

    # ---- transformer layers (static Python loop, params stacked on leading L) ----
    for l in range(NUM_LAYERS):
        qkv = jnp.dot(x, qkvw_ref[l], preferred_element_type=jnp.float32) + qkvb_ref[l]  # (BS, 3H)

        ctx_heads = []
        for h in range(NUM_HEADS):
            lo = h * HEAD_DIM
            hi = lo + HEAD_DIM
            q = qkv[:, lo:hi].reshape(B, S, HEAD_DIM)
            k = qkv[:, HIDDEN + lo:HIDDEN + hi].reshape(B, S, HEAD_DIM)
            v = qkv[:, 2 * HIDDEN + lo:2 * HIDDEN + hi].reshape(B, S, HEAD_DIM)

            s = jnp.einsum('bqd,bkd->bqk', q, k,
                           preferred_element_type=jnp.float32) * scale      # (B, S, S)
            s = s + add_mask
            m = jnp.max(s, axis=-1, keepdims=True)
            p = jnp.exp(s - m)
            p = p / jnp.sum(p, axis=-1, keepdims=True)
            c = jnp.einsum('bqk,bkd->bqd', p, v,
                           preferred_element_type=jnp.float32)              # (B, S, D)
            ctx_heads.append(c.reshape(BS, HEAD_DIM))

        # concat heads on lane axis; head_mask applied as per-head lane vector
        # (equivalent to probs * head_mask[h], factored out of the V matmul).
        ctx = jnp.concatenate(ctx_heads, axis=-1) * hm_ref[l]               # (BS, H)

        attn_out = jnp.dot(ctx, aow_ref[l], preferred_element_type=jnp.float32) + aob_ref[l]
        x = _layer_norm(attn_out + x, g1_ref[l], b1_ref[l])

        inter = jnp.dot(x, iw_ref[l], preferred_element_type=jnp.float32) + ib_ref[l]
        inter = _gelu(inter)
        ffo = jnp.dot(inter, ow_ref[l], preferred_element_type=jnp.float32) + ob_ref[l]
        x = _layer_norm(ffo + x, g2_ref[l], b2_ref[l])

    # ---- classification head: mean-pool -> (dropout=id) -> fc -> (dropout=id) -> classifier ----
    pooled = jnp.mean(x.reshape(B, S, HIDDEN), axis=1)                      # (B, H)
    # TODO(synk): nn.Dropout has no inference-time effect; omitted (identity).
    hfc = jnp.dot(pooled, fcw_ref[...], preferred_element_type=jnp.float32) + fcb_ref[...]
    scores = jnp.dot(hfc, cw_ref[...], preferred_element_type=jnp.float32) + cb_ref[...]
    o_ref[...] = scores.astype(o_ref.dtype)


# ----------------------------- wrapper --------------------------------------------

def forward(params, input_ids, attention_mask, head_mask=None):
    assert attention_mask is not None, "attention mask is none!"
    assert input_ids.shape == (B, S)

    if head_mask is None:
        head_mask = jnp.ones((NUM_HEADS,), jnp.float32)
    head_mask = head_mask.astype(jnp.float32)
    if head_mask.ndim == 1:                       # [num_heads] -> [num_layers, num_heads]
        head_mask = jnp.broadcast_to(head_mask, (NUM_LAYERS, NUM_HEADS))
    # expand per-head scalars to a lane vector matching the concatenated context
    hm_vec = jnp.repeat(head_mask, HEAD_DIM, axis=-1).reshape(NUM_LAYERS, 1, HIDDEN)

    ids = input_ids.astype(jnp.int32).reshape(BS, 1)
    amask = attention_mask.astype(jnp.float32)

    inputs = (
        ids, amask, hm_vec,
        params["word_emb"], params["pos_emb"], params["type_emb"],
        params["emb_ln_g"], params["emb_ln_b"],
        params["qkv_w"], params["qkv_b"], params["ao_w"], params["ao_b"],
        params["ln1_g"], params["ln1_b"],
        params["i_w"], params["i_b"], params["o_w"], params["o_b"],
        params["ln2_g"], params["ln2_b"],
        params["fc_w"], params["fc_b"], params["cls_w"], params["cls_b"],
    )

    def full_spec(a):
        rank = a.ndim
        return pl.BlockSpec(a.shape, lambda i, _r=rank: (0,) * _r)

    return pl.pallas_call(
        _bert_fused_kernel,
        out_shape=jax.ShapeDtypeStruct((B, NUM_CLASSES), jnp.float32),
        grid=(1,),
        in_specs=[full_spec(a) for a in inputs],
        out_specs=pl.BlockSpec((B, NUM_CLASSES), lambda i: (0, 0)),
        compiler_params=pltpu.CompilerParams(dimension_semantics=("arbitrary",)),
    )(*inputs)


# ----------------------------- deterministic param init --------------------------

def init_params(key):
    def nrm(k, shape):
        return (jax.random.normal(k, shape, jnp.float32) * 0.02).astype(jnp.float32)

    keys = iter(jax.random.split(key, 64))
    L, H, I, C = NUM_LAYERS, HIDDEN, INTERMEDIATE, NUM_CLASSES
    params = {
        "word_emb": nrm(next(keys), (VOCAB, H)),
        "pos_emb": nrm(next(keys), (MAX_POS, H)),
        "type_emb": nrm(next(keys), (TYPE_VOCAB, H)),
        "emb_ln_g": jnp.ones((1, H), jnp.float32),
        "emb_ln_b": jnp.zeros((1, H), jnp.float32),
        # per-layer params stacked on a leading L axis; Q/K/V fused into one [H, 3H]
        "qkv_w": nrm(next(keys), (L, H, 3 * H)),
        "qkv_b": jnp.zeros((L, 1, 3 * H), jnp.float32),
        "ao_w": nrm(next(keys), (L, H, H)),
        "ao_b": jnp.zeros((L, 1, H), jnp.float32),
        "ln1_g": jnp.ones((L, 1, H), jnp.float32),
        "ln1_b": jnp.zeros((L, 1, H), jnp.float32),
        "i_w": nrm(next(keys), (L, H, I)),
        "i_b": jnp.zeros((L, 1, I), jnp.float32),
        "o_w": nrm(next(keys), (L, I, H)),
        "o_b": jnp.zeros((L, 1, H), jnp.float32),
        "ln2_g": jnp.ones((L, 1, H), jnp.float32),
        "ln2_b": jnp.zeros((L, 1, H), jnp.float32),
        "fc_w": nrm(next(keys), (H, H)),
        "fc_b": jnp.zeros((1, H), jnp.float32),
        "cls_w": nrm(next(keys), (H, C)),
        "cls_b": jnp.zeros((1, C), jnp.float32),
    }
    return params


# ----------------------------- main ----------------------------------------------

if __name__ == "__main__":
    key = jax.random.PRNGKey(0)
    pkey, ikey = jax.random.split(key)

    params = init_params(pkey)

    input_ids = jax.random.randint(ikey, (B, S), 0, VOCAB, dtype=jnp.int32)
    attention_mask = jnp.array([[1, 1, 1, 1, 1, 1, 1, 0],
                                [1, 1, 1, 1, 1, 0, 0, 0]], jnp.int32)
    head_mask = jnp.ones((NUM_HEADS,), jnp.float32)

    fwd = jax.jit(lambda ids, am, hm: forward(params, ids, am, hm))
    scores = fwd(input_ids, attention_mask, head_mask)
    jax.block_until_ready(scores)

    assert scores.shape == (B, NUM_CLASSES)
    assert bool(jnp.all(jnp.isfinite(scores)))
    print("KERNEL_OK")
</pallas_src>

<mosaic_0001>
module attributes {stable_mosaic.version = 11 : i64} {
  func.func @_bert_fused_kernel(%arg0: i32, %arg1: memref<16x1xi32, #tpu.memory_space<vmem>>, %arg2: memref<2x8xf32, #tpu.memory_space<vmem>>, %arg3: memref<2x1x32xf32, #tpu.memory_space<vmem>>, %arg4: memref<100x32xf32, #tpu.memory_space<vmem>>, %arg5: memref<16x32xf32, #tpu.memory_space<vmem>>, %arg6: memref<2x32xf32, #tpu.memory_space<vmem>>, %arg7: memref<1x32xf32, #tpu.memory_space<vmem>>, %arg8: memref<1x32xf32, #tpu.memory_space<vmem>>, %arg9: memref<2x32x96xf32, #tpu.memory_space<vmem>>, %arg10: memref<2x1x96xf32, #tpu.memory_space<vmem>>, %arg11: memref<2x32x32xf32, #tpu.memory_space<vmem>>, %arg12: memref<2x1x32xf32, #tpu.memory_space<vmem>>, %arg13: memref<2x1x32xf32, #tpu.memory_space<vmem>>, %arg14: memref<2x1x32xf32, #tpu.memory_space<vmem>>, %arg15: memref<2x32x64xf32, #tpu.memory_space<vmem>>, %arg16: memref<2x1x64xf32, #tpu.memory_space<vmem>>, %arg17: memref<2x64x32xf32, #tpu.memory_space<vmem>>, %arg18: memref<2x1x32xf32, #tpu.memory_space<vmem>>, %arg19: memref<2x1x32xf32, #tpu.memory_space<vmem>>, %arg20: memref<2x1x32xf32, #tpu.memory_space<vmem>>, %arg21: memref<32x32xf32, #tpu.memory_space<vmem>>, %arg22: memref<1x32xf32, #tpu.memory_space<vmem>>, %arg23: memref<32x2xf32, #tpu.memory_space<vmem>>, %arg24: memref<1x2xf32, #tpu.memory_space<vmem>>, %arg25: memref<2x2xf32, #tpu.memory_space<vmem>>) attributes {dimension_semantics = [#tpu.dimension_semantics<arbitrary>], iteration_bounds = array<i64: 1>, scalar_prefetch = 0 : i64, scratch_operands = 0 : i64, tpu.core_type = #tpu.core_type<tc>, window_params = [{pipeline_mode = #tpu.pipeline_mode<synchronous>, transform_indices = @transform_0, window_bounds = array<i64: 16, 1>}, {pipeline_mode = #tpu.pipeline_mode<synchronous>, transform_indices = @transform_1, window_bounds = array<i64: 2, 8>}, {pipeline_mode = #tpu.pipeline_mode<synchronous>, transform_indices = @transform_2, window_bounds = array<i64: 2, 1, 32>}, {pipeline_mode = #tpu.pipeline_mode<synchronous>, transform_indices = @transform_3, window_bounds = array<i64: 100, 32>}, {pipeline_mode = #tpu.pipeline_mode<synchronous>, transform_indices = @transform_4, window_bounds = array<i64: 16, 32>}, {pipeline_mode = #tpu.pipeline_mode<synchronous>, transform_indices = @transform_5, window_bounds = array<i64: 2, 32>}, {pipeline_mode = #tpu.pipeline_mode<synchronous>, transform_indices = @transform_6, window_bounds = array<i64: 1, 32>}, {pipeline_mode = #tpu.pipeline_mode<synchronous>, transform_indices = @transform_7, window_bounds = array<i64: 1, 32>}, {pipeline_mode = #tpu.pipeline_mode<synchronous>, transform_indices = @transform_8, window_bounds = array<i64: 2, 32, 96>}, {pipeline_mode = #tpu.pipeline_mode<synchronous>, transform_indices = @transform_9, window_bounds = array<i64: 2, 1, 96>}, {pipeline_mode = #tpu.pipeline_mode<synchronous>, transform_indices = @transform_10, window_bounds = array<i64: 2, 32, 32>}, {pipeline_mode = #tpu.pipeline_mode<synchronous>, transform_indices = @transform_11, window_bounds = array<i64: 2, 1, 32>}, {pipeline_mode = #tpu.pipeline_mode<synchronous>, transform_indices = @transform_12, window_bounds = array<i64: 2, 1, 32>}, {pipeline_mode = #tpu.pipeline_mode<synchronous>, transform_indices = @transform_13, window_bounds = array<i64: 2, 1, 32>}, {pipeline_mode = #tpu.pipeline_mode<synchronous>, transform_indices = @transform_14, window_bounds = array<i64: 2, 32, 64>}, {pipeline_mode = #tpu.pipeline_mode<synchronous>, transform_indices = @transform_15, window_bounds = array<i64: 2, 1, 64>}, {pipeline_mode = #tpu.pipeline_mode<synchronous>, transform_indices = @transform_16, window_bounds = array<i64: 2, 64, 32>}, {pipeline_mode = #tpu.pipeline_mode<synchronous>, transform_indices = @transform_17, window_bounds = array<i64: 2, 1, 32>}, {pipeline_mode = #tpu.pipeline_mode<synchronous>, transform_indices = @transform_18, window_bounds = array<i64: 2, 1, 32>}, {pipeline_mode = #tpu.pipeline_mode<synchronous>, transform_indices = @transform_19, window_bounds = array<i64: 2, 1, 32>}, {pipeline_mode = #tpu.pipeline_mode<synchronous>, transform_indices = @transform_20, window_bounds = array<i64: 32, 32>}, {pipeline_mode = #tpu.pipeline_mode<synchronous>, transform_indices = @transform_21, window_bounds = array<i64: 1, 32>}, {pipeline_mode = #tpu.pipeline_mode<synchronous>, transform_indices = @transform_22, window_bounds = array<i64: 32, 2>}, {pipeline_mode = #tpu.pipeline_mode<synchronous>, transform_indices = @transform_23, window_bounds = array<i64: 1, 2>}, {pipeline_mode = #tpu.pipeline_mode<synchronous>, transform_indices = @transform_24, window_bounds = array<i64: 2, 2>}]} {
    %c0 = arith.constant 0 : index
    %c0_0 = arith.constant 0 : index
    %0 = vector.load %arg1[%c0, %c0_0] : memref<16x1xi32, #tpu.memory_space<vmem>>, vector<16x1xi32>
    %1 = tpu.iota {dimensions = array<i32: 1>} : vector<16x100xi32>
    %2 = vector.broadcast %0 : vector<16x1xi32> to vector<16x100xi32>
    %3 = arith.cmpi eq, %1, %2 : vector<16x100xi32>
    %4 = arith.extui %3 : vector<16x100xi1> to vector<16x100xi32>
    %5 = arith.sitofp %4 : vector<16x100xi32> to vector<16x100xf32>
    %c0_1 = arith.constant 0 : index
    %c0_2 = arith.constant 0 : index
    %6 = vector.load %arg4[%c0_1, %c0_2] : memref<100x32xf32, #tpu.memory_space<vmem>>, vector<100x32xf32>
    %cst = arith.constant dense<0.000000e+00> : vector<16x32xf32>
    %7 = tpu.matmul %5, %6, %cst {dimension_numbers = #tpu.dot_dimension_numbers<[1], [0], [0], [1], [0, 0, 1, 1], [], []>} : vector<16x100xf32>, vector<100x32xf32>, vector<16x32xf32> -> vector<16x32xf32>
    %c0_3 = arith.constant 0 : index
    %c0_4 = arith.constant 0 : index
    %8 = vector.load %arg5[%c0_3, %c0_4] : memref<16x32xf32, #tpu.memory_space<vmem>>, vector<8x32xf32>
    %9 = tpu.concatenate %8, %8 in 0 : vector<8x32xf32>, vector<8x32xf32> -> vector<16x32xf32>
    %10 = arith.addf %7, %9 : vector<16x32xf32>
    %c0_5 = arith.constant 0 : index
    %c0_6 = arith.constant 0 : index
    %11 = vector.load %arg6[%c0_5, %c0_6] : memref<2x32xf32, #tpu.memory_space<vmem>>, vector<1x32xf32>
    %12 = vector.broadcast %11 : vector<1x32xf32> to vector<16x32xf32>
    %13 = arith.addf %10, %12 : vector<16x32xf32>
    %c0_7 = arith.constant 0 : index
    %c0_8 = arith.constant 0 : index
    %14 = vector.load %arg7[%c0_7, %c0_8] : memref<1x32xf32, #tpu.memory_space<vmem>>, vector<1x32xf32>
    %c0_9 = arith.constant 0 : index
    %c0_10 = arith.constant 0 : index
    %15 = vector.load %arg8[%c0_9, %c0_10] : memref<1x32xf32, #tpu.memory_space<vmem>>, vector<1x32xf32>
    %cst_11 = arith.constant dense<0.000000e+00> : vector<16xf32>
    %16 = vector.multi_reduction <add>, %13, %cst_11 [1] : vector<16x32xf32> to vector<16xf32>
    %17 = vector.shape_cast %16 : vector<16xf32> to vector<16x1xf32>
    %cst_12 = arith.constant 3.200000e+01 : f32
    %18 = vector.broadcast %cst_12 : f32 to vector<16x1xf32>
    %19 = arith.divf %17, %18 : vector<16x1xf32>
    %20 = vector.broadcast %19 : vector<16x1xf32> to vector<16x32xf32>
    %21 = arith.subf %13, %20 : vector<16x32xf32>
    %22 = arith.mulf %21, %21 : vector<16x32xf32>
    %cst_13 = arith.constant dense<0.000000e+00> : vector<16xf32>
    %23 = vector.multi_reduction <add>, %22, %cst_13 [1] : vector<16x32xf32> to vector<16xf32>
    %24 = vector.shape_cast %23 : vector<16xf32> to vector<16x1xf32>
    %cst_14 = arith.constant 3.200000e+01 : f32
    %25 = vector.broadcast %cst_14 : f32 to vector<16x1xf32>
    %26 = arith.divf %24, %25 : vector<16x1xf32>
    %cst_15 = arith.constant 9.99999996E-13 : f32
    %27 = vector.broadcast %cst_15 : f32 to vector<16x1xf32>
    %28 = arith.addf %26, %27 : vector<16x1xf32>
    %29 = math.rsqrt %28 : vector<16x1xf32>
    %30 = vector.broadcast %29 : vector<16x1xf32> to vector<16x32xf32>
    %31 = arith.mulf %21, %30 : vector<16x32xf32>
    %32 = vector.broadcast %14 : vector<1x32xf32> to vector<16x32xf32>
    %33 = arith.mulf %31, %32 : vector<16x32xf32>
    %34 = vector.broadcast %15 : vector<1x32xf32> to vector<16x32xf32>
    %35 = arith.addf %33, %34 : vector<16x32xf32>
    %c0_16 = arith.constant 0 : index
    %c0_17 = arith.constant 0 : index
    %36 = vector.load %arg2[%c0_16, %c0_17] : memref<2x8xf32, #tpu.memory_space<vmem>>, vector<2x8xf32>
    %cst_18 = arith.constant 1.000000e+00 : f32
    %37 = vector.broadcast %cst_18 : f32 to vector<2x8xf32>
    %38 = arith.subf %37, %36 : vector<2x8xf32>
    %cst_19 = arith.constant -1.000000e+04 : f32
    %39 = vector.broadcast %cst_19 : f32 to vector<2x8xf32>
    %40 = arith.mulf %38, %39 : vector<2x8xf32>
    %41 = vector.shape_cast %40 : vector<2x8xf32> to vector<2x1x8xf32>
    %c0_20 = arith.constant 0 : index
    %c0_21 = arith.constant 0 : index
    %c0_22 = arith.constant 0 : index
    %42 = vector.load %arg9[%c0_20, %c0_21, %c0_22] : memref<2x32x96xf32, #tpu.memory_space<vmem>>, vector<1x32x96xf32>
    %43 = vector.shape_cast %42 : vector<1x32x96xf32> to vector<32x96xf32>
    %cst_23 = arith.constant dense<0.000000e+00> : vector<16x96xf32>
    %44 = tpu.matmul %35, %43, %cst_23 {dimension_numbers = #tpu.dot_dimension_numbers<[1], [0], [0], [1], [0, 0, 1, 1], [], []>} : vector<16x32xf32>, vector<32x96xf32>, vector<16x96xf32> -> vector<16x96xf32>
    %c0_24 = arith.constant 0 : index
    %c0_25 = arith.constant 0 : index
    %c0_26 = arith.constant 0 : index
    %45 = vector.load %arg10[%c0_24, %c0_25, %c0_26] : memref<2x1x96xf32, #tpu.memory_space<vmem>>, vector<1x1x96xf32>
    %46 = vector.shape_cast %45 : vector<1x1x96xf32> to vector<1x96xf32>
    %47 = vector.broadcast %46 : vector<1x96xf32> to vector<16x96xf32>
    %48 = arith.addf %44, %47 : vector<16x96xf32>
    %49 = vector.extract_strided_slice %48 {offsets = [0, 0], sizes = [16, 8], strides = [1, 1]} : vector<16x96xf32> to vector<16x8xf32>
    %50 = vector.shape_cast %49 : vector<16x8xf32> to vector<2x8x8xf32>
    %51 = vector.extract_strided_slice %48 {offsets = [0, 32], sizes = [16, 8], strides = [1, 1]} : vector<16x96xf32> to vector<16x8xf32>
    %52 = vector.shape_cast %51 : vector<16x8xf32> to vector<2x8x8xf32>
    %53 = vector.extract_strided_slice %48 {offsets = [0, 64], sizes = [16, 8], strides = [1, 1]} : vector<16x96xf32> to vector<16x8xf32>
    %54 = vector.shape_cast %53 : vector<16x8xf32> to vector<2x8x8xf32>
    "tpu.trace_start"() <{level = 10 : i32, message = "bqd,bkd->bqk"}> : () -> ()
    %cst_27 = arith.constant dense<0.000000e+00> : vector<2x8x8xf32>
    %55 = tpu.matmul %50, %52, %cst_27 {dimension_numbers = #tpu.dot_dimension_numbers<[2], [2], [1], [1], [0, 0, 0, 1, 1, 1], [0], [0]>} : vector<2x8x8xf32>, vector<2x8x8xf32>, vector<2x8x8xf32> -> vector<2x8x8xf32>
    "tpu.trace_stop"() : () -> ()
    %cst_28 = arith.constant 0.353553385 : f32
    %56 = vector.broadcast %cst_28 : f32 to vector<2x8x8xf32>
    %57 = arith.mulf %55, %56 : vector<2x8x8xf32>
    %58 = vector.broadcast %41 : vector<2x1x8xf32> to vector<2x8x8xf32>
    %59 = arith.addf %57, %58 : vector<2x8x8xf32>
    %cst_29 = arith.constant dense<0xFF800000> : vector<2x8xf32>
    %60 = vector.multi_reduction <maximumf>, %59, %cst_29 [2] : vector<2x8x8xf32> to vector<2x8xf32>
    %61 = vector.shape_cast %60 : vector<2x8xf32> to vector<2x8x1xf32>
    %62 = vector.broadcast %61 : vector<2x8x1xf32> to vector<2x8x8xf32>
    %63 = arith.subf %59, %62 : vector<2x8x8xf32>
    %64 = math.exp %63 : vector<2x8x8xf32>
    %cst_30 = arith.constant dense<0.000000e+00> : vector<2x8xf32>
    %65 = vector.multi_reduction <add>, %64, %cst_30 [2] : vector<2x8x8xf32> to vector<2x8xf32>
    %66 = vector.shape_cast %65 : vector<2x8xf32> to vector<2x8x1xf32>
    %67 = vector.broadcast %66 : vector<2x8x1xf32> to vector<2x8x8xf32>
    %68 = arith.divf %64, %67 : vector<2x8x8xf32>
    "tpu.trace_start"() <{level = 10 : i32, message = "bqk,bkd->bqd"}> : () -> ()
    %cst_31 = arith.constant dense<0.000000e+00> : vector<2x8x8xf32>
    %69 = tpu.matmul %68, %54, %cst_31 {dimension_numbers = #tpu.dot_dimension_numbers<[2], [1], [1], [2], [0, 0, 0, 1, 1, 2], [0], [0]>} : vector<2x8x8xf32>, vector<2x8x8xf32>, vector<2x8x8xf32> -> vector<2x8x8xf32>
    "tpu.trace_stop"() : () -> ()
    %70 = vector.shape_cast %69 : vector<2x8x8xf32> to vector<16x8xf32>
    %71 = vector.extract_strided_slice %48 {offsets = [0, 8], sizes = [16, 8], strides = [1, 1]} : vector<16x96xf32> to vector<16x8xf32>
    %72 = vector.shape_cast %71 : vector<16x8xf32> to vector<2x8x8xf32>
    %73 = vector.extract_strided_slice %48 {offsets = [0, 40], sizes = [16, 8], strides = [1, 1]} : vector<16x96xf32> to vector<16x8xf32>
    %74 = vector.shape_cast %73 : vector<16x8xf32> to vector<2x8x8xf32>
    %75 = vector.extract_strided_slice %48 {offsets = [0, 72], sizes = [16, 8], strides = [1, 1]} : vector<16x96xf32> to vector<16x8xf32>
    %76 = vector.shape_cast %75 : vector<16x8xf32> to vector<2x8x8xf32>
    "tpu.trace_start"() <{level = 10 : i32, message = "bqd,bkd->bqk"}> : () -> ()
    %cst_32 = arith.constant dense<0.000000e+00> : vector<2x8x8xf32>
    %77 = tpu.matmul %72, %74, %cst_32 {dimension_numbers = #tpu.dot_dimension_numbers<[2], [2], [1], [1], [0, 0, 0, 1, 1, 1], [0], [0]>} : vector<2x8x8xf32>, vector<2x8x8xf32>, vector<2x8x8xf32> -> vector<2x8x8xf32>
    "tpu.trace_stop"() : () -> ()
    %cst_33 = arith.constant 0.353553385 : f32
    %78 = vector.broadcast %cst_33 : f32 to vector<2x8x8xf32>
    %79 = arith.mulf %77, %78 : vector<2x8x8xf32>
    %80 = vector.broadcast %41 : vector<2x1x8xf32> to vector<2x8x8xf32>
    %81 = arith.addf %79, %80 : vector<2x8x8xf32>
    %cst_34 = arith.constant dense<0xFF800000> : vector<2x8xf32>
    %82 = vector.multi_reduction <maximumf>, %81, %cst_34 [2] : vector<2x8x8xf32> to vector<2x8xf32>
    %83 = vector.shape_cast %82 : vector<2x8xf32> to vector<2x8x1xf32>
    %84 = vector.broadcast %83 : vector<2x8x1xf32> to vector<2x8x8xf32>
    %85 = arith.subf %81, %84 : vector<2x8x8xf32>
    %86 = math.exp %85 : vector<2x8x8xf32>
    %cst_35 = arith.constant dense<0.000000e+00> : vector<2x8xf32>
    %87 = vector.multi_reduction <add>, %86, %cst_35 [2] : vector<2x8x8xf32> to vector<2x8xf32>
    %88 = vector.shape_cast %87 : vector<2x8xf32> to vector<2x8x1xf32>
    %89 = vector.broadcast %88 : vector<2x8x1xf32> to vector<2x8x8xf32>
    %90 = arith.divf %86, %89 : vector<2x8x8xf32>
    "tpu.trace_start"() <{level = 10 : i32, message = "bqk,bkd->bqd"}> : () -> ()
    %cst_36 = arith.constant dense<0.000000e+00> : vector<2x8x8xf32>
    %91 = tpu.matmul %90, %76, %cst_36 {dimension_numbers = #tpu.dot_dimension_numbers<[2], [1], [1], [2], [0, 0, 0, 1, 1, 2], [0], [0]>} : vector<2x8x8xf32>, vector<2x8x8xf32>, vector<2x8x8xf32> -> vector<2x8x8xf32>
    "tpu.trace_stop"() : () -> ()
    %92 = vector.shape_cast %91 : vector<2x8x8xf32> to vector<16x8xf32>
    %93 = vector.extract_strided_slice %48 {offsets = [0, 16], sizes = [16, 8], strides = [1, 1]} : vector<16x96xf32> to vector<16x8xf32>
    %94 = vector.shape_cast %93 : vector<16x8xf32> to vector<2x8x8xf32>
    %95 = vector.extract_strided_slice %48 {offsets = [0, 48], sizes = [16, 8], strides = [1, 1]} : vector<16x96xf32> to vector<16x8xf32>
    %96 = vector.shape_cast %95 : vector<16x8xf32> to vector<2x8x8xf32>
    %97 = vector.extract_strided_slice %48 {offsets = [0, 80], sizes = [16, 8], strides = [1, 1]} : vector<16x96xf32> to vector<16x8xf32>
    %98 = vector.shape_cast %97 : vector<16x8xf32> to vector<2x8x8xf32>
    "tpu.trace_start"() <{level = 10 : i32, message = "bqd,bkd->bqk"}> : () -> ()
    %cst_37 = arith.constant dense<0.000000e+00> : vector<2x8x8xf32>
    %99 = tpu.matmul %94, %96, %cst_37 {dimension_numbers = #tpu.dot_dimension_numbers<[2], [2], [1], [1], [0, 0, 0, 1, 1, 1], [0], [0]>} : vector<2x8x8xf32>, vector<2x8x8xf32>, vector<2x8x8xf32> -> vector<2x8x8xf32>
    "tpu.trace_stop"() : () -> ()
    %cst_38 = arith.constant 0.353553385 : f32
    %100 = vector.broadcast %cst_38 : f32 to vector<2x8x8xf32>
    %101 = arith.mulf %99, %100 : vector<2x8x8xf32>
    %102 = vector.broadcast %41 : vector<2x1x8xf32> to vector<2x8x8xf32>
    %103 = arith.addf %101, %102 : vector<2x8x8xf32>
    %cst_39 = arith.constant dense<0xFF800000> : vector<2x8xf32>
    %104 = vector.multi_reduction <maximumf>, %103, %cst_39 [2] : vector<2x8x8xf32> to vector<2x8xf32>
    %105 = vector.shape_cast %104 : vector<2x8xf32> to vector<2x8x1xf32>
    %106 = vector.broadcast %105 : vector<2x8x1xf32> to vector<2x8x8xf32>
    %107 = arith.subf %103, %106 : vector<2x8x8xf32>
    %108 = math.exp %107 : vector<2x8x8xf32>
    %cst_40 = arith.constant dense<0.000000e+00> : vector<2x8xf32>
    %109 = vector.multi_reduction <add>, %108, %cst_40 [2] : vector<2x8x8xf32> to vector<2x8xf32>
    %110 = vector.shape_cast %109 : vector<2x8xf32> to vector<2x8x1xf32>
    %111 = vector.broadcast %110 : vector<2x8x1xf32> to vector<2x8x8xf32>
    %112 = arith.divf %108, %111 : vector<2x8x8xf32>
    "tpu.trace_start"() <{level = 10 : i32, message = "bqk,bkd->bqd"}> : () -> ()
    %cst_41 = arith.constant dense<0.000000e+00> : vector<2x8x8xf32>
    %113 = tpu.matmul %112, %98, %cst_41 {dimension_numbers = #tpu.dot_dimension_numbers<[2], [1], [1], [2], [0, 0, 0, 1, 1, 2], [0], [0]>} : vector<2x8x8xf32>, vector<2x8x8xf32>, vector<2x8x8xf32> -> vector<2x8x8xf32>
    "tpu.trace_stop"() : () -> ()
    %114 = vector.shape_cast %113 : vector<2x8x8xf32> to vector<16x8xf32>
    %115 = vector.extract_strided_slice %48 {offsets = [0, 24], sizes = [16, 8], strides = [1, 1]} : vector<16x96xf32> to vector<16x8xf32>
    %116 = vector.shape_cast %115 : vector<16x8xf32> to vector<2x8x8xf32>
    %117 = vector.extract_strided_slice %48 {offsets = [0, 56], sizes = [16, 8], strides = [1, 1]} : vector<16x96xf32> to vector<16x8xf32>
    %118 = vector.shape_cast %117 : vector<16x8xf32> to vector<2x8x8xf32>
    %119 = vector.extract_strided_slice %48 {offsets = [0, 88], sizes = [16, 8], strides = [1, 1]} : vector<16x96xf32> to vector<16x8xf32>
    %120 = vector.shape_cast %119 : vector<16x8xf32> to vector<2x8x8xf32>
    "tpu.trace_start"() <{level = 10 : i32, message = "bqd,bkd->bqk"}> : () -> ()
    %cst_42 = arith.constant dense<0.000000e+00> : vector<2x8x8xf32>
    %121 = tpu.matmul %116, %118, %cst_42 {dimension_numbers = #tpu.dot_dimension_numbers<[2], [2], [1], [1], [0, 0, 0, 1, 1, 1], [0], [0]>} : vector<2x8x8xf32>, vector<2x8x8xf32>, vector<2x8x8xf32> -> vector<2x8x8xf32>
    "tpu.trace_stop"() : () -> ()
    %cst_43 = arith.constant 0.353553385 : f32
    %122 = vector.broadcast %cst_43 : f32 to vector<2x8x8xf32>
    %123 = arith.mulf %121, %122 : vector<2x8x8xf32>
    %124 = vector.broadcast %41 : vector<2x1x8xf32> to vector<2x8x8xf32>
    %125 = arith.addf %123, %124 : vector<2x8x8xf32>
    %cst_44 = arith.constant dense<0xFF800000> : vector<2x8xf32>
    %126 = vector.multi_reduction <maximumf>, %125, %cst_44 [2] : vector<2x8x8xf32> to vector<2x8xf32>
    %127 = vector.shape_cast %126 : vector<2x8xf32> to vector<2x8x1xf32>
    %128 = vector.broadcast %127 : vector<2x8x1xf32> to vector<2x8x8xf32>
    %129 = arith.subf %125, %128 : vector<2x8x8xf32>
    %130 = math.exp %129 : vector<2x8x8xf32>
    %cst_45 = arith.constant dense<0.000000e+00> : vector<2x8xf32>
    %131 = vector.multi_reduction <add>, %130, %cst_45 [2] : vector<2x8x8xf32> to vector<2x8xf32>
    %132 = vector.shape_cast %131 : vector<2x8xf32> to vector<2x8x1xf32>
    %133 = vector.broadcast %132 : vector<2x8x1xf32> to vector<2x8x8xf32>
    %134 = arith.divf %130, %133 : vector<2x8x8xf32>
    "tpu.trace_start"() <{level = 10 : i32, message = "bqk,bkd->bqd"}> : () -> ()
    %cst_46 = arith.constant dense<0.000000e+00> : vector<2x8x8xf32>
    %135 = tpu.matmul %134, %120, %cst_46 {dimension_numbers = #tpu.dot_dimension_numbers<[2], [1], [1], [2], [0, 0, 0, 1, 1, 2], [0], [0]>} : vector<2x8x8xf32>, vector<2x8x8xf32>, vector<2x8x8xf32> -> vector<2x8x8xf32>
    "tpu.trace_stop"() : () -> ()
    %136 = vector.shape_cast %135 : vector<2x8x8xf32> to vector<16x8xf32>
    %137 = tpu.concatenate %70, %92, %114, %136 in 1 : vector<16x8xf32>, vector<16x8xf32>, vector<16x8xf32>, vector<16x8xf32> -> vector<16x32xf32>
    %c0_47 = arith.constant 0 : index
    %c0_48 = arith.constant 0 : index
    %c0_49 = arith.constant 0 : index
    %138 = vector.load %arg3[%c0_47, %c0_48, %c0_49] : memref<2x1x32xf32, #tpu.memory_space<vmem>>, vector<1x1x32xf32>
    %139 = vector.shape_cast %138 : vector<1x1x32xf32> to vector<1x32xf32>
    %140 = vector.broadcast %139 : vector<1x32xf32> to vector<16x32xf32>
    %141 = arith.mulf %137, %140 : vector<16x32xf32>
    %c0_50 = arith.constant 0 : index
    %c0_51 = arith.constant 0 : index
    %c0_52 = arith.constant 0 : index
    %142 = vector.load %arg11[%c0_50, %c0_51, %c0_52] : memref<2x32x32xf32, #tpu.memory_space<vmem>>, vector<1x32x32xf32>
    %143 = vector.shape_cast %142 : vector<1x32x32xf32> to vector<32x32xf32>
    %cst_53 = arith.constant dense<0.000000e+00> : vector<16x32xf32>
    %144 = tpu.matmul %141, %143, %cst_53 {dimension_numbers = #tpu.dot_dimension_numbers<[1], [0], [0], [1], [0, 0, 1, 1], [], []>} : vector<16x32xf32>, vector<32x32xf32>, vector<16x32xf32> -> vector<16x32xf32>
    %c0_54 = arith.constant 0 : index
    %c0_55 = arith.constant 0 : index
    %c0_56 = arith.constant 0 : index
    %145 = vector.load %arg12[%c0_54, %c0_55, %c0_56] : memref<2x1x32xf32, #tpu.memory_space<vmem>>, vector<1x1x32xf32>
    %146 = vector.shape_cast %145 : vector<1x1x32xf32> to vector<1x32xf32>
    %147 = vector.broadcast %146 : vector<1x32xf32> to vector<16x32xf32>
    %148 = arith.addf %144, %147 : vector<16x32xf32>
    %149 = arith.addf %148, %35 : vector<16x32xf32>
    %c0_57 = arith.constant 0 : index
    %c0_58 = arith.constant 0 : index
    %c0_59 = arith.constant 0 : index
    %150 = vector.load %arg13[%c0_57, %c0_58, %c0_59] : memref<2x1x32xf32, #tpu.memory_space<vmem>>, vector<1x1x32xf32>
    %151 = vector.shape_cast %150 : vector<1x1x32xf32> to vector<1x32xf32>
    %c0_60 = arith.constant 0 : index
    %c0_61 = arith.constant 0 : index
    %c0_62 = arith.constant 0 : index
    %152 = vector.load %arg14[%c0_60, %c0_61, %c0_62] : memref<2x1x32xf32, #tpu.memory_space<vmem>>, vector<1x1x32xf32>
    %153 = vector.shape_cast %152 : vector<1x1x32xf32> to vector<1x32xf32>
    %cst_63 = arith.constant dense<0.000000e+00> : vector<16xf32>
    %154 = vector.multi_reduction <add>, %149, %cst_63 [1] : vector<16x32xf32> to vector<16xf32>
    %155 = vector.shape_cast %154 : vector<16xf32> to vector<16x1xf32>
    %cst_64 = arith.constant 3.200000e+01 : f32
    %156 = vector.broadcast %cst_64 : f32 to vector<16x1xf32>
    %157 = arith.divf %155, %156 : vector<16x1xf32>
    %158 = vector.broadcast %157 : vector<16x1xf32> to vector<16x32xf32>
    %159 = arith.subf %149, %158 : vector<16x32xf32>
    %160 = arith.mulf %159, %159 : vector<16x32xf32>
    %cst_65 = arith.constant dense<0.000000e+00> : vector<16xf32>
    %161 = vector.multi_reduction <add>, %160, %cst_65 [1] : vector<16x32xf32> to vector<16xf32>
    %162 = vector.shape_cast %161 : vector<16xf32> to vector<16x1xf32>
    %cst_66 = arith.constant 3.200000e+01 : f32
    %163 = vector.broadcast %cst_66 : f32 to vector<16x1xf32>
    %164 = arith.divf %162, %163 : vector<16x1xf32>
    %cst_67 = arith.constant 9.99999996E-13 : f32
    %165 = vector.broadcast %cst_67 : f32 to vector<16x1xf32>
    %166 = arith.addf %164, %165 : vector<16x1xf32>
    %167 = math.rsqrt %166 : vector<16x1xf32>
    %168 = vector.broadcast %167 : vector<16x1xf32> to vector<16x32xf32>
    %169 = arith.mulf %159, %168 : vector<16x32xf32>
    %170 = vector.broadcast %151 : vector<1x32xf32> to vector<16x32xf32>
    %171 = arith.mulf %169, %170 : vector<16x32xf32>
    %172 = vector.broadcast %153 : vector<1x32xf32> to vector<16x32xf32>
    %173 = arith.addf %171, %172 : vector<16x32xf32>
    %c0_68 = arith.constant 0 : index
    %c0_69 = arith.constant 0 : index
    %c0_70 = arith.constant 0 : index
    %174 = vector.load %arg15[%c0_68, %c0_69, %c0_70] : memref<2x32x64xf32, #tpu.memory_space<vmem>>, vector<1x32x64xf32>
    %175 = vector.shape_cast %174 : vector<1x32x64xf32> to vector<32x64xf32>
    %cst_71 = arith.constant dense<0.000000e+00> : vector<16x64xf32>
    %176 = tpu.matmul %173, %175, %cst_71 {dimension_numbers = #tpu.dot_dimension_numbers<[1], [0], [0], [1], [0, 0, 1, 1], [], []>} : vector<16x32xf32>, vector<32x64xf32>, vector<16x64xf32> -> vector<16x64xf32>
    %c0_72 = arith.constant 0 : index
    %c0_73 = arith.constant 0 : index
    %c0_74 = arith.constant 0 : index
    %177 = vector.load %arg16[%c0_72, %c0_73, %c0_74] : memref<2x1x64xf32, #tpu.memory_space<vmem>>, vector<1x1x64xf32>
    %178 = vector.shape_cast %177 : vector<1x1x64xf32> to vector<1x64xf32>
    %179 = vector.broadcast %178 : vector<1x64xf32> to vector<16x64xf32>
    %180 = arith.addf %176, %179 : vector<16x64xf32>
    %cst_75 = arith.constant 5.000000e-01 : f32
    %181 = vector.broadcast %cst_75 : f32 to vector<16x64xf32>
    %182 = arith.mulf %181, %180 : vector<16x64xf32>
    %cst_76 = arith.constant 0.707106769 : f32
    %183 = vector.broadcast %cst_76 : f32 to vector<16x64xf32>
    %184 = arith.mulf %180, %183 : vector<16x64xf32>
    %185 = math.erf %184 : vector<16x64xf32>
    %cst_77 = arith.constant 1.000000e+00 : f32
    %186 = vector.broadcast %cst_77 : f32 to vector<16x64xf32>
    %187 = arith.addf %186, %185 : vector<16x64xf32>
    %188 = arith.mulf %182, %187 : vector<16x64xf32>
    %c0_78 = arith.constant 0 : index
    %c0_79 = arith.constant 0 : index
    %c0_80 = arith.constant 0 : index
    %189 = vector.load %arg17[%c0_78, %c0_79, %c0_80] : memref<2x64x32xf32, #tpu.memory_space<vmem>>, vector<1x64x32xf32>
    %190 = vector.shape_cast %189 : vector<1x64x32xf32> to vector<64x32xf32>
    %cst_81 = arith.constant dense<0.000000e+00> : vector<16x32xf32>
    %191 = tpu.matmul %188, %190, %cst_81 {dimension_numbers = #tpu.dot_dimension_numbers<[1], [0], [0], [1], [0, 0, 1, 1], [], []>} : vector<16x64xf32>, vector<64x32xf32>, vector<16x32xf32> -> vector<16x32xf32>
    %c0_82 = arith.constant 0 : index
    %c0_83 = arith.constant 0 : index
    %c0_84 = arith.constant 0 : index
    %192 = vector.load %arg18[%c0_82, %c0_83, %c0_84] : memref<2x1x32xf32, #tpu.memory_space<vmem>>, vector<1x1x32xf32>
    %193 = vector.shape_cast %192 : vector<1x1x32xf32> to vector<1x32xf32>
    %194 = vector.broadcast %193 : vector<1x32xf32> to vector<16x32xf32>
    %195 = arith.addf %191, %194 : vector<16x32xf32>
    %196 = arith.addf %195, %173 : vector<16x32xf32>
    %c0_85 = arith.constant 0 : index
    %c0_86 = arith.constant 0 : index
    %c0_87 = arith.constant 0 : index
    %197 = vector.load %arg19[%c0_85, %c0_86, %c0_87] : memref<2x1x32xf32, #tpu.memory_space<vmem>>, vector<1x1x32xf32>
    %198 = vector.shape_cast %197 : vector<1x1x32xf32> to vector<1x32xf32>
    %c0_88 = arith.constant 0 : index
    %c0_89 = arith.constant 0 : index
    %c0_90 = arith.constant 0 : index
    %199 = vector.load %arg20[%c0_88, %c0_89, %c0_90] : memref<2x1x32xf32, #tpu.memory_space<vmem>>, vector<1x1x32xf32>
    %200 = vector.shape_cast %199 : vector<1x1x32xf32> to vector<1x32xf32>
    %cst_91 = arith.constant dense<0.000000e+00> : vector<16xf32>
    %201 = vector.multi_reduction <add>, %196, %cst_91 [1] : vector<16x32xf32> to vector<16xf32>
    %202 = vector.shape_cast %201 : vector<16xf32> to vector<16x1xf32>
    %cst_92 = arith.constant 3.200000e+01 : f32
    %203 = vector.broadcast %cst_92 : f32 to vector<16x1xf32>
    %204 = arith.divf %202, %203 : vector<16x1xf32>
    %205 = vector.broadcast %204 : vector<16x1xf32> to vector<16x32xf32>
    %206 = arith.subf %196, %205 : vector<16x32xf32>
    %207 = arith.mulf %206, %206 : vector<16x32xf32>
    %cst_93 = arith.constant dense<0.000000e+00> : vector<16xf32>
    %208 = vector.multi_reduction <add>, %207, %cst_93 [1] : vector<16x32xf32> to vector<16xf32>
    %209 = vector.shape_cast %208 : vector<16xf32> to vector<16x1xf32>
    %cst_94 = arith.constant 3.200000e+01 : f32
    %210 = vector.broadcast %cst_94 : f32 to vector<16x1xf32>
    %211 = arith.divf %209, %210 : vector<16x1xf32>
    %cst_95 = arith.constant 9.99999996E-13 : f32
    %212 = vector.broadcast %cst_95 : f32 to vector<16x1xf32>
    %213 = arith.addf %211, %212 : vector<16x1xf32>
    %214 = math.rsqrt %213 : vector<16x1xf32>
    %215 = vector.broadcast %214 : vector<16x1xf32> to vector<16x32xf32>
    %216 = arith.mulf %206, %215 : vector<16x32xf32>
    %217 = vector.broadcast %198 : vector<1x32xf32> to vector<16x32xf32>
    %218 = arith.mulf %216, %217 : vector<16x32xf32>
    %219 = vector.broadcast %200 : vector<1x32xf32> to vector<16x32xf32>
    %220 = arith.addf %218, %219 : vector<16x32xf32>
    %c1 = arith.constant 1 : index
    %c0_96 = arith.constant 0 : index
    %c0_97 = arith.constant 0 : index
    %221 = vector.load %arg9[%c1, %c0_96, %c0_97] : memref<2x32x96xf32, #tpu.memory_space<vmem>>, vector<1x32x96xf32>
    %222 = vector.shape_cast %221 : vector<1x32x96xf32> to vector<32x96xf32>
    %cst_98 = arith.constant dense<0.000000e+00> : vector<16x96xf32>
    %223 = tpu.matmul %220, %222, %cst_98 {dimension_numbers = #tpu.dot_dimension_numbers<[1], [0], [0], [1], [0, 0, 1, 1], [], []>} : vector<16x32xf32>, vector<32x96xf32>, vector<16x96xf32> -> vector<16x96xf32>
    %c1_99 = arith.constant 1 : index
    %c0_100 = arith.constant 0 : index
    %c0_101 = arith.constant 0 : index
    %224 = vector.load %arg10[%c1_99, %c0_100, %c0_101] : memref<2x1x96xf32, #tpu.memory_space<vmem>>, vector<1x1x96xf32>
    %225 = vector.shape_cast %224 : vector<1x1x96xf32> to vector<1x96xf32>
    %226 = vector.broadcast %225 : vector<1x96xf32> to vector<16x96xf32>
    %227 = arith.addf %223, %226 : vector<16x96xf32>
    %228 = vector.extract_strided_slice %227 {offsets = [0, 0], sizes = [16, 8], strides = [1, 1]} : vector<16x96xf32> to vector<16x8xf32>
    %229 = vector.shape_cast %228 : vector<16x8xf32> to vector<2x8x8xf32>
    %230 = vector.extract_strided_slice %227 {offsets = [0, 32], sizes = [16, 8], strides = [1, 1]} : vector<16x96xf32> to vector<16x8xf32>
    %231 = vector.shape_cast %230 : vector<16x8xf32> to vector<2x8x8xf32>
    %232 = vector.extract_strided_slice %227 {offsets = [0, 64], sizes = [16, 8], strides = [1, 1]} : vector<16x96xf32> to vector<16x8xf32>
    %233 = vector.shape_cast %232 : vector<16x8xf32> to vector<2x8x8xf32>
    "tpu.trace_start"() <{level = 10 : i32, message = "bqd,bkd->bqk"}> : () -> ()
    %cst_102 = arith.constant dense<0.000000e+00> : vector<2x8x8xf32>
    %234 = tpu.matmul %229, %231, %cst_102 {dimension_numbers = #tpu.dot_dimension_numbers<[2], [2], [1], [1], [0, 0, 0, 1, 1, 1], [0], [0]>} : vector<2x8x8xf32>, vector<2x8x8xf32>, vector<2x8x8xf32> -> vector<2x8x8xf32>
    "tpu.trace_stop"() : () -> ()
    %cst_103 = arith.constant 0.353553385 : f32
    %235 = vector.broadcast %cst_103 : f32 to vector<2x8x8xf32>
    %236 = arith.mulf %234, %235 : vector<2x8x8xf32>
    %237 = vector.broadcast %41 : vector<2x1x8xf32> to vector<2x8x8xf32>
    %238 = arith.addf %236, %237 : vector<2x8x8xf32>
    %cst_104 = arith.constant dense<0xFF800000> : vector<2x8xf32>
    %239 = vector.multi_reduction <maximumf>, %238, %cst_104 [2] : vector<2x8x8xf32> to vector<2x8xf32>
    %240 = vector.shape_cast %239 : vector<2x8xf32> to vector<2x8x1xf32>
    %241 = vector.broadcast %240 : vector<2x8x1xf32> to vector<2x8x8xf32>
    %242 = arith.subf %238, %241 : vector<2x8x8xf32>
    %243 = math.exp %242 : vector<2x8x8xf32>
    %cst_105 = arith.constant dense<0.000000e+00> : vector<2x8xf32>
    %244 = vector.multi_reduction <add>, %243, %cst_105 [2] : vector<2x8x8xf32> to vector<2x8xf32>
    %245 = vector.shape_cast %244 : vector<2x8xf32> to vector<2x8x1xf32>
    %246 = vector.broadcast %245 : vector<2x8x1xf32> to vector<2x8x8xf32>
    %247 = arith.divf %243, %246 : vector<2x8x8xf32>
    "tpu.trace_start"() <{level = 10 : i32, message = "bqk,bkd->bqd"}> : () -> ()
    %cst_106 = arith.constant dense<0.000000e+00> : vector<2x8x8xf32>
    %248 = tpu.matmul %247, %233, %cst_106 {dimension_numbers = #tpu.dot_dimension_numbers<[2], [1], [1], [2], [0, 0, 0, 1, 1, 2], [0], [0]>} : vector<2x8x8xf32>, vector<2x8x8xf32>, vector<2x8x8xf32> -> vector<2x8x8xf32>
    "tpu.trace_stop"() : () -> ()
    %249 = vector.shape_cast %248 : vector<2x8x8xf32> to vector<16x8xf32>
    %250 = vector.extract_strided_slice %227 {offsets = [0, 8], sizes = [16, 8], strides = [1, 1]} : vector<16x96xf32> to vector<16x8xf32>
    %251 = vector.shape_cast %250 : vector<16x8xf32> to vector<2x8x8xf32>
    %252 = vector.extract_strided_slice %227 {offsets = [0, 40], sizes = [16, 8], strides = [1, 1]} : vector<16x96xf32> to vector<16x8xf32>
    %253 = vector.shape_cast %252 : vector<16x8xf32> to vector<2x8x8xf32>
    %254 = vector.extract_strided_slice %227 {offsets = [0, 72], sizes = [16, 8], strides = [1, 1]} : vector<16x96xf32> to vector<16x8xf32>
    %255 = vector.shape_cast %254 : vector<16x8xf32> to vector<2x8x8xf32>
    "tpu.trace_start"() <{level = 10 : i32, message = "bqd,bkd->bqk"}> : () -> ()
    %cst_107 = arith.constant dense<0.000000e+00> : vector<2x8x8xf32>
    %256 = tpu.matmul %251, %253, %cst_107 {dimension_numbers = #tpu.dot_dimension_numbers<[2], [2], [1], [1], [0, 0, 0, 1, 1, 1], [0], [0]>} : vector<2x8x8xf32>, vector<2x8x8xf32>, vector<2x8x8xf32> -> vector<2x8x8xf32>
    "tpu.trace_stop"() : () -> ()
    %cst_108 = arith.constant 0.353553385 : f32
    %257 = vector.broadcast %cst_108 : f32 to vector<2x8x8xf32>
    %258 = arith.mulf %256, %257 : vector<2x8x8xf32>
    %259 = vector.broadcast %41 : vector<2x1x8xf32> to vector<2x8x8xf32>
    %260 = arith.addf %258, %259 : vector<2x8x8xf32>
    %cst_109 = arith.constant dense<0xFF800000> : vector<2x8xf32>
    %261 = vector.multi_reduction <maximumf>, %260, %cst_109 [2] : vector<2x8x8xf32> to vector<2x8xf32>
    %262 = vector.shape_cast %261 : vector<2x8xf32> to vector<2x8x1xf32>
    %263 = vector.broadcast %262 : vector<2x8x1xf32> to vector<2x8x8xf32>
    %264 = arith.subf %260, %263 : vector<2x8x8xf32>
    %265 = math.exp %264 : vector<2x8x8xf32>
    %cst_110 = arith.constant dense<0.000000e+00> : vector<2x8xf32>
    %266 = vector.multi_reduction <add>, %265, %cst_110 [2] : vector<2x8x8xf32> to vector<2x8xf32>
    %267 = vector.shape_cast %266 : vector<2x8xf32> to vector<2x8x1xf32>
    %268 = vector.broadcast %267 : vector<2x8x1xf32> to vector<2x8x8xf32>
    %269 = arith.divf %265, %268 : vector<2x8x8xf32>
    "tpu.trace_start"() <{level = 10 : i32, message = "bqk,bkd->bqd"}> : () -> ()
    %cst_111 = arith.constant dense<0.000000e+00> : vector<2x8x8xf32>
    %270 = tpu.matmul %269, %255, %cst_111 {dimension_numbers = #tpu.dot_dimension_numbers<[2], [1], [1], [2], [0, 0, 0, 1, 1, 2], [0], [0]>} : vector<2x8x8xf32>, vector<2x8x8xf32>, vector<2x8x8xf32> -> vector<2x8x8xf32>
    "tpu.trace_stop"() : () -> ()
    %271 = vector.shape_cast %270 : vector<2x8x8xf32> to vector<16x8xf32>
    %272 = vector.extract_strided_slice %227 {offsets = [0, 16], sizes = [16, 8], strides = [1, 1]} : vector<16x96xf32> to vector<16x8xf32>
    %273 = vector.shape_cast %272 : vector<16x8xf32> to vector<2x8x8xf32>
    %274 = vector.extract_strided_slice %227 {offsets = [0, 48], sizes = [16, 8], strides = [1, 1]} : vector<16x96xf32> to vector<16x8xf32>
    %275 = vector.shape_cast %274 : vector<16x8xf32> to vector<2x8x8xf32>
    %276 = vector.extract_strided_slice %227 {offsets = [0, 80], sizes = [16, 8], strides = [1, 1]} : vector<16x96xf32> to vector<16x8xf32>
    %277 = vector.shape_cast %276 : vector<16x8xf32> to vector<2x8x8xf32>
    "tpu.trace_start"() <{level = 10 : i32, message = "bqd,bkd->bqk"}> : () -> ()
    %cst_112 = arith.constant dense<0.000000e+00> : vector<2x8x8xf32>
    %278 = tpu.matmul %273, %275, %cst_112 {dimension_numbers = #tpu.dot_dimension_numbers<[2], [2], [1], [1], [0, 0, 0, 1, 1, 1], [0], [0]>} : vector<2x8x8xf32>, vector<2x8x8xf32>, vector<2x8x8xf32> -> vector<2x8x8xf32>
    "tpu.trace_stop"() : () -> ()
    %cst_113 = arith.constant 0.353553385 : f32
    %279 = vector.broadcast %cst_113 : f32 to vector<2x8x8xf32>
    %280 = arith.mulf %278, %279 : vector<2x8x8xf32>
    %281 = vector.broadcast %41 : vector<2x1x8xf32> to vector<2x8x8xf32>
    %282 = arith.addf %280, %281 : vector<2x8x8xf32>
    %cst_114 = arith.constant dense<0xFF800000> : vector<2x8xf32>
    %283 = vector.multi_reduction <maximumf>, %282, %cst_114 [2] : vector<2x8x8xf32> to vector<2x8xf32>
    %284 = vector.shape_cast %283 : vector<2x8xf32> to vector<2x8x1xf32>
    %285 = vector.broadcast %284 : vector<2x8x1xf32> to vector<2x8x8xf32>
    %286 = arith.subf %282, %285 : vector<2x8x8xf32>
    %287 = math.exp %286 : vector<2x8x8xf32>
    %cst_115 = arith.constant dense<0.000000e+00> : vector<2x8xf32>
    %288 = vector.multi_reduction <add>, %287, %cst_115 [2] : vector<2x8x8xf32> to vector<2x8xf32>
    %289 = vector.shape_cast %288 : vector<2x8xf32> to vector<2x8x1xf32>
    %290 = vector.broadcast %289 : vector<2x8x1xf32> to vector<2x8x8xf32>
    %291 = arith.divf %287, %290 : vector<2x8x8xf32>
    "tpu.trace_start"() <{level = 10 : i32, message = "bqk,bkd->bqd"}> : () -> ()
    %cst_116 = arith.constant dense<0.000000e+00> : vector<2x8x8xf32>
    %292 = tpu.matmul %291, %277, %cst_116 {dimension_numbers = #tpu.dot_dimension_numbers<[2], [1], [1], [2], [0, 0, 0, 1, 1, 2], [0], [0]>} : vector<2x8x8xf32>, vector<2x8x8xf32>, vector<2x8x8xf32> -> vector<2x8x8xf32>
    "tpu.trace_stop"() : () -> ()
    %293 = vector.shape_cast %292 : vector<2x8x8xf32> to vector<16x8xf32>
    %294 = vector.extract_strided_slice %227 {offsets = [0, 24], sizes = [16, 8], strides = [1, 1]} : vector<16x96xf32> to vector<16x8xf32>
    %295 = vector.shape_cast %294 : vector<16x8xf32> to vector<2x8x8xf32>
    %296 = vector.extract_strided_slice %227 {offsets = [0, 56], sizes = [16, 8], strides = [1, 1]} : vector<16x96xf32> to vector<16x8xf32>
    %297 = vector.shape_cast %296 : vector<16x8xf32> to vector<2x8x8xf32>
    %298 = vector.extract_strided_slice %227 {offsets = [0, 88], sizes = [16, 8], strides = [1, 1]} : vector<16x96xf32> to vector<16x8xf32>
    %299 = vector.shape_cast %298 : vector<16x8xf32> to vector<2x8x8xf32>
    "tpu.trace_start"() <{level = 10 : i32, message = "bqd,bkd->bqk"}> : () -> ()
    %cst_117 = arith.constant dense<0.000000e+00> : vector<2x8x8xf32>
    %300 = tpu.matmul %295, %297, %cst_117 {dimension_numbers = #tpu.dot_dimension_numbers<[2], [2], [1], [1], [0, 0, 0, 1, 1, 1], [0], [0]>} : vector<2x8x8xf32>, vector<2x8x8xf32>, vector<2x8x8xf32> -> vector<2x8x8xf32>
    "tpu.trace_stop"() : () -> ()
    %cst_118 = arith.constant 0.353553385 : f32
    %301 = vector.broadcast %cst_118 : f32 to vector<2x8x8xf32>
    %302 = arith.mulf %300, %301 : vector<2x8x8xf32>
    %303 = vector.broadcast %41 : vector<2x1x8xf32> to vector<2x8x8xf32>
    %304 = arith.addf %302, %303 : vector<2x8x8xf32>
    %cst_119 = arith.constant dense<0xFF800000> : vector<2x8xf32>
    %305 = vector.multi_reduction <maximumf>, %304, %cst_119 [2] : vector<2x8x8xf32> to vector<2x8xf32>
    %306 = vector.shape_cast %305 : vector<2x8xf32> to vector<2x8x1xf32>
    %307 = vector.broadcast %306 : vector<2x8x1xf32> to vector<2x8x8xf32>
    %308 = arith.subf %304, %307 : vector<2x8x8xf32>
    %309 = math.exp %308 : vector<2x8x8xf32>
    %cst_120 = arith.constant dense<0.000000e+00> : vector<2x8xf32>
    %310 = vector.multi_reduction <add>, %309, %cst_120 [2] : vector<2x8x8xf32> to vector<2x8xf32>
    %311 = vector.shape_cast %310 : vector<2x8xf32> to vector<2x8x1xf32>
    %312 = vector.broadcast %311 : vector<2x8x1xf32> to vector<2x8x8xf32>
    %313 = arith.divf %309, %312 : vector<2x8x8xf32>
    "tpu.trace_start"() <{level = 10 : i32, message = "bqk,bkd->bqd"}> : () -> ()
    %cst_121 = arith.constant dense<0.000000e+00> : vector<2x8x8xf32>
    %314 = tpu.matmul %313, %299, %cst_121 {dimension_numbers = #tpu.dot_dimension_numbers<[2], [1], [1], [2], [0, 0, 0, 1, 1, 2], [0], [0]>} : vector<2x8x8xf32>, vector<2x8x8xf32>, vector<2x8x8xf32> -> vector<2x8x8xf32>
    "tpu.trace_stop"() : () -> ()
    %315 = vector.shape_cast %314 : vector<2x8x8xf32> to vector<16x8xf32>
    %316 = tpu.concatenate %249, %271, %293, %315 in 1 : vector<16x8xf32>, vector<16x8xf32>, vector<16x8xf32>, vector<16x8xf32> -> vector<16x32xf32>
    %c1_122 = arith.constant 1 : index
    %c0_123 = arith.constant 0 : index
    %c0_124 = arith.constant 0 : index
    %317 = vector.load %arg3[%c1_122, %c0_123, %c0_124] : memref<2x1x32xf32, #tpu.memory_space<vmem>>, vector<1x1x32xf32>
    %318 = vector.shape_cast %317 : vector<1x1x32xf32> to vector<1x32xf32>
    %319 = vector.broadcast %318 : vector<1x32xf32> to vector<16x32xf32>
    %320 = arith.mulf %316, %319 : vector<16x32xf32>
    %c1_125 = arith.constant 1 : index
    %c0_126 = arith.constant 0 : index
    %c0_127 = arith.constant 0 : index
    %321 = vector.load %arg11[%c1_125, %c0_126, %c0_127] : memref<2x32x32xf32, #tpu.memory_space<vmem>>, vector<1x32x32xf32>
    %322 = vector.shape_cast %321 : vector<1x32x32xf32> to vector<32x32xf32>
    %cst_128 = arith.constant dense<0.000000e+00> : vector<16x32xf32>
    %323 = tpu.matmul %320, %322, %cst_128 {dimension_numbers = #tpu.dot_dimension_numbers<[1], [0], [0], [1], [0, 0, 1, 1], [], []>} : vector<16x32xf32>, vector<32x32xf32>, vector<16x32xf32> -> vector<16x32xf32>
    %c1_129 = arith.constant 1 : index
    %c0_130 = arith.constant 0 : index
    %c0_131 = arith.constant 0 : index
    %324 = vector.load %arg12[%c1_129, %c0_130, %c0_131] : memref<2x1x32xf32, #tpu.memory_space<vmem>>, vector<1x1x32xf32>
    %325 = vector.shape_cast %324 : vector<1x1x32xf32> to vector<1x32xf32>
    %326 = vector.broadcast %325 : vector<1x32xf32> to vector<16x32xf32>
    %327 = arith.addf %323, %326 : vector<16x32xf32>
    %328 = arith.addf %327, %220 : vector<16x32xf32>
    %c1_132 = arith.constant 1 : index
    %c0_133 = arith.constant 0 : index
    %c0_134 = arith.constant 0 : index
    %329 = vector.load %arg13[%c1_132, %c0_133, %c0_134] : memref<2x1x32xf32, #tpu.memory_space<vmem>>, vector<1x1x32xf32>
    %330 = vector.shape_cast %329 : vector<1x1x32xf32> to vector<1x32xf32>
    %c1_135 = arith.constant 1 : index
    %c0_136 = arith.constant 0 : index
    %c0_137 = arith.constant 0 : index
    %331 = vector.load %arg14[%c1_135, %c0_136, %c0_137] : memref<2x1x32xf32, #tpu.memory_space<vmem>>, vector<1x1x32xf32>
    %332 = vector.shape_cast %331 : vector<1x1x32xf32> to vector<1x32xf32>
    %cst_138 = arith.constant dense<0.000000e+00> : vector<16xf32>
    %333 = vector.multi_reduction <add>, %328, %cst_138 [1] : vector<16x32xf32> to vector<16xf32>
    %334 = vector.shape_cast %333 : vector<16xf32> to vector<16x1xf32>
    %cst_139 = arith.constant 3.200000e+01 : f32
    %335 = vector.broadcast %cst_139 : f32 to vector<16x1xf32>
    %336 = arith.divf %334, %335 : vector<16x1xf32>
    %337 = vector.broadcast %336 : vector<16x1xf32> to vector<16x32xf32>
    %338 = arith.subf %328, %337 : vector<16x32xf32>
    %339 = arith.mulf %338, %338 : vector<16x32xf32>
    %cst_140 = arith.constant dense<0.000000e+00> : vector<16xf32>
    %340 = vector.multi_reduction <add>, %339, %cst_140 [1] : vector<16x32xf32> to vector<16xf32>
    %341 = vector.shape_cast %340 : vector<16xf32> to vector<16x1xf32>
    %cst_141 = arith.constant 3.200000e+01 : f32
    %342 = vector.broadcast %cst_141 : f32 to vector<16x1xf32>
    %343 = arith.divf %341, %342 : vector<16x1xf32>
    %cst_142 = arith.constant 9.99999996E-13 : f32
    %344 = vector.broadcast %cst_142 : f32 to vector<16x1xf32>
    %345 = arith.addf %343, %344 : vector<16x1xf32>
    %346 = math.rsqrt %345 : vector<16x1xf32>
    %347 = vector.broadcast %346 : vector<16x1xf32> to vector<16x32xf32>
    %348 = arith.mulf %338, %347 : vector<16x32xf32>
    %349 = vector.broadcast %330 : vector<1x32xf32> to vector<16x32xf32>
    %350 = arith.mulf %348, %349 : vector<16x32xf32>
    %351 = vector.broadcast %332 : vector<1x32xf32> to vector<16x32xf32>
    %352 = arith.addf %350, %351 : vector<16x32xf32>
    %c1_143 = arith.constant 1 : index
    %c0_144 = arith.constant 0 : index
    %c0_145 = arith.constant 0 : index
    %353 = vector.load %arg15[%c1_143, %c0_144, %c0_145] : memref<2x32x64xf32, #tpu.memory_space<vmem>>, vector<1x32x64xf32>
    %354 = vector.shape_cast %353 : vector<1x32x64xf32> to vector<32x64xf32>
    %cst_146 = arith.constant dense<0.000000e+00> : vector<16x64xf32>
    %355 = tpu.matmul %352, %354, %cst_146 {dimension_numbers = #tpu.dot_dimension_numbers<[1], [0], [0], [1], [0, 0, 1, 1], [], []>} : vector<16x32xf32>, vector<32x64xf32>, vector<16x64xf32> -> vector<16x64xf32>
    %c1_147 = arith.constant 1 : index
    %c0_148 = arith.constant 0 : index
    %c0_149 = arith.constant 0 : index
    %356 = vector.load %arg16[%c1_147, %c0_148, %c0_149] : memref<2x1x64xf32, #tpu.memory_space<vmem>>, vector<1x1x64xf32>
    %357 = vector.shape_cast %356 : vector<1x1x64xf32> to vector<1x64xf32>
    %358 = vector.broadcast %357 : vector<1x64xf32> to vector<16x64xf32>
    %359 = arith.addf %355, %358 : vector<16x64xf32>
    %cst_150 = arith.constant 5.000000e-01 : f32
    %360 = vector.broadcast %cst_150 : f32 to vector<16x64xf32>
    %361 = arith.mulf %360, %359 : vector<16x64xf32>
    %cst_151 = arith.constant 0.707106769 : f32
    %362 = vector.broadcast %cst_151 : f32 to vector<16x64xf32>
    %363 = arith.mulf %359, %362 : vector<16x64xf32>
    %364 = math.erf %363 : vector<16x64xf32>
    %cst_152 = arith.constant 1.000000e+00 : f32
    %365 = vector.broadcast %cst_152 : f32 to vector<16x64xf32>
    %366 = arith.addf %365, %364 : vector<16x64xf32>
    %367 = arith.mulf %361, %366 : vector<16x64xf32>
    %c1_153 = arith.constant 1 : index
    %c0_154 = arith.constant 0 : index
    %c0_155 = arith.constant 0 : index
    %368 = vector.load %arg17[%c1_153, %c0_154, %c0_155] : memref<2x64x32xf32, #tpu.memory_space<vmem>>, vector<1x64x32xf32>
    %369 = vector.shape_cast %368 : vector<1x64x32xf32> to vector<64x32xf32>
    %cst_156 = arith.constant dense<0.000000e+00> : vector<16x32xf32>
    %370 = tpu.matmul %367, %369, %cst_156 {dimension_numbers = #tpu.dot_dimension_numbers<[1], [0], [0], [1], [0, 0, 1, 1], [], []>} : vector<16x64xf32>, vector<64x32xf32>, vector<16x32xf32> -> vector<16x32xf32>
    %c1_157 = arith.constant 1 : index
    %c0_158 = arith.constant 0 : index
    %c0_159 = arith.constant 0 : index
    %371 = vector.load %arg18[%c1_157, %c0_158, %c0_159] : memref<2x1x32xf32, #tpu.memory_space<vmem>>, vector<1x1x32xf32>
    %372 = vector.shape_cast %371 : vector<1x1x32xf32> to vector<1x32xf32>
    %373 = vector.broadcast %372 : vector<1x32xf32> to vector<16x32xf32>
    %374 = arith.addf %370, %373 : vector<16x32xf32>
    %375 = arith.addf %374, %352 : vector<16x32xf32>
    %c1_160 = arith.constant 1 : index
    %c0_161 = arith.constant 0 : index
    %c0_162 = arith.constant 0 : index
    %376 = vector.load %arg19[%c1_160, %c0_161, %c0_162] : memref<2x1x32xf32, #tpu.memory_space<vmem>>, vector<1x1x32xf32>
    %377 = vector.shape_cast %376 : vector<1x1x32xf32> to vector<1x32xf32>
    %c1_163 = arith.constant 1 : index
    %c0_164 = arith.constant 0 : index
    %c0_165 = arith.constant 0 : index
    %378 = vector.load %arg20[%c1_163, %c0_164, %c0_165] : memref<2x1x32xf32, #tpu.memory_space<vmem>>, vector<1x1x32xf32>
    %379 = vector.shape_cast %378 : vector<1x1x32xf32> to vector<1x32xf32>
    %cst_166 = arith.constant dense<0.000000e+00> : vector<16xf32>
    %380 = vector.multi_reduction <add>, %375, %cst_166 [1] : vector<16x32xf32> to vector<16xf32>
    %381 = vector.shape_cast %380 : vector<16xf32> to vector<16x1xf32>
    %cst_167 = arith.constant 3.200000e+01 : f32
    %382 = vector.broadcast %cst_167 : f32 to vector<16x1xf32>
    %383 = arith.divf %381, %382 : vector<16x1xf32>
    %384 = vector.broadcast %383 : vector<16x1xf32> to vector<16x32xf32>
    %385 = arith.subf %375, %384 : vector<16x32xf32>
    %386 = arith.mulf %385, %385 : vector<16x32xf32>
    %cst_168 = arith.constant dense<0.000000e+00> : vector<16xf32>
    %387 = vector.multi_reduction <add>, %386, %cst_168 [1] : vector<16x32xf32> to vector<16xf32>
    %388 = vector.shape_cast %387 : vector<16xf32> to vector<16x1xf32>
    %cst_169 = arith.constant 3.200000e+01 : f32
    %389 = vector.broadcast %cst_169 : f32 to vector<16x1xf32>
    %390 = arith.divf %388, %389 : vector<16x1xf32>
    %cst_170 = arith.constant 9.99999996E-13 : f32
    %391 = vector.broadcast %cst_170 : f32 to vector<16x1xf32>
    %392 = arith.addf %390, %391 : vector<16x1xf32>
    %393 = math.rsqrt %392 : vector<16x1xf32>
    %394 = vector.broadcast %393 : vector<16x1xf32> to vector<16x32xf32>
    %395 = arith.mulf %385, %394 : vector<16x32xf32>
    %396 = vector.broadcast %377 : vector<1x32xf32> to vector<16x32xf32>
    %397 = arith.mulf %395, %396 : vector<16x32xf32>
    %398 = vector.broadcast %379 : vector<1x32xf32> to vector<16x32xf32>
    %399 = arith.addf %397, %398 : vector<16x32xf32>
    %400 = vector.shape_cast %399 : vector<16x32xf32> to vector<2x8x32xf32>
    %cst_171 = arith.constant dense<0.000000e+00> : vector<2x32xf32>
    %401 = vector.multi_reduction <add>, %400, %cst_171 [1] : vector<2x8x32xf32> to vector<2x32xf32>
    %cst_172 = arith.constant 8.000000e+00 : f32
    %402 = vector.broadcast %cst_172 : f32 to vector<2x32xf32>
    %403 = arith.divf %401, %402 : vector<2x32xf32>
    %c0_173 = arith.constant 0 : index
    %c0_174 = arith.constant 0 : index
    %404 = vector.load %arg21[%c0_173, %c0_174] : memref<32x32xf32, #tpu.memory_space<vmem>>, vector<32x32xf32>
    %cst_175 = arith.constant dense<0.000000e+00> : vector<2x32xf32>
    %405 = tpu.matmul %403, %404, %cst_175 {dimension_numbers = #tpu.dot_dimension_numbers<[1], [0], [0], [1], [0, 0, 1, 1], [], []>} : vector<2x32xf32>, vector<32x32xf32>, vector<2x32xf32> -> vector<2x32xf32>
    %c0_176 = arith.constant 0 : index
    %c0_177 = arith.constant 0 : index
    %406 = vector.load %arg22[%c0_176, %c0_177] : memref<1x32xf32, #tpu.memory_space<vmem>>, vector<1x32xf32>
    %407 = vector.broadcast %406 : vector<1x32xf32> to vector<2x32xf32>
    %408 = arith.addf %405, %407 : vector<2x32xf32>
    %c0_178 = arith.constant 0 : index
    %c0_179 = arith.constant 0 : index
    %409 = vector.load %arg23[%c0_178, %c0_179] : memref<32x2xf32, #tpu.memory_space<vmem>>, vector<32x2xf32>
    %cst_180 = arith.constant dense<0.000000e+00> : vector<2x2xf32>
    %410 = tpu.matmul %408, %409, %cst_180 {dimension_numbers = #tpu.dot_dimension_numbers<[1], [0], [0], [1], [0, 0, 1, 1], [], []>} : vector<2x32xf32>, vector<32x2xf32>, vector<2x2xf32> -> vector<2x2xf32>
    %c0_181 = arith.constant 0 : index
    %c0_182 = arith.constant 0 : index
    %411 = vector.load %arg24[%c0_181, %c0_182] : memref<1x2xf32, #tpu.memory_space<vmem>>, vector<1x2xf32>
    %412 = vector.broadcast %411 : vector<1x2xf32> to vector<2x2xf32>
    %413 = arith.addf %410, %412 : vector<2x2xf32>
    %c0_183 = arith.constant 0 : index
    %c0_184 = arith.constant 0 : index
    %414 = vector.load %arg25[%c0_183, %c0_184] : memref<2x2xf32, #tpu.memory_space<vmem>>, vector<2x2xf32>
    tpu.vector_store %arg25[%c0_183, %c0_184], %413 {strides = array<i32>} : memref<2x2xf32, #tpu.memory_space<vmem>>, vector<2x2xf32>,
    return
  }
  func.func @transform_0(%arg0: i32) -> (i32, i32) {
    %c0_i32 = arith.constant 0 : i32
    %c0_i32_0 = arith.constant 0 : i32
    %c0_i32_1 = arith.constant 0 : i32
    return %c0_i32, %c0_i32_0 : i32, i32
  }
  func.func @transform_1(%arg0: i32) -> (i32, i32) {
    %c0_i32 = arith.constant 0 : i32
    %c0_i32_0 = arith.constant 0 : i32
    %c0_i32_1 = arith.constant 0 : i32
    return %c0_i32, %c0_i32_0 : i32, i32
  }
  func.func @transform_2(%arg0: i32) -> (i32, i32, i32) {
    %c0_i32 = arith.constant 0 : i32
    %c0_i32_0 = arith.constant 0 : i32
    %c0_i32_1 = arith.constant 0 : i32
    %c0_i32_2 = arith.constant 0 : i32
    return %c0_i32, %c0_i32_0, %c0_i32_1 : i32, i32, i32
  }
  func.func @transform_3(%arg0: i32) -> (i32, i32) {
    %c0_i32 = arith.constant 0 : i32
    %c0_i32_0 = arith.constant 0 : i32
    %c0_i32_1 = arith.constant 0 : i32
    return %c0_i32, %c0_i32_0 : i32, i32
  }
  func.func @transform_4(%arg0: i32) -> (i32, i32) {
    %c0_i32 = arith.constant 0 : i32
    %c0_i32_0 = arith.constant 0 : i32
    %c0_i32_1 = arith.constant 0 : i32
    return %c0_i32, %c0_i32_0 : i32, i32
  }
  func.func @transform_5(%arg0: i32) -> (i32, i32) {
    %c0_i32 = arith.constant 0 : i32
    %c0_i32_0 = arith.constant 0 : i32
    %c0_i32_1 = arith.constant 0 : i32
    return %c0_i32, %c0_i32_0 : i32, i32
  }
  func.func @transform_6(%arg0: i32) -> (i32, i32) {
    %c0_i32 = arith.constant 0 : i32
    %c0_i32_0 = arith.constant 0 : i32
    %c0_i32_1 = arith.constant 0 : i32
    return %c0_i32, %c0_i32_0 : i32, i32
  }
  func.func @transform_7(%arg0: i32) -> (i32, i32) {
    %c0_i32 = arith.constant 0 : i32
    %c0_i32_0 = arith.constant 0 : i32
    %c0_i32_1 = arith.constant 0 : i32
    return %c0_i32, %c0_i32_0 : i32, i32
  }
  func.func @transform_8(%arg0: i32) -> (i32, i32, i32) {
    %c0_i32 = arith.constant 0 : i32
    %c0_i32_0 = arith.constant 0 : i32
    %c0_i32_1 = arith.constant 0 : i32
    %c0_i32_2 = arith.constant 0 : i32
    return %c0_i32, %c0_i32_0, %c0_i32_1 : i32, i32, i32
  }
  func.func @transform_9(%arg0: i32) -> (i32, i32, i32) {
    %c0_i32 = arith.constant 0 : i32
    %c0_i32_0 = arith.constant 0 : i32
    %c0_i32_1 = arith.constant 0 : i32
    %c0_i32_2 = arith.constant 0 : i32
    return %c0_i32, %c0_i32_0, %c0_i32_1 : i32, i32, i32
  }
  func.func @transform_10(%arg0: i32) -> (i32, i32, i32) {
    %c0_i32 = arith.constant 0 : i32
    %c0_i32_0 = arith.constant 0 : i32
    %c0_i32_1 = arith.constant 0 : i32
    %c0_i32_2 = arith.constant 0 : i32
    return %c0_i32, %c0_i32_0, %c0_i32_1 : i32, i32, i32
  }
  func.func @transform_11(%arg0: i32) -> (i32, i32, i32) {
    %c0_i32 = arith.constant 0 : i32
    %c0_i32_0 = arith.constant 0 : i32
    %c0_i32_1 = arith.constant 0 : i32
    %c0_i32_2 = arith.constant 0 : i32
    return %c0_i32, %c0_i32_0, %c0_i32_1 : i32, i32, i32
  }
  func.func @transform_12(%arg0: i32) -> (i32, i32, i32) {
    %c0_i32 = arith.constant 0 : i32
    %c0_i32_0 = arith.constant 0 : i32
    %c0_i32_1 = arith.constant 0 : i32
    %c0_i32_2 = arith.constant 0 : i32
    return %c0_i32, %c0_i32_0, %c0_i32_1 : i32, i32, i32
  }
  func.func @transform_13(%arg0: i32) -> (i32, i32, i32) {
    %c0_i32 = arith.constant 0 : i32
    %c0_i32_0 = arith.constant 0 : i32
    %c0_i32_1 = arith.constant 0 : i32
    %c0_i32_2 = arith.constant 0 : i32
    return %c0_i32, %c0_i32_0, %c0_i32_1 : i32, i32, i32
  }
  func.func @transform_14(%arg0: i32) -> (i32, i32, i32) {
    %c0_i32 = arith.constant 0 : i32
    %c0_i32_0 = arith.constant 0 : i32
    %c0_i32_1 = arith.constant 0 : i32
    %c0_i32_2 = arith.constant 0 : i32
    return %c0_i32, %c0_i32_0, %c0_i32_1 : i32, i32, i32
  }
  func.func @transform_15(%arg0: i32) -> (i32, i32, i32) {
    %c0_i32 = arith.constant 0 : i32
    %c0_i32_0 = arith.constant 0 : i32
    %c0_i32_1 = arith.constant 0 : i32
    %c0_i32_2 = arith.constant 0 : i32
    return %c0_i32, %c0_i32_0, %c0_i32_1 : i32, i32, i32
  }
  func.func @transform_16(%arg0: i32) -> (i32, i32, i32) {
    %c0_i32 = arith.constant 0 : i32
    %c0_i32_0 = arith.constant 0 : i32
    %c0_i32_1 = arith.constant 0 : i32
    %c0_i32_2 = arith.constant 0 : i32
    return %c0_i32, %c0_i32_0, %c0_i32_1 : i32, i32, i32
  }
  func.func @transform_17(%arg0: i32) -> (i32, i32, i32) {
    %c0_i32 = arith.constant 0 : i32
    %c0_i32_0 = arith.constant 0 : i32
    %c0_i32_1 = arith.constant 0 : i32
    %c0_i32_2 = arith.constant 0 : i32
    return %c0_i32, %c0_i32_0, %c0_i32_1 : i32, i32, i32
  }
  func.func @transform_18(%arg0: i32) -> (i32, i32, i32) {
    %c0_i32 = arith.constant 0 : i32
    %c0_i32_0 = arith.constant 0 : i32
    %c0_i32_1 = arith.constant 0 : i32
    %c0_i32_2 = arith.constant 0 : i32
    return %c0_i32, %c0_i32_0, %c0_i32_1 : i32, i32, i32
  }
  func.func @transform_19(%arg0: i32) -> (i32, i32, i32) {
    %c0_i32 = arith.constant 0 : i32
    %c0_i32_0 = arith.constant 0 : i32
    %c0_i32_1 = arith.constant 0 : i32
    %c0_i32_2 = arith.constant 0 : i32
    return %c0_i32, %c0_i32_0, %c0_i32_1 : i32, i32, i32
  }
  func.func @transform_20(%arg0: i32) -> (i32, i32) {
    %c0_i32 = arith.constant 0 : i32
    %c0_i32_0 = arith.constant 0 : i32
    %c0_i32_1 = arith.constant 0 : i32
    return %c0_i32, %c0_i32_0 : i32, i32
  }
  func.func @transform_21(%arg0: i32) -> (i32, i32) {
    %c0_i32 = arith.constant 0 : i32
    %c0_i32_0 = arith.constant 0 : i32
    %c0_i32_1 = arith.constant 0 : i32
    return %c0_i32, %c0_i32_0 : i32, i32
  }
  func.func @transform_22(%arg0: i32) -> (i32, i32) {
    %c0_i32 = arith.constant 0 : i32
    %c0_i32_0 = arith.constant 0 : i32
    %c0_i32_1 = arith.constant 0 : i32
    return %c0_i32, %c0_i32_0 : i32, i32
  }
  func.func @transform_23(%arg0: i32) -> (i32, i32) {
    %c0_i32 = arith.constant 0 : i32
    %c0_i32_0 = arith.constant 0 : i32
    %c0_i32_1 = arith.constant 0 : i32
    return %c0_i32, %c0_i32_0 : i32, i32
  }
  func.func @transform_24(%arg0: i32) -> (i32, i32) {
    %c0_i32 = arith.constant 0 : i32
    %c0_i32_0 = arith.constant 0 : i32
    %c0_i32_1 = arith.constant 0 : i32
    return %c0_i32, %c0_i32_0 : i32, i32
  }
}

</mosaic_0001>

<bundles_post_ra>
// kernel: _lambda_.1
= control target key start
LH: loop header
LB: loop body
LE: loop exit
PB: predicated region body
PF: predicated region fallthrough
CT: control target
= control target key end

     0   :  { %s6048_s0 = inlined_call_operand.vmem [shape: s32[16,1], index: 0, kind: input, shape index: {}]   ;;  %s6049_s1 = inlined_call_operand.vmem [shape: f32[2,8], index: 1, kind: input, shape index: {}]   ;;  %s6050_s2 = inlined_call_operand.vmem [shape: f32[2,1,32], index: 2, kind: input, shape index: {}]   ;;  %s6051_s3 = inlined_call_operand.hbm [shape: f32[100,32], index: 3, kind: input, shape index: {}]   ;;  %s6052_s4 = inlined_call_operand.hbm [shape: f32[16,32], index: 4, kind: input, shape index: {}]   ;;  %s6053_s5 = inlined_call_operand.vmem [shape: f32[2,32], index: 5, kind: input, shape index: {}]   ;;  %s6054_s6 = inlined_call_operand.vmem [shape: f32[1,32], index: 6, kind: input, shape index: {}]   ;;  %s6055_s7 = inlined_call_operand.vmem [shape: f32[1,32], index: 7, kind: input, shape index: {}, may-alias: {7,21}]   ;;  %s6056_s8 = inlined_call_operand.hbm [shape: f32[2,32,96], index: 8, kind: input, shape index: {}]   ;;  %s6057_s9 = inlined_call_operand.vmem [shape: f32[2,1,96], index: 9, kind: input, shape index: {}]   ;;  %s6058_s10 = inlined_call_operand.hbm [shape: f32[2,32,32], index: 10, kind: input, shape index: {}]   ;;  %s6059_s11 = inlined_call_operand.vmem [shape: f32[2,1,32], index: 11, kind: input, shape index: {}, may-alias: {11,13,17,19}]   ;;  %s6060_s12 = inlined_call_operand.vmem [shape: f32[2,1,32], index: 12, kind: input, shape index: {}, may-alias: {12,18}]   ;;  %s6061_s13 = inlined_call_operand.vmem [shape: f32[2,1,32], index: 13, kind: input, shape index: {}, may-alias: {11,13,17,19}]   ;;  %s6062_s14 = inlined_call_operand.vmem [shape: f32[2,32,64], index: 14, kind: input, shape index: {}]   ;;  %s6063_s15 = inlined_call_operand.vmem [shape: f32[2,1,64], index: 15, kind: input, shape index: {}]   ;;  %s6064_s16 = inlined_call_operand.hbm [shape: f32[2,64,32], index: 16, kind: input, shape index: {}]   ;;  %s6065_s17 = inlined_call_operand.vmem [shape: f32[2,1,32], index: 17, kind: input, shape index: {}, may-alias: {11,13,17,19}]   ;;  %s6066_s18 = inlined_call_operand.vmem [shape: f32[2,1,32], index: 18, kind: input, shape index: {}, may-alias: {12,18}]   ;;  %s6067_s19 = inlined_call_operand.vmem [shape: f32[2,1,32], index: 19, kind: input, shape index: {}, may-alias: {11,13,17,19}]   ;;  %s6068_s20 = inlined_call_operand.hbm [shape: f32[32,32], index: 20, kind: input, shape index: {}]   ;;  %s6069_s21 = inlined_call_operand.vmem [shape: f32[1,32], index: 21, kind: input, shape index: {}, may-alias: {7,21}]   ;;  %s6070_s22 = inlined_call_operand.vmem [shape: f32[32,2], index: 22, kind: input, shape index: {}]   ;;  %s6071_s23 = inlined_call_operand.vmem [shape: f32[1,2], index: 23, kind: input, shape index: {}]   ;;  %s6072_s24 = inlined_call_operand.hbm [shape: f32[2,2], index: 24, kind: output, shape index: {}]  }
   0x1   :  { %6085 = sst [smem:[#allocation19_spill]] %s6048_s0 }
   0x2   :  { %6086 = sst [smem:[#allocation20_spill]] %s6049_s1 }
   0x3   :  { %6087 = sst [smem:[#allocation21_spill]] %s6050_s2 }
   0x4   :  { %6088 = sst [smem:[#allocation22_spill]] %s6051_s3 }
   0x5   :  { %6089 = sst [smem:[#allocation23_spill]] %s6052_s4 }
   0x6   :  { %6090 = sst [smem:[#allocation24_spill]] %s6053_s5 }
   0x7   :  { %6091 = sst [smem:[#allocation25_spill]] %s6054_s6 }
   0x8   :  { %6092 = sst [smem:[#allocation26_spill]] %s6055_s7 }
   0x9   :  { %6093 = sst [smem:[#allocation27_spill]] %s6056_s8 }
   0xa   :  { %6094 = sst [smem:[#allocation28_spill]] %s6071_s23 }
   0xb   :  { %6095 = sst [smem:[#allocation29_spill]] %s6072_s24 }
   0xc   :  { %29 = vsyncpa [#allocation3], 0 }
   0xd   :  { %30 = vsyncpa [#allocation6], 0 }
   0xe   :  { %31 = vsyncpa [#allocation9], 0 }
   0xf   :  { %32 = vsyncpa [#allocation12], 0 }
  0x10   :  { %33 = vsyncpa [#allocation4], 0  ;;  %s5251_s5 = smov [#allocation5]   ;;  %s5252_s27 = smov [#allocation8]  }
  0x11   :  { %s57_s26 = sshll.u32 %s5251_s5, 4  ;;  %s89_s28 = sshll.u32 %s5252_s27, 4  ;;  %s58_s26 = int_to_ptr.vmem [resolvable:$true] %s57_s26  ;;  %s5403_s28 = int_to_ptr.vmem [resolvable:$true] %s89_s28 }
  0x12   :  { %s6096_s29 = sld [smem:[#allocation23_spill]] }
  0x18   :  { %s5087_s0 = scalar_lea.hbm %s6096_s29, 256 }
  0x19   :  { %p5088_p0 = scmp.ne.s32.totalorder %s6096_s29, %s5087_s0  ;;  %p5091_p1 = scmp.lt.u32.totalorder %s5087_s0, %s6096_s29 }
  0x1b   :  { %p5093_p2 = pnand %p5091_p1, %p5088_p0 }
  0x1d   :  { %5096 = shalt.err (!%p5093_p2)
}
  0x1e   :  { %s5097_s8 = scalar_lea.vmem %s58_s26, 256  ;;  %p5102_p4 = scmp.lt.s32.totalorder %s58_s26, %s58_s26 }
  0x1f   :  { %p5098_p3 = scmp.ne.s32.totalorder %s58_s26, %s5097_s8  ;;  %p5103_p5 = scmp.lt.s32.totalorder %s5097_s8, %s5097_s8 }
  0x21   :  { %p5104_p6 = por %p5103_p5, %p5102_p4 }
  0x23   :  { %p5105_p7 = pnand %p5104_p6, %p5098_p3 }
  0x25   :  { %5108 = shalt.err (!%p5105_p7)
}
  0x26   :  { %s5253_s4 = smov 128   ;;  %s6083_s1 = smov 8  }
  0x27   :  { %63 = dma.hbm_to_vmem [thread:$0]  %s6096_s29, 256, %s58_s26, [#allocation6], %s5253_s4, %s5253_s4, %s6083_s1  }
  0x28   :  { %s5109_s0 = scalar_lea.hbm %s6058_s10, 1024 }
  0x29   :  { %p5110_p8 = scmp.ne.s32.totalorder %s6058_s10, %s5109_s0  ;;  %p5113_p9 = scmp.lt.u32.totalorder %s5109_s0, %s6058_s10 }
  0x2b   :  { %p5115_p10 = pnand %p5113_p9, %p5110_p8 }
  0x2d   :  { %5118 = shalt.err (!%p5115_p10)
}
  0x2e   :  { %s5119_s8 = scalar_lea.vmem %s5403_s28, 1024  ;;  %p5124_p12 = scmp.lt.s32.totalorder %s5403_s28, %s5403_s28 }
  0x2f   :  { %p5120_p11 = scmp.ne.s32.totalorder %s5403_s28, %s5119_s8  ;;  %p5125_p13 = scmp.lt.s32.totalorder %s5119_s8, %s5119_s8 }
  0x31   :  { %p5126_p0 = por %p5125_p13, %p5124_p12 }
  0x33   :  { %p5127_p1 = pnand %p5126_p0, %p5120_p11 }
  0x35   :  { %5130 = shalt.err (!%p5127_p1)
}
  0x36   :  { %95 = dma.hbm_to_vmem [thread:$0]  %s6058_s10, 1024, %s5403_s28, [#allocation9], %s5253_s4, %s5253_s4, %s6083_s1  }
  0x37   :  { %s5255_s5 = smov [#allocation2]   ;;  %s5256_s6 = smov [#allocation7]  }
  0x38   :  { %s45_s27 = sshll.u32 %s5255_s5, 4  ;;  %s75_s2 = sshll.u32 %s5256_s6, 4  ;;  %s46_s27 = int_to_ptr.vmem [resolvable:$true] %s45_s27  ;;  %s5440_s2 = int_to_ptr.vmem [resolvable:$true] %s75_s2 }
  0x39   :  { %s6097_s30 = sld [smem:[#allocation22_spill]] }
  0x3f   :  { %s5131_s3 = scalar_lea.hbm %s6097_s30, 1664 }
  0x40   :  { %p5132_p2 = scmp.ne.s32.totalorder %s6097_s30, %s5131_s3  ;;  %p5135_p3 = scmp.lt.u32.totalorder %s5131_s3, %s6097_s30 }
  0x42   :  { %p5137_p4 = pnand %p5135_p3, %p5132_p2 }
  0x44   :  { %5140 = shalt.err (!%p5137_p4)
}
  0x45   :  { %s5141_s10 = scalar_lea.vmem %s46_s27, 1664  ;;  %p5146_p6 = scmp.lt.s32.totalorder %s46_s27, %s46_s27 }
  0x46   :  { %p5142_p5 = scmp.ne.s32.totalorder %s46_s27, %s5141_s10  ;;  %p5147_p7 = scmp.lt.s32.totalorder %s5141_s10, %s5141_s10 }
  0x48   :  { %p5148_p8 = por %p5147_p7, %p5146_p6 }
  0x4a   :  { %p5149_p9 = pnand %p5148_p8, %p5142_p5 }
  0x4c   :  { %5152 = shalt.err (!%p5149_p9)
}
  0x4d   :  { %51 = dma.hbm_to_vmem [thread:$0]  %s6097_s30, 1664, %s46_s27, [#allocation3], %s5253_s4, %s5253_s4, %s6083_s1  }
  0x4e   :  { %s6098_s23 = sld [smem:[#allocation27_spill]] }
  0x54   :  { %s5153_s24 = scalar_lea.hbm %s6098_s23, 1024 }
  0x55   :  { %p5154_p10 = scmp.ne.s32.totalorder %s6098_s23, %s5153_s24  ;;  %p5157_p11 = scmp.lt.u32.totalorder %s5153_s24, %s6098_s23 }
  0x57   :  { %p5159_p12 = pnand %p5157_p11, %p5154_p10 }
  0x59   :  { %5162 = shalt.err (!%p5159_p12)
}
  0x5a   :  { %s5163_s25 = scalar_lea.vmem %s5440_s2, 1024  ;;  %p5168_p0 = scmp.lt.s32.totalorder %s5440_s2, %s5440_s2 }
  0x5b   :  { %p5164_p13 = scmp.ne.s32.totalorder %s5440_s2, %s5163_s25  ;;  %p5169_p1 = scmp.lt.s32.totalorder %s5163_s25, %s5163_s25 }
  0x5d   :  { %p5170_p2 = por %p5169_p1, %p5168_p0 }
  0x5f   :  { %p5171_p3 = pnand %p5170_p2, %p5164_p13 }
  0x61   :  { %5174 = shalt.err (!%p5171_p3)
}
  0x62   :  { %81 = dma.hbm_to_vmem [thread:$0]  %s6098_s23, 1024, %s5440_s2, [#allocation6], %s5253_s4, %s5253_s4, %s6083_s1  }
  0x63   :  { %s5257_s8 = smov [#allocation10]   ;;  %s5258_s28 = smov [#allocation11]  }
  0x64   :  { %s111_s10 = sshll.u32 %s5257_s8, 4  ;;  %s129_s26 = sshll.u32 %s5258_s28, 4  ;;  %s112_s10 = int_to_ptr.vmem [resolvable:$true] %s111_s10  ;;  %s5477_s26 = int_to_ptr.vmem [resolvable:$true] %s129_s26 }
  0x65   :  { %s5175_s24 = scalar_lea.hbm %s6064_s16, 2048 }
  0x66   :  { %p5176_p4 = scmp.ne.s32.totalorder %s6064_s16, %s5175_s24  ;;  %p5179_p5 = scmp.lt.u32.totalorder %s5175_s24, %s6064_s16 }
  0x68   :  { %p5181_p6 = pnand %p5179_p5, %p5176_p4 }
  0x6a   :  { %5184 = shalt.err (!%p5181_p6)
}
  0x6b   :  { %s5185_s2 = scalar_lea.vmem %s112_s10, 2048  ;;  %p5190_p8 = scmp.lt.s32.totalorder %s112_s10, %s112_s10 }
  0x6c   :  { %p5186_p7 = scmp.ne.s32.totalorder %s112_s10, %s5185_s2  ;;  %p5191_p9 = scmp.lt.s32.totalorder %s5185_s2, %s5185_s2 }
  0x6e   :  { %p5192_p10 = por %p5191_p9, %p5190_p8 }
  0x70   :  { %p5193_p11 = pnand %p5192_p10, %p5186_p7 }
  0x72   :  { %5196 = shalt.err (!%p5193_p11)
}
  0x73   :  { %117 = dma.hbm_to_vmem [thread:$0]  %s6064_s16, 2048, %s112_s10, [#allocation9], %s5253_s4, %s5253_s4, %s6083_s1  }
  0x74   :  { %s5197_s8 = scalar_lea.hbm %s6068_s20, 512 }
  0x75   :  { %p5198_p12 = scmp.ne.s32.totalorder %s6068_s20, %s5197_s8  ;;  %p5201_p13 = scmp.lt.u32.totalorder %s5197_s8, %s6068_s20 }
  0x77   :  { %p5203_p0 = pnand %p5201_p13, %p5198_p12 }
  0x79   :  { %5206 = shalt.err (!%p5203_p0)
}
  0x7a   :  { %s5207_s6 = scalar_lea.vmem %s5477_s26, 512  ;;  %p5212_p2 = scmp.lt.s32.totalorder %s5477_s26, %s5477_s26 }
  0x7b   :  { %p5208_p1 = scmp.ne.s32.totalorder %s5477_s26, %s5207_s6  ;;  %p5213_p3 = scmp.lt.s32.totalorder %s5207_s6, %s5207_s6 }
  0x7d   :  { %p5214_p4 = por %p5213_p3, %p5212_p2 }
  0x7f   :  { %p5215_p5 = pnand %p5214_p4, %p5208_p1 }
  0x81   :  { %5218 = shalt.err (!%p5215_p5)
}
  0x82   :  { %135 = dma.hbm_to_vmem [thread:$0]  %s6068_s20, 512, %s5477_s26, [#allocation12], %s5253_s4, %s5253_s4, %s6083_s1  }
  0x83   :  { %5241 = dma.done.wait [#allocation3], 1664  }
  0x84   :  { %5242 = vsyncadd [#allocation3], 4294965632 }
  0x85   :  { %5243 = dma.done.wait [#allocation6], 1280  }
  0x86   :  { %5244 = vsyncadd [#allocation6], 4294966016 }
  0x87   :  { %5245 = dma.done.wait [#allocation9], 3072  }
  0x88   :  { %5246 = vsyncadd [#allocation9], 4294964224 }
  0x89   :  { %5247 = dma.done.wait [#allocation12], 512  }
  0x8a   :  { %5248 = vsyncadd [#allocation12], 4294966784  ;;  %v5259_v0 = vmov 0   ;;  %s6099_s3 = sld [smem:[#allocation19_spill]]  ;;  %v176_v2 = vld [vmem:[#allocation2] sm:$0xff]  ;;  %v177_v3 = vld [vmem:[#allocation2 + $0x8] sm:$0xff]  ;;  %v162_v23 = vlaneseq }
  0x8b   :  { %4994 = vset.pattern.permute.xlu0 %v5259_v0  ;;  %v178_v4 = vld [vmem:[#allocation2 + $0x10] sm:$0xff]  ;;  %v179_v5 = vld [vmem:[#allocation2 + $0x18] sm:$0xff]  ;;  %v4851_v7 = vpack.c.bf16 %v177_v3, %v176_v2  ;;  %v180_v9 = vld [vmem:[#allocation2 + $0x20] sm:$0xff]  ;;  %vm197_vm0 = vcmask 1043456   ;;  %v5260_v22 = vmov 0.0   ;;  %vm190_vm1 = vcmask 818176  }
  0x8c   :  { %v4855_v8 = vpack.c.bf16 %v179_v5, %v178_v4  ;;  %v181_v10 = vld [vmem:[#allocation2 + $0x28] sm:$0xff]  ;;  %v182_v12 = vld [vmem:[#allocation2 + $0x30] sm:$0xff]  ;;  %v183_v13 = vld [vmem:[#allocation2 + $0x38] sm:$0xff]  ;;  %v163_v24 = vand.u32 127, %v162_v23  ;;  %s6100_s23 = sld [smem:[#allocation24_spill]]  ;;  %vm285_vm4 = vcmask 261120  }
  0x8d   :  { %4852 = vmatprep.subr.bf16.mxu0 %v4851_v7  ;;  %v4859_v11 = vpack.c.bf16 %v181_v10, %v180_v9  ;;  %v4863_v14 = vpack.c.bf16 %v183_v13, %v182_v12  ;;  %v184_v15 = vld [vmem:[#allocation2 + $0x40] sm:$0xff]  ;;  %v185_v16 = vld [vmem:[#allocation2 + $0x48] sm:$0xff]  ;;  %v186_v18 = vld [vmem:[#allocation2 + $0x50] sm:$0xff]  ;;  %s6101_s30 = sld [smem:[#allocation25_spill]]  ;;  %s6102_s29 = sld [smem:[#allocation26_spill]]  ;;  %vm5261_vm5 = vmmov 0  }
  0x8e   :  { %4854 = vmatpush3.bf16.msra.mxu0 %v4851_v7  ;;  %v4867_v17 = vpack.c.bf16 %v185_v16, %v184_v15  ;;  %v187_v19 = vld [vmem:[#allocation2 + $0x58] sm:$0xff]  ;;  %v188_v21 = vld [vmem:[#allocation2 + $0x60] sm:$0xf]  ;;  %v189_v29 = vld [vmem:[#allocation5] sm:$0xff]  ;;  %s5262_s6 = smov 96   ;;  %vm450_vm6 = vcmask 64512  }
  0x8f   :  { %4856 = vmatprep.subr.bf16.mxu0 %v4855_v8  ;;  %v4871_v20 = vpack.c.bf16 %v187_v19, %v186_v18  ;;  %v355_v49 = vld [vmem:[#allocation7] sm:$0xff]  ;;  %v356_v50 = vld [vmem:[#allocation7 + $0x8] sm:$0xff]  ;;  %v357_v51 = vld [vmem:[#allocation7 + $0x10] sm:$0xff]  ;;  %s6103_s0 = sld [smem:[#allocation20_spill]]  ;;  %v337_v19 = vshrl.u32 %v162_v23, 7  ;;  %s5264_s7 = smov 64  }
  0x90   :  { %v160_v1 = vld [vmem:[%s6099_s3] sm:$0xff]  ;;  %v161_v6 = vld [vmem:[%s6099_s3 + $0x8] sm:$0xff]  ;;  %v4875_v52 = vpack.c.bf16 %v356_v50, %v355_v49  ;;  %v358_v53 = vld [vmem:[#allocation7 + $0x18] sm:$0xff]  ;;  %s5265_s3 = smov 88   ;;  %s5266_s20 = smov 120   ;;  %vm1818_vm7 = vcmask 130048  }
  0x91   :  { %165 = vperm.xlu0 %4994, %v160_v1   ;;  %v4879_v54 = vpack.c.bf16 %v358_v53, %v357_v51  ;;  %v4292_v7 = vld [vmem:[%s6057_s9] ss:$0 sm:$0xff]  ;;  %s5267_s4 = smov 56   ;;  %s5268_s26 = smov 80   ;;  %vm1821_vm8 = vcmask 195584   ;;  %vm2088_vm9 = vcmask 523264  }
  0x92   :  { %4858 = vmatpush3.bf16.msra.mxu0 %v4855_v8  ;;  %v4289_v32 = vld [vmem:[%s6100_s23] ss:$0 sm:$0xff]  ;;  %4876 = vmatprep.subr.bf16.mxu1 %v4875_v52  ;;  %s5269_s2 = smov 112   ;;  %s5270_s23 = smov 48   ;;  %vm4106_vm10 = vcmask 1041409   ;;  %vm4264_vm11 = vcmask 9216  }
  0x93   :  { %4860 = vmatprep.subr.bf16.mxu0 %v4859_v11  ;;  %4878 = vmatpush3.bf16.msra.mxu1 %v4875_v52  ;;  %v4290_v62 = vld [vmem:[%s6101_s30] ss:$0 sm:$0xff]  ;;  %s5271_s25 = smov 72   ;;  %s5272_s27 = smov 104  }
  0x94   :  { %4880 = vmatprep.subr.bf16.mxu1 %v4879_v54  ;;  %v4291_v0 = vld [vmem:[%s6102_s29] ss:$0 sm:$0xff]  ;;  %s5273_s30 = smov 40   ;;  %s6081_s8 = smov 16  }
  0x95   :  { %168 = vperm.xlu0 %4994, %v161_v6   ;;  %v329_v16 = vld [vmem:[%s6103_s0] sm:$0x3]  ;;  %s6079_s28 = smov 24   ;;  %s6104_s24 = sld [smem:[#allocation21_spill]] }
  0x96   :  { %4862 = vmatpush3.bf16.msra.mxu0 %v4859_v11 }
  0x97   :  { %4864 = vmatprep.subr.bf16.mxu0 %v4863_v14  ;;  %4882 = vmatpush3.bf16.msra.mxu1 %v4879_v54 }
  0x98   :  { %4576 = vmatprep.subr.mxu1 %v5260_v22 }
  0x9a   :  { %4866 = vmatpush3.bf16.msra.mxu0 %v4863_v14  ;;  %v5263_v14 = vmov 1966171168  }
  0x9b   :  { %4868 = vmatprep.subr.bf16.mxu0 %v4867_v17  ;;  %v334_v15 = vunpack.c.l.s4 %v5263_v14 }
  0x9d   :  { %v335_v18 = vunpack.c.0.s8 %v334_v15 }
  0x9e   :  { %4870 = vmatpush3.bf16.msra.mxu0 %v4867_v17  ;;  %v330_v17 = vsub.f32 1.0, %v329_v16 }
  0x9f   :  { %4872 = vmatprep.subr.bf16.mxu0 %v4871_v20 }
  0xa2   :  { %4874 = vmatpush3.bf16.msra.mxu0 %v4871_v20  ;;  %v331_v20 = vmul.f32 -10000.0, %v330_v17 }
  0xa3   :  { %4560 = vmatprep.subr.msk.mxu0 %vm197_vm0, %v188_v21 }
  0xa6   :  { %4561 = vmatpush3.msk.msra.mxu0 %vm197_vm0, %v188_v21  ;;  %v338_v21 = vsub.s32 %v335_v18, %v337_v19 }
  0xa7   :  { %4601 = vmatprep.subr.mxu0 %v5260_v22 }
 0x110   :  { %v166_v25 = vpop.permute.xlu0 %165 }
 0x111   :  { %vm170_vm2 = vcmp.eq.s32.totalorder %v163_v24, %v166_v25 }
 0x112   :  { %v4284_v26 = vsel %vm170_vm2, 1.0, %v5260_v22 }
 0x113   :  { %4562 = vmatprep.mubr.msk.f32.mxu0 %vm190_vm1, %v4284_v26 }
 0x114   :  { %v169_v27 = vpop.permute.xlu0 %168 }
 0x115   :  { %vm171_vm3 = vcmp.eq.s32.totalorder %v163_v24, %v169_v27  ;;  %v339_v24 = vrot.slane %v331_v20, %v338_v21  ;;  %v606_v27 = vsub.s32 0, %v337_v19 }
 0x116   :  { %v4285_v28 = vsel %vm171_vm3, 1.0, %v5260_v22 }
 0x117   :  { %4563 = vmatmul.mubr.msk.f32.vlgmr.msra.gmra.mrb[0].mxu0 %vm190_vm1, %v4285_v28  ;;  %v340_v25 = vcombine.high %v339_v24, %v339_v24  ;;  %v347_v26 = vrot.slane %v339_v24, %v338_v21 }
 0x118   :  { %4603 = vmatprep.mubr.msk.f32.mxu0 %vm5261_vm5, %v5260_v22 }
 0x119   :  { %v354_v28 = vrot.slane %v340_v25, %v338_v21 }
 0x1ea   :  { %v4564_v30 = vpop.f32.mrb[0].mxu0 }
 0x1eb   :  { %v267_v31 = vpop.f32.mrb[1].mxu0  ;;  %v273_v33 = vadd.f32 %v4564_v30, %v189_v29 }
 0x1ec   :  { %v268_v34 = vadd.f32 %v267_v31, %v189_v29  ;;  %v5577_v29 = vrot.slane %v347_v26, %v606_v27 }
 0x1ed   :  { %v282_v37 = vadd.f32 %v4289_v32, %v273_v33  ;;  %v5579_v33 = vrot.slane %v354_v28, %v606_v27 }
 0x1ee   :  { %v281_v35 = vadd.f32 %v4289_v32, %v268_v34 }
 0x1ef   :  { %v289_v38 = vsel %vm285_vm4, %v282_v37, 0.0 }
 0x1f0   :  { %v286_v36 = vsel %vm285_vm4, %v281_v35, 0.0 }
 0x1f1   :  { %287 = vadd.xlane.f32.xlu1 %v286_v36 }
 0x1f5   :  { %290 = vadd.xlane.f32.xlu1 %v289_v38 }
 0x27e   :  { %v288_v39 = vpop.xlane.xlu1 %287 }
 0x27f   :  { %v293_v40 = vmul.f32 0.03125, %v288_v39 }
 0x281   :  { %v295_v41 = vsub.f32 %v281_v35, %v293_v40 }
 0x282   :  { %v291_v42 = vpop.xlane.xlu1 %290 }
 0x283   :  { %v294_v43 = vmul.f32 0.03125, %v291_v42  ;;  %v297_v44 = vmul.f32 %v295_v41, %v295_v41 }
 0x285   :  { %v296_v45 = vsub.f32 %v282_v37, %v294_v43  ;;  %v299_v46 = vsel %vm285_vm4, %v297_v44, 0.0 }
 0x286   :  { %300 = vadd.xlane.f32.xlu0 %v299_v46 }
 0x287   :  { %v298_v47 = vmul.f32 %v296_v45, %v296_v45 }
 0x289   :  { %v302_v48 = vsel %vm285_vm4, %v298_v47, 0.0 }
 0x28a   :  { %303 = vadd.xlane.f32.xlu1 %v302_v48 }
 0x313   :  { %v301_v55 = vpop.xlane.xlu0 %300 }
 0x314   :  { %v305_v56 = vmul.f32 0.03125, %v301_v55 }
 0x316   :  { %v307_v57 = vadd.f32 1e-12, %v305_v56 }
 0x317   :  { %v304_v58 = vpop.xlane.xlu1 %303 }
 0x318   :  { %4995 = vrsqrt.f32 %v307_v57  ;;  %v306_v59 = vmul.f32 0.03125, %v304_v58 }
 0x31a   :  { %v308_v60 = vadd.f32 1e-12, %v306_v59 }
 0x31c   :  { %4997 = vrsqrt.f32 %v308_v60 }
 0x322   :  { %v4996_v61 = vpop.eup %4995 }
 0x323   :  { %v311_v63 = vmul.f32 %v4996_v61, %v295_v41 }
 0x325   :  { %v319_v1 = vmul.f32 %v4290_v62, %v311_v63 }
 0x326   :  { %v4998_v2 = vpop.eup %4997 }
 0x327   :  { %v312_v3 = vmul.f32 %v4998_v2, %v296_v45  ;;  %v5538_v4 = vadd.f32 %v4291_v0, %v319_v1 }
 0x329   :  { %v320_v5 = vmul.f32 %v4290_v62, %v312_v3  ;;  %4573 = vmatprep.mubr.msk.f32.mxu1 %vm285_vm4, %v5538_v4 }
 0x32b   :  { %v5542_v6 = vadd.f32 %v4291_v0, %v320_v5 }
 0x32d   :  { %4574 = vmatmul.mubr.msk.f32.vlgmr.msra.gmra.mrb[0].mxu1 %vm285_vm4, %v5542_v6 }
 0x32e   :  { %4578 = vmatprep.mubr.msk.f32.mxu1 %vm5261_vm5, %v5260_v22 }
 0x400   :  { %v4575_v8 = vpop.f32.mrb[0].mxu1 }
 0x401   :  { %v438_v9 = vpop.f32.mrb[1].mxu1  ;;  %v5557_v11 = vadd.f32 %v4575_v8, %v4292_v7 }
 0x402   :  { %v5553_v10 = vadd.f32 %v4292_v7, %v438_v9 }
 0x404   :  { %448 = vrot.lane.b32.xlu1 %v5553_v10, %s5262_s6 }
 0x408   :  { %526 = vrot.lane.b32.xlu1 %v5557_v11, %s5262_s6 }
 0x476   :  { %v449_v12 = vpop.permute.xlu1 %448 }
 0x477   :  { %4577 = vmatpush3.xpose.msk.msra.mxu1 %vm450_vm6, %v449_v12 }
 0x478   :  { %4581 = vmatprep.subr.mxu1 %v5260_v22 }
 0x47a   :  { %4579 = vmatmul.mubr.msk.f32.vlgmr.msra.gmra.mrb[2].mxu1 %vm450_vm6, %v5553_v10  ;;  %v527_v13 = vpop.permute.xlu1 %526 }
 0x47b   :  { %4582 = vmatpush3.xpose.msk.msra.mxu1 %vm450_vm6, %v527_v13  ;;  %4583 = vmatprep.mubr.msk.f32.mxu1 %vm5261_vm5, %v5260_v22 }
 0x47c   :  { %4586 = vmatprep.subr.mxu1 %v5260_v22 }
 0x47e   :  { %4584 = vmatmul.mubr.msk.f32.vlgmr.msra.gmra.mrb[4].mxu1 %vm450_vm6, %v5557_v11 }
 0x47f   :  { %4588 = vmatprep.mubr.msk.f32.mxu1 %vm5261_vm5, %v5260_v22 }
 0x54d   :  { %v521_v30 = vpop.f32.mrb[2].mxu1 }
 0x54e   :  { %v602_v31 = vmul.f32 0.35355338, %v521_v30  ;;  %v4580_v32 = vpop.f32.mrb[3].mxu1 }
 0x550   :  { %v614_v34 = vadd.f32 %v5577_v29, %v602_v31 }
 0x551   :  { %v598_v35 = vpop.f32.mrb[4].mxu1 }
 0x552   :  { %v603_v36 = vmul.f32 0.35355338, %v598_v35  ;;  %v4585_v37 = vpop.f32.mrb[5].mxu1  ;;  %v616_v23 = vsel %vm450_vm6, %v614_v34, -inf }
 0x553   :  { %617 = vmax.xlane.f32.xlu1 %v616_v23 }
 0x554   :  { %v615_v38 = vadd.f32 %v5579_v33, %v603_v36 }
 0x556   :  { %v619_v39 = vsel %vm450_vm6, %v615_v38, -inf }
 0x557   :  { %620 = vmax.xlane.f32.xlu0 %v619_v39 }
 0x564   :  { %714 = vrot.lane.b32.xlu1 %v5557_v11, %s5264_s7 }
 0x56d   :  { %638 = vrot.lane.b32.xlu0 %v5553_v10, %s5264_s7 }
 0x571   :  { %792 = vrot.lane.b32.xlu0 %v5553_v10, %s5265_s3 }
 0x575   :  { %870 = vrot.lane.b32.xlu0 %v5557_v11, %s5265_s3 }
 0x5e0   :  { %v618_v40 = vpop.xlane.xlu1 %617 }
 0x5e1   :  { %v622_v41 = vsub.f32 %v614_v34, %v618_v40 }
 0x5e3   :  { %v624_v42 = vmul.f32 1.442695, %v622_v41 }
 0x5e4   :  { %v621_v43 = vpop.xlane.xlu0 %620  ;;  %v715_v59 = vpop.permute.xlu1 %714 }
 0x5e5   :  { %4999 = vpow2.f32 %v624_v42  ;;  %v623_v44 = vsub.f32 %v615_v38, %v621_v43 }
 0x5e7   :  { %v626_v45 = vmul.f32 1.442695, %v623_v44 }
 0x5e8   :  { %v639_v46 = vpop.permute.xlu0 %638 }
 0x5e9   :  { %5001 = vpow2.f32 %v626_v45  ;;  %4587 = vmatpush3.msra.mxu1 %v639_v46 }
 0x5ea   :  { %4591 = vmatprep.subr.mxu1 %v5260_v22 }
 0x5ec   :  { %v793_v47 = vpop.permute.xlu0 %792 }
 0x5ef   :  { %v5000_v48 = vpop.eup %4999 }
 0x5f0   :  { %v871_v49 = vpop.permute.xlu0 %870  ;;  %v628_v50 = vsel %vm450_vm6, %v5000_v48, 0.0 }
 0x5f1   :  { %4602 = vmatpush3.xpose.msk.msra.mxu0 %vm450_vm6, %v871_v49  ;;  %629 = vadd.xlane.f32.xlu0 %v628_v50 }
 0x5f2   :  { %4611 = vmatprep.subr.mxu0 %v5260_v22 }
 0x5f3   :  { %v5002_v51 = vpop.eup %5001 }
 0x5f4   :  { %v631_v52 = vsel %vm450_vm6, %v5002_v51, 0.0 }
 0x5f5   :  { %632 = vadd.xlane.f32.xlu0 %v631_v52 }
 0x60b   :  { %790 = vrot.lane.b32.xlu0 %v5553_v10, %s5266_s20 }
 0x60f   :  { %868 = vrot.lane.b32.xlu0 %v5557_v11, %s5266_s20 }
 0x67e   :  { %v630_v53 = vpop.xlane.xlu0 %629 }
 0x67f   :  { %5003 = vrcp.f32 %v630_v53 }
 0x682   :  { %v633_v54 = vpop.xlane.xlu0 %632 }
 0x683   :  { %5005 = vrcp.f32 %v633_v54 }
 0x686   :  { %v791_v55 = vpop.permute.xlu0 %790 }
 0x689   :  { %v5004_v56 = vpop.eup %5003 }
 0x68a   :  { %v869_v57 = vpop.permute.xlu0 %868  ;;  %v635_v58 = vmul.f32 %v5004_v56, %v5000_v48 }
 0x68b   :  { %4604 = vmatmul.mubr.msk.f32.vlgmr.msra.gmra.mrb[2].mxu0 %vm450_vm6, %v869_v57 }
 0x68c   :  { %4589 = vmatmul.mubr.msk.f32.vlgmr.msra.gmra.mrb[6].mxu1 %vm450_vm6, %v635_v58  ;;  %4613 = vmatprep.mubr.msk.f32.mxu0 %vm5261_vm5, %v5260_v22 }
 0x68d   :  { %v5006_v60 = vpop.eup %5005  ;;  %4592 = vmatpush3.msra.mxu1 %v715_v59  ;;  %4593 = vmatprep.mubr.msk.f32.mxu1 %vm5261_vm5, %v5260_v22 }
 0x68e   :  { %v637_v61 = vmul.f32 %v5006_v60, %v5002_v51  ;;  %4596 = vmatprep.subr.mxu1 %v5260_v22 }
 0x690   :  { %4594 = vmatmul.mubr.msk.f32.vlgmr.msra.gmra.mrb[8].mxu1 %vm450_vm6, %v637_v61 }
 0x691   :  { %4598 = vmatprep.mubr.msk.f32.mxu1 %vm5261_vm5, %v5260_v22 }
 0x694   :  { %4597 = vmatpush3.xpose.msk.msra.mxu1 %vm450_vm6, %v793_v47 }
 0x695   :  { %4606 = vmatprep.subr.mxu1 %v5260_v22 }
 0x697   :  { %4599 = vmatmul.mubr.msk.f32.vlgmr.msra.gmra.mrb[10].mxu1 %vm450_vm6, %v791_v55 }
 0x698   :  { %4608 = vmatprep.mubr.msk.f32.mxu1 %vm5261_vm5, %v5260_v22 }
 0x75e   :  { %v942_v62 = vpop.f32.mrb[2].mxu0 }
 0x75f   :  { %v947_v63 = vmul.f32 0.35355338, %v942_v62  ;;  %v5617_v0 = vpop.f32.mrb[6].mxu1  ;;  %v4605_v1 = vpop.f32.mrb[3].mxu0 }
 0x760   :  { %v4590_v2 = vpop.f32.mrb[7].mxu1 }
 0x761   :  { %v949_v3 = vadd.f32 %v947_v63, %v5579_v33 }
 0x763   :  { %v5620_v5 = vpop.f32.mrb[8].mxu1  ;;  %v953_v7 = vsel %vm450_vm6, %v949_v3, -inf }
 0x764   :  { %954 = vmax.xlane.f32.xlu0 %v953_v7  ;;  %v4595_v8 = vpop.f32.mrb[9].mxu1 }
 0x76a   :  { %v864_v9 = vpop.f32.mrb[10].mxu1 }
 0x76b   :  { %v946_v12 = vmul.f32 0.35355338, %v864_v9  ;;  %v4600_v13 = vpop.f32.mrb[11].mxu1 }
 0x76d   :  { %v948_v14 = vadd.f32 %v946_v12, %v5577_v29 }
 0x76f   :  { %v950_v15 = vsel %vm450_vm6, %v948_v14, -inf }
 0x770   :  { %951 = vmax.xlane.f32.xlu1 %v950_v15 }
 0x77a   :  { %972 = vrot.lane.b32.xlu0 %v5553_v10, %s5267_s4 }
 0x7f1   :  { %v955_v16 = vpop.xlane.xlu0 %954 }
 0x7f2   :  { %v957_v17 = vsub.f32 %v949_v3, %v955_v16 }
 0x7f4   :  { %v960_v18 = vmul.f32 1.442695, %v957_v17 }
 0x7f5   :  { %v973_v19 = vpop.permute.xlu0 %972 }
 0x7f6   :  { %5007 = vpow2.f32 %v960_v18  ;;  %4607 = vmatpush3.msra.mxu1 %v973_v19 }
 0x7f7   :  { %4616 = vmatprep.subr.mxu1 %v5260_v22 }
 0x7fd   :  { %v952_v20 = vpop.xlane.xlu1 %951 }
 0x7fe   :  { %v956_v21 = vsub.f32 %v948_v14, %v952_v20 }
 0x800   :  { %v5008_v24 = vpop.eup %5007  ;;  %v958_v25 = vmul.f32 1.442695, %v956_v21 }
 0x801   :  { %v965_v26 = vsel %vm450_vm6, %v5008_v24, 0.0 }
 0x802   :  { %5009 = vpow2.f32 %v958_v25  ;;  %966 = vadd.xlane.f32.xlu1 %v965_v26 }
 0x80c   :  { %v5010_v27 = vpop.eup %5009 }
 0x80d   :  { %v962_v28 = vsel %vm450_vm6, %v5010_v27, 0.0 }
 0x80e   :  { %963 = vadd.xlane.f32.xlu0 %v962_v28 }
 0x813   :  { %1048 = vrot.lane.b32.xlu1 %v5557_v11, %s5267_s4 }
 0x817   :  { %1126 = vrot.lane.b32.xlu1 %v5553_v10, %s5268_s26 }
 0x81b   :  { %1124 = vrot.lane.b32.xlu1 %v5553_v10, %s5269_s2 }
 0x824   :  { %1204 = vrot.lane.b32.xlu0 %v5557_v11, %s5268_s26 }
 0x828   :  { %1202 = vrot.lane.b32.xlu0 %v5557_v11, %s5269_s2 }
 0x88f   :  { %v967_v30 = vpop.xlane.xlu1 %966 }
 0x890   :  { %5011 = vrcp.f32 %v967_v30 }
 0x893   :  { %v1049_v31 = vpop.permute.xlu1 %1048 }
 0x894   :  { %4612 = vmatpush3.msra.mxu0 %v1049_v31 }
 0x895   :  { %4621 = vmatprep.subr.mxu0 %v5260_v22 }
 0x897   :  { %v1127_v38 = vpop.permute.xlu1 %1126 }
 0x89a   :  { %v5012_v32 = vpop.eup %5011 }
 0x89b   :  { %v971_v34 = vmul.f32 %v5012_v32, %v5008_v24  ;;  %v964_v35 = vpop.xlane.xlu0 %963  ;;  %v1125_v40 = vpop.permute.xlu1 %1124 }
 0x89c   :  { %5013 = vrcp.f32 %v964_v35 }
 0x89d   :  { %4614 = vmatmul.mubr.msk.f32.vlgmr.msra.gmra.mrb[4].mxu0 %vm450_vm6, %v971_v34 }
 0x89e   :  { %4623 = vmatprep.mubr.msk.f32.mxu0 %vm5261_vm5, %v5260_v22 }
 0x89f   :  { %v1205_v36 = vpop.permute.xlu0 %1204 }
 0x8a0   :  { %4622 = vmatpush3.xpose.msk.msra.mxu0 %vm450_vm6, %v1205_v36 }
 0x8a1   :  { %4631 = vmatprep.subr.mxu0 %v5260_v22 }
 0x8a3   :  { %v1203_v37 = vpop.permute.xlu0 %1202 }
 0x8a4   :  { %4624 = vmatmul.mubr.msk.f32.vlgmr.msra.gmra.mrb[6].mxu0 %vm450_vm6, %v1203_v37 }
 0x8a5   :  { %4633 = vmatprep.mubr.msk.f32.mxu0 %vm5261_vm5, %v5260_v22 }
 0x8a6   :  { %v5014_v23 = vpop.eup %5013 }
 0x8a7   :  { %v969_v39 = vmul.f32 %v5014_v23, %v5010_v27 }
 0x8a9   :  { %4609 = vmatmul.mubr.msk.f32.vlgmr.msra.gmra.mrb[12].mxu1 %vm450_vm6, %v969_v39 }
 0x8aa   :  { %4617 = vmatpush3.xpose.msk.msra.mxu1 %vm450_vm6, %v1127_v38  ;;  %4618 = vmatprep.mubr.msk.f32.mxu1 %vm5261_vm5, %v5260_v22 }
 0x8ab   :  { %4626 = vmatprep.subr.mxu1 %v5260_v22 }
 0x8ad   :  { %4619 = vmatmul.mubr.msk.f32.vlgmr.msra.gmra.mrb[14].mxu1 %vm450_vm6, %v1125_v40 }
 0x8ae   :  { %4628 = vmatprep.mubr.msk.f32.mxu1 %vm5261_vm5, %v5260_v22 }
 0x970   :  { %v5657_v41 = vpop.f32.mrb[4].mxu0 }
 0x971   :  { %v4615_v42 = vpop.f32.mrb[5].mxu0 }
 0x977   :  { %v1276_v43 = vpop.f32.mrb[6].mxu0 }
 0x978   :  { %v1281_v44 = vmul.f32 0.35355338, %v1276_v43  ;;  %v4625_v45 = vpop.f32.mrb[7].mxu0 }
 0x97a   :  { %v1283_v46 = vadd.f32 %v1281_v44, %v5579_v33 }
 0x97c   :  { %v5660_v47 = vpop.f32.mrb[12].mxu1  ;;  %v1287_v48 = vsel %vm450_vm6, %v1283_v46, -inf }
 0x97d   :  { %1288 = vmax.xlane.f32.xlu0 %v1287_v48  ;;  %v4610_v49 = vpop.f32.mrb[13].mxu1 }
 0x980   :  { %v1198_v50 = vpop.f32.mrb[14].mxu1 }
 0x981   :  { %v1280_v51 = vmul.f32 0.35355338, %v1198_v50  ;;  %v4620_v52 = vpop.f32.mrb[15].mxu1 }
 0x983   :  { %v1282_v53 = vadd.f32 %v1280_v51, %v5577_v29 }
 0x985   :  { %v1284_v54 = vsel %vm450_vm6, %v1282_v53, -inf }
 0x986   :  { %1285 = vmax.xlane.f32.xlu1 %v1284_v54 }
 0x993   :  { %1306 = vrot.lane.b32.xlu0 %v5553_v10, %s5270_s23 }
 0xa0a   :  { %v1289_v55 = vpop.xlane.xlu0 %1288 }
 0xa0b   :  { %v1291_v56 = vsub.f32 %v1283_v46, %v1289_v55  ;;  %v1835_v55 = vld [vmem:[#allocation8 + $0x10] sm:$0xff] }
 0xa0d   :  { %v1294_v57 = vmul.f32 1.442695, %v1291_v56  ;;  %v1836_v56 = vld [vmem:[#allocation8 + $0x18] sm:$0xff] }
 0xa0e   :  { %v1307_v58 = vpop.permute.xlu0 %1306 }
 0xa0f   :  { %5015 = vpow2.f32 %v1294_v57  ;;  %4627 = vmatpush3.msra.mxu1 %v1307_v58  ;;  %v4887_v57 = vpack.c.bf16 %v1836_v56, %v1835_v55 }
 0xa10   :  { %4636 = vmatprep.subr.mxu1 %v5260_v22 }
 0xa13   :  { %v1286_v59 = vpop.xlane.xlu1 %1285 }
 0xa14   :  { %v1290_v60 = vsub.f32 %v1282_v53, %v1286_v59 }
 0xa16   :  { %v1292_v61 = vmul.f32 1.442695, %v1290_v60 }
 0xa18   :  { %5017 = vpow2.f32 %v1292_v61 }
 0xa19   :  { %v5016_v62 = vpop.eup %5015 }
 0xa1a   :  { %v1299_v63 = vsel %vm450_vm6, %v5016_v62, 0.0 }
 0xa1b   :  { %1300 = vadd.xlane.f32.xlu1 %v1299_v63 }
 0xa22   :  { %v5018_v1 = vpop.eup %5017 }
 0xa23   :  { %v1296_v2 = vsel %vm450_vm6, %v5018_v1, 0.0 }
 0xa24   :  { %1297 = vadd.xlane.f32.xlu0 %v1296_v2 }
 0xa2c   :  { %1382 = vrot.lane.b32.xlu1 %v5557_v11, %s5270_s23 }
 0xa30   :  { %1460 = vrot.lane.b32.xlu1 %v5553_v10, %s5271_s25 }
 0xa34   :  { %1458 = vrot.lane.b32.xlu1 %v5553_v10, %s5272_s27 }
 0xa3a   :  { %1538 = vrot.lane.b32.xlu0 %v5557_v11, %s5271_s25 }
 0xa3e   :  { %1536 = vrot.lane.b32.xlu0 %v5557_v11, %s5272_s27 }
 0xaa8   :  { %v1301_v3 = vpop.xlane.xlu1 %1300 }
 0xaa9   :  { %5019 = vrcp.f32 %v1301_v3 }
 0xaac   :  { %v1383_v7 = vpop.permute.xlu1 %1382 }
 0xaad   :  { %4632 = vmatpush3.msra.mxu0 %v1383_v7 }
 0xaae   :  { %4641 = vmatprep.subr.mxu0 %v5260_v22 }
 0xab0   :  { %v1461_v16 = vpop.permute.xlu1 %1460 }
 0xab1   :  { %v1298_v8 = vpop.xlane.xlu0 %1297 }
 0xab2   :  { %5021 = vrcp.f32 %v1298_v8 }
 0xab3   :  { %v5020_v9 = vpop.eup %5019 }
 0xab4   :  { %v1305_v12 = vmul.f32 %v5020_v9, %v5016_v62  ;;  %v1459_v18 = vpop.permute.xlu1 %1458 }
 0xab5   :  { %v1539_v13 = vpop.permute.xlu0 %1538 }
 0xab6   :  { %4634 = vmatmul.mubr.msk.f32.vlgmr.msra.gmra.mrb[8].mxu0 %vm450_vm6, %v1305_v12 }
 0xab7   :  { %4642 = vmatpush3.xpose.msk.msra.mxu0 %vm450_vm6, %v1539_v13  ;;  %4643 = vmatprep.mubr.msk.f32.mxu0 %vm5261_vm5, %v5260_v22  ;;  %v4319_v13 = vld [vmem:[%s6104_s24] ss:$0 sm:$0xff] }
 0xab8   :  { %4651 = vmatprep.subr.mxu0 %v5260_v22 }
 0xab9   :  { %v1537_v14 = vpop.permute.xlu0 %1536 }
 0xaba   :  { %4644 = vmatmul.mubr.msk.f32.vlgmr.msra.gmra.mrb[10].mxu0 %vm450_vm6, %v1537_v14 }
 0xabb   :  { %4653 = vmatprep.mubr.msk.f32.mxu0 %vm5261_vm5, %v5260_v22 }
 0xabc   :  { %v5022_v15 = vpop.eup %5021 }
 0xabd   :  { %v1303_v17 = vmul.f32 %v5022_v15, %v5018_v1 }
 0xabf   :  { %4629 = vmatmul.mubr.msk.f32.vlgmr.msra.gmra.mrb[16].mxu1 %vm450_vm6, %v1303_v17 }
 0xac0   :  { %4637 = vmatpush3.xpose.msk.msra.mxu1 %vm450_vm6, %v1461_v16  ;;  %4638 = vmatprep.mubr.msk.f32.mxu1 %vm5261_vm5, %v5260_v22 }
 0xac1   :  { %4646 = vmatprep.subr.mxu1 %v5260_v22 }
 0xac3   :  { %4639 = vmatmul.mubr.msk.f32.vlgmr.msra.gmra.mrb[18].mxu1 %vm450_vm6, %v1459_v18 }
 0xac4   :  { %4648 = vmatprep.mubr.msk.f32.mxu1 %vm5261_vm5, %v5260_v22 }
 0xb89   :  { %v1454_v19 = vpop.f32.mrb[8].mxu0 }
 0xb8a   :  { %v4635_v20 = vpop.f32.mrb[9].mxu0 }
 0xb8d   :  { %v1610_v21 = vpop.f32.mrb[10].mxu0 }
 0xb8e   :  { %v1615_v24 = vmul.f32 0.35355338, %v1610_v21  ;;  %v4645_v25 = vpop.f32.mrb[11].mxu0 }
 0xb90   :  { %v1617_v26 = vadd.f32 %v1615_v24, %v5579_v33 }
 0xb92   :  { %v1378_v27 = vpop.f32.mrb[16].mxu1  ;;  %v1621_v28 = vsel %vm450_vm6, %v1617_v26, -inf }
 0xb93   :  { %1622 = vmax.xlane.f32.xlu0 %v1621_v28  ;;  %v4630_v30 = vpop.f32.mrb[17].mxu1 }
 0xb96   :  { %v1532_v31 = vpop.f32.mrb[18].mxu1 }
 0xb97   :  { %v1614_v32 = vmul.f32 0.35355338, %v1532_v31  ;;  %v4640_v34 = vpop.f32.mrb[19].mxu1 }
 0xb99   :  { %v1616_v35 = vadd.f32 %v1614_v32, %v5577_v29 }
 0xb9b   :  { %v1618_v36 = vsel %vm450_vm6, %v1616_v35, -inf }
 0xb9c   :  { %1619 = vmax.xlane.f32.xlu1 %v1618_v36 }
 0xc20   :  { %v1623_v37 = vpop.xlane.xlu0 %1622 }
 0xc21   :  { %v1625_v23 = vsub.f32 %v1617_v26, %v1623_v37 }
 0xc23   :  { %v1628_v38 = vmul.f32 1.442695, %v1625_v23 }
 0xc25   :  { %5023 = vpow2.f32 %v1628_v38  ;;  %v1972_v38 = vld [vmem:[%s6062_s14 + $0x8] sm:$0xff] }
 0xc29   :  { %v1620_v39 = vpop.xlane.xlu1 %1619 }
 0xc2a   :  { %v1624_v40 = vsub.f32 %v1616_v35, %v1620_v39 }
 0xc2c   :  { %v1626_v42 = vmul.f32 1.442695, %v1624_v40  ;;  %v1973_v40 = vld [vmem:[%s6062_s14 + $0x10] sm:$0xff] }
 0xc2e   :  { %5025 = vpow2.f32 %v1626_v42  ;;  %v1974_v42 = vld [vmem:[%s6062_s14 + $0x18] sm:$0xff] }
 0xc2f   :  { %v5024_v43 = vpop.eup %5023 }
 0xc30   :  { %v1633_v44 = vsel %vm450_vm6, %v5024_v43, 0.0 }
 0xc31   :  { %1634 = vadd.xlane.f32.xlu1 %v1633_v44 }
 0xc38   :  { %v5026_v45 = vpop.eup %5025 }
 0xc39   :  { %v1630_v46 = vsel %vm450_vm6, %v5026_v45, 0.0 }
 0xc3a   :  { %1631 = vadd.xlane.f32.xlu0 %v1630_v46 }
 0xc42   :  { %1716 = vrot.lane.b32.xlu1 %v5557_v11, %s5273_s30 }
 0xc46   :  { %1794 = vrot.lane.b32.xlu1 %v5660_v47, %s6083_s1 }
 0xc4a   :  { %1802 = vrot.lane.b32.xlu1 %v1378_v27, %s6081_s8 }
 0xc50   :  { %1640 = vrot.lane.b32.xlu0 %v5553_v10, %s5273_s30  ;;  %v1833_v10 = vld [vmem:[#allocation8] sm:$0xff] }
 0xc54   :  { %1796 = vrot.lane.b32.xlu0 %v5657_v41, %s6083_s1  ;;  %v1834_v41 = vld [vmem:[#allocation8 + $0x8] sm:$0xff] }
 0xc55   :  { %v4883_v54 = vpack.c.bf16 %v1834_v41, %v1833_v10  ;;  %v4324_v10 = vld [vmem:[%s6061_s13] ss:$0 sm:$0xff] }
 0xc58   :  { %1804 = vrot.lane.b32.xlu0 %v1454_v19, %s6081_s8 }
 0xcbe   :  { %v1635_v48 = vpop.xlane.xlu1 %1634 }
 0xcbf   :  { %5027 = vrcp.f32 %v1635_v48 }
 0xcc2   :  { %v1717_v49 = vpop.permute.xlu1 %1716 }
 0xcc3   :  { %4652 = vmatpush3.msra.mxu0 %v1717_v49 }
 0xcc6   :  { %v1795_v63 = vpop.permute.xlu1 %1794 }
 0xcc7   :  { %v1632_v50 = vpop.xlane.xlu0 %1631  ;;  %v1816_v8 = vsel %vm450_vm6, %v5617_v0, %v1795_v63  ;;  %v4320_v0 = vld [vmem:[%s6059_s11] ss:$0 sm:$0xff]  ;;  %v2077_v63 = vld [vmem:[#allocation10 + $0x20] sm:$0xff] }
 0xcc8   :  { %5029 = vrcp.f32 %v1632_v50 }
 0xcc9   :  { %v5028_v11 = vpop.eup %5027 }
 0xcca   :  { %v1639_v51 = vmul.f32 %v5028_v11, %v5024_v43  ;;  %v1803_v2 = vpop.permute.xlu1 %1802  ;;  %v4895_v43 = vpack.c.bf16 %v1974_v42, %v1973_v40 }
 0xccb   :  { %v1641_v47 = vpop.permute.xlu0 %1640  ;;  %v1819_v12 = vsel %vm1818_vm7, %v1816_v8, %v1803_v2 }
 0xccc   :  { %4647 = vmatpush3.msra.mxu1 %v1641_v47  ;;  %4654 = vmatmul.mubr.msk.f32.vlgmr.msra.gmra.mrb[12].mxu0 %vm450_vm6, %v1639_v51  ;;  %v4323_v51 = vld [vmem:[%s6060_s12] ss:$0 sm:$0xff] }
 0xccd   :  { %4884 = vmatprep.subr.bf16.mxu1 %v4883_v54 }
 0xccf   :  { %v1797_v62 = vpop.permute.xlu0 %1796 }
 0xcd0   :  { %v1817_v7 = vsel %vm450_vm6, %v5620_v5, %v1797_v62 }
 0xcd2   :  { %v5030_v52 = vpop.eup %5029 }
 0xcd3   :  { %v1637_v53 = vmul.f32 %v5030_v52, %v5026_v45  ;;  %v1805_v1 = vpop.permute.xlu0 %1804 }
 0xcd4   :  { %v1820_v9 = vsel %vm1818_vm7, %v1817_v7, %v1805_v1  ;;  %v2078_v1 = vld [vmem:[#allocation10 + $0x28] sm:$0xff]  ;;  %v2080_v7 = vld [vmem:[#allocation10 + $0x38] sm:$0xff] }
 0xcd5   :  { %4649 = vmatmul.mubr.msk.f32.vlgmr.msra.gmra.mrb[20].mxu1 %vm450_vm6, %v1637_v53  ;;  %v4907_v2 = vpack.c.bf16 %v2078_v1, %v2077_v63  ;;  %v4334_v1 = vld [vmem:[%s6057_s9 + $0x1] ss:$0 sm:$0xff]  ;;  %s6105_s9 = smov 8  }
 0xcd6   :  { %4886 = vmatpush3.bf16.msra.mxu1 %v4883_v54 }
 0xcd7   :  { %4888 = vmatprep.subr.bf16.mxu1 %v4887_v57 }
 0xcda   :  { %4890 = vmatpush3.bf16.msra.mxu1 %v4887_v57  ;;  %v2073_v57 = vld [vmem:[#allocation10] sm:$0xff] }
 0xd9f   :  { %v1788_v58 = vpop.f32.mrb[12].mxu0 }
 0xda0   :  { %1812 = vrot.lane.b32.xlu0 %v1788_v58, %s6079_s28  ;;  %v4655_v59 = vpop.f32.mrb[13].mxu0  ;;  %v2074_v58 = vld [vmem:[#allocation10 + $0x8] sm:$0xff] }
 0xda1   :  { %v4899_v59 = vpack.c.bf16 %v2074_v58, %v2073_v57 }
 0xda3   :  { %4900 = vmatprep.subr.bf16.mxu1 %v4899_v59 }
 0xda8   :  { %v1712_v60 = vpop.f32.mrb[20].mxu1 }
 0xda9   :  { %1810 = vrot.lane.b32.xlu1 %v1712_v60, %s6079_s28  ;;  %v4650_v61 = vpop.f32.mrb[21].mxu1  ;;  %v2075_v60 = vld [vmem:[#allocation10 + $0x10] sm:$0xff] }
 0xdaa   :  { %v2076_v61 = vld [vmem:[#allocation10 + $0x18] sm:$0xff] }
 0xdab   :  { %v4903_v62 = vpack.c.bf16 %v2076_v61, %v2075_v60 }
 0xe12   :  { %v1813_v3 = vpop.permute.xlu0 %1812 }
 0xe13   :  { %v1823_v14 = vsel %vm1821_vm8, %v1820_v9, %v1813_v3  ;;  %v2079_v3 = vld [vmem:[#allocation10 + $0x30] sm:$0xff]  ;;  %v4325_v9 = vld [vmem:[%s6063_s15] ss:$0 sm:$0xff] }
 0xe14   :  { %v1832_v18 = vmul.f32 %v4319_v13, %v1823_v14  ;;  %v4911_v8 = vpack.c.bf16 %v2080_v7, %v2079_v3 }
 0xe1b   :  { %v1811_v15 = vpop.permute.xlu1 %1810 }
 0xe1c   :  { %v1822_v16 = vsel %vm1821_vm8, %v1819_v12, %v1811_v15 }
 0xe1d   :  { %v1831_v17 = vmul.f32 %v4319_v13, %v1822_v16 }
 0xe1f   :  { %4664 = vmatprep.mubr.msk.f32.mxu1 %vm285_vm4, %v1831_v17 }
 0xe20   :  { %4665 = vmatmul.mubr.msk.f32.vlgmr.msra.gmra.mrb[22].mxu1 %vm285_vm4, %v1832_v18 }
 0xe21   :  { %4902 = vmatpush3.bf16.msra.mxu1 %v4899_v59  ;;  %v4332_v59 = vld [vmem:[%s6067_s19] ss:$0 sm:$0xff] }
 0xe22   :  { %4904 = vmatprep.subr.bf16.mxu1 %v4903_v62 }
 0xe25   :  { %4906 = vmatpush3.bf16.msra.mxu1 %v4903_v62 }
 0xe26   :  { %4908 = vmatprep.subr.bf16.mxu1 %v4907_v2 }
 0xe29   :  { %4910 = vmatpush3.bf16.msra.mxu1 %v4907_v2 }
 0xe2a   :  { %4912 = vmatprep.subr.bf16.mxu1 %v4911_v8 }
 0xe2d   :  { %4914 = vmatpush3.bf16.msra.mxu1 %v4911_v8 }
 0xe2e   :  { %4718 = vmatprep.subr.mxu1 %v5260_v22 }
 0xef3   :  { %v4666_v5 = vpop.f32.mrb[22].mxu1 }
 0xef4   :  { %v1922_v19 = vadd.f32 %v4666_v5, %v4320_v0  ;;  %v1916_v20 = vpop.f32.mrb[23].mxu1 }
 0xef5   :  { %v1917_v21 = vadd.f32 %v4320_v0, %v1916_v20 }
 0xef6   :  { %v1926_v24 = vadd.f32 %v1922_v19, %v5542_v6 }
 0xef7   :  { %v1925_v25 = vadd.f32 %v1917_v21, %v5538_v4  ;;  %v1971_v4 = vld [vmem:[%s6062_s14] sm:$0xff] }
 0xef8   :  { %v1932_v26 = vsel %vm285_vm4, %v1926_v24, 0.0  ;;  %v4891_v39 = vpack.c.bf16 %v1972_v38, %v1971_v4 }
 0xef9   :  { %1933 = vadd.xlane.f32.xlu0 %v1932_v26  ;;  %v1929_v27 = vsel %vm285_vm4, %v1925_v25, 0.0  ;;  %v4328_v26 = vld [vmem:[%s6065_s17] ss:$0 sm:$0xff] }
 0xefa   :  { %1930 = vadd.xlane.f32.xlu1 %v1929_v27  ;;  %4892 = vmatprep.subr.bf16.mxu0 %v4891_v39 }
 0xefb   :  { %4894 = vmatpush3.bf16.msra.mxu0 %v4891_v39 }
 0xefc   :  { %4896 = vmatprep.subr.bf16.mxu0 %v4895_v43 }
 0xeff   :  { %4898 = vmatpush3.bf16.msra.mxu0 %v4895_v43 }
 0xf86   :  { %v1934_v28 = vpop.xlane.xlu0 %1933 }
 0xf87   :  { %v1936_v30 = vmul.f32 0.03125, %v1934_v28  ;;  %v1931_v31 = vpop.xlane.xlu1 %1930 }
 0xf88   :  { %v1935_v32 = vmul.f32 0.03125, %v1931_v31 }
 0xf89   :  { %v1938_v34 = vsub.f32 %v1926_v24, %v1936_v30 }
 0xf8a   :  { %v1937_v35 = vsub.f32 %v1925_v25, %v1935_v32 }
 0xf8b   :  { %v1940_v36 = vmul.f32 %v1938_v34, %v1938_v34 }
 0xf8c   :  { %v1939_v37 = vmul.f32 %v1937_v35, %v1937_v35 }
 0xf8d   :  { %v1944_v23 = vsel %vm285_vm4, %v1940_v36, 0.0 }
 0xf8e   :  { %1945 = vadd.xlane.f32.xlu1 %v1944_v23  ;;  %v1941_v6 = vsel %vm285_vm4, %v1939_v37, 0.0 }
 0xf8f   :  { %1942 = vadd.xlane.f32.xlu0 %v1941_v6 }
0x101b   :  { %v1946_v44 = vpop.xlane.xlu1 %1945 }
0x101c   :  { %v1948_v45 = vmul.f32 0.03125, %v1946_v44  ;;  %v1943_v46 = vpop.xlane.xlu0 %1942 }
0x101d   :  { %v1947_v48 = vmul.f32 0.03125, %v1943_v46  ;;  %v2218_v46 = vld [vmem:[#allocation7 + $0x28] sm:$0xff] }
0x101e   :  { %v1950_v49 = vadd.f32 1e-12, %v1948_v45  ;;  %v2217_v45 = vld [vmem:[#allocation7 + $0x20] sm:$0xff] }
0x101f   :  { %v1949_v50 = vadd.f32 1e-12, %v1947_v48  ;;  %v4915_v48 = vpack.c.bf16 %v2218_v46, %v2217_v45 }
0x1020   :  { %5031 = vrsqrt.f32 %v1950_v49  ;;  %v2219_v49 = vld [vmem:[#allocation7 + $0x30] sm:$0xff] }
0x1021   :  { %5033 = vrsqrt.f32 %v1949_v50  ;;  %v2220_v50 = vld [vmem:[#allocation7 + $0x38] sm:$0xff]  ;;  %4916 = vmatprep.subr.bf16.mxu0 %v4915_v48 }
0x102a   :  { %v5032_v11 = vpop.eup %5031 }
0x102b   :  { %v5034_v47 = vpop.eup %5033  ;;  %v1954_v52 = vmul.f32 %v5032_v11, %v1938_v34  ;;  %v4919_v11 = vpack.c.bf16 %v2220_v50, %v2219_v49 }
0x102c   :  { %v1953_v53 = vmul.f32 %v5034_v47, %v1937_v35 }
0x102d   :  { %v1962_v41 = vmul.f32 %v4323_v51, %v1954_v52 }
0x102e   :  { %v1961_v54 = vmul.f32 %v4323_v51, %v1953_v53 }
0x102f   :  { %v1970_v56 = vadd.f32 %v4324_v10, %v1962_v41 }
0x1030   :  { %v1969_v55 = vadd.f32 %v4324_v10, %v1961_v54 }
0x1032   :  { %4675 = vmatprep.mubr.msk.f32.mxu0 %vm285_vm4, %v1969_v55 }
0x1033   :  { %4676 = vmatmul.mubr.msk.f32.vlgmr.msra.gmra.mrb[14].mxu0 %vm285_vm4, %v1970_v56 }
0x1034   :  { %4918 = vmatpush3.bf16.msra.mxu0 %v4915_v48 }
0x1035   :  { %4920 = vmatprep.subr.bf16.mxu0 %v4919_v11 }
0x1038   :  { %4922 = vmatpush3.bf16.msra.mxu0 %v4919_v11 }
0x1039   :  { %4708 = vmatprep.subr.mxu0 %v5260_v22 }
0x1106   :  { %v4677_v12 = vpop.f32.mrb[14].mxu0 }
0x1107   :  { %v2060_v13 = vadd.f32 %v4677_v12, %v4325_v9  ;;  %v2054_v14 = vpop.f32.mrb[15].mxu0 }
0x1108   :  { %v2055_v15 = vadd.f32 %v4325_v9, %v2054_v14 }
0x1109   :  { %v2066_v16 = vmul.f32 0.70710677, %v2060_v13  ;;  %v2064_v21 = vmul.f32 0.5, %v2060_v13 }
0x110a   :  { %v2065_v17 = vmul.f32 0.70710677, %v2055_v15  ;;  %v2063_v19 = vmul.f32 0.5, %v2055_v15 }
0x110b   :  { %5035 = verf.f32 %v2066_v16 }
0x110c   :  { %5037 = verf.f32 %v2065_v17 }
0x1115   :  { %v5036_v18 = vpop.eup %5035 }
0x1116   :  { %v5038_v0 = vpop.eup %5037  ;;  %v2070_v5 = vadd.f32 1.0, %v5036_v18 }
0x1117   :  { %v2069_v20 = vadd.f32 1.0, %v5038_v0 }
0x1118   :  { %v2072_v25 = vmul.f32 %v2070_v5, %v2064_v21 }
0x1119   :  { %v2071_v24 = vmul.f32 %v2069_v20, %v2063_v19 }
0x111b   :  { %4694 = vmatprep.mubr.msk.f32.mxu1 %vm2088_vm9, %v2071_v24 }
0x111c   :  { %4695 = vmatmul.mubr.msk.f32.vlgmr.msra.gmra.mrb[24].mxu1 %vm2088_vm9, %v2072_v25 }
0x111d   :  { %4720 = vmatprep.mubr.msk.f32.mxu1 %vm5261_vm5, %v5260_v22 }
0x11ef   :  { %v4696_v27 = vpop.f32.mrb[24].mxu1 }
0x11f0   :  { %v2167_v28 = vadd.f32 %v4696_v27, %v4328_v26  ;;  %v2161_v30 = vpop.f32.mrb[25].mxu1 }
0x11f1   :  { %v2162_v31 = vadd.f32 %v4328_v26, %v2161_v30 }
0x11f2   :  { %v2171_v32 = vadd.f32 %v2167_v28, %v1970_v56 }
0x11f3   :  { %v2170_v34 = vadd.f32 %v2162_v31, %v1969_v55  ;;  %v4331_v55 = vld [vmem:[%s6066_s18] ss:$0 sm:$0xff] }
0x11f4   :  { %v2177_v35 = vsel %vm285_vm4, %v2171_v32, 0.0 }
0x11f5   :  { %2178 = vadd.xlane.f32.xlu1 %v2177_v35  ;;  %v2174_v36 = vsel %vm285_vm4, %v2170_v34, 0.0 }
0x11f6   :  { %2175 = vadd.xlane.f32.xlu0 %v2174_v36 }
0x1282   :  { %v2179_v37 = vpop.xlane.xlu1 %2178 }
0x1283   :  { %v2181_v23 = vmul.f32 0.03125, %v2179_v37  ;;  %v2176_v6 = vpop.xlane.xlu0 %2175 }
0x1284   :  { %v2180_v4 = vmul.f32 0.03125, %v2176_v6 }
0x1285   :  { %v2183_v38 = vsub.f32 %v2171_v32, %v2181_v23 }
0x1286   :  { %v2182_v39 = vsub.f32 %v2170_v34, %v2180_v4 }
0x1287   :  { %v2185_v40 = vmul.f32 %v2183_v38, %v2183_v38 }
0x1288   :  { %v2184_v42 = vmul.f32 %v2182_v39, %v2182_v39 }
0x1289   :  { %v2189_v43 = vsel %vm285_vm4, %v2185_v40, 0.0 }
0x128a   :  { %2190 = vadd.xlane.f32.xlu1 %v2189_v43  ;;  %v2186_v44 = vsel %vm285_vm4, %v2184_v42, 0.0 }
0x128b   :  { %2187 = vadd.xlane.f32.xlu0 %v2186_v44 }
0x1317   :  { %v2191_v51 = vpop.xlane.xlu1 %2190 }
0x1318   :  { %v2193_v47 = vmul.f32 0.03125, %v2191_v51  ;;  %v2188_v52 = vpop.xlane.xlu0 %2187 }
0x1319   :  { %v2192_v53 = vmul.f32 0.03125, %v2188_v52 }
0x131a   :  { %v2195_v10 = vadd.f32 1e-12, %v2193_v47 }
0x131b   :  { %v2194_v41 = vadd.f32 1e-12, %v2192_v53 }
0x131c   :  { %5039 = vrsqrt.f32 %v2195_v10 }
0x131d   :  { %5041 = vrsqrt.f32 %v2194_v41 }
0x1326   :  { %v5040_v54 = vpop.eup %5039 }
0x1327   :  { %v5042_v56 = vpop.eup %5041  ;;  %v2199_v57 = vmul.f32 %v5040_v54, %v2183_v38 }
0x1328   :  { %v2198_v58 = vmul.f32 %v5042_v56, %v2182_v39 }
0x1329   :  { %v2207_v60 = vmul.f32 %v4331_v55, %v2199_v57 }
0x132a   :  { %v2206_v61 = vmul.f32 %v4331_v55, %v2198_v58 }
0x132b   :  { %v5783_v63 = vadd.f32 %v4332_v59, %v2207_v60 }
0x132c   :  { %v5781_v62 = vadd.f32 %v4332_v59, %v2206_v61 }
0x132e   :  { %4705 = vmatprep.mubr.msk.f32.mxu0 %vm285_vm4, %v5781_v62 }
0x132f   :  { %4706 = vmatmul.mubr.msk.f32.vlgmr.msra.gmra.mrb[16].mxu0 %vm285_vm4, %v5783_v63 }
0x1330   :  { %4710 = vmatprep.mubr.msk.f32.mxu0 %vm5261_vm5, %v5260_v22 }
0x1402   :  { %v4707_v2 = vpop.f32.mrb[16].mxu0 }
0x1403   :  { %v5794_v3 = vadd.f32 %v4707_v2, %v4334_v1  ;;  %v2301_v7 = vpop.f32.mrb[17].mxu0 }
0x1404   :  { %v5796_v8 = vadd.f32 %v4334_v1, %v2301_v7 }
0x1405   :  { %2388 = vrot.lane.b32.xlu1 %v5794_v3, %s5262_s6 }
0x1406   :  { %2311 = vrot.lane.b32.xlu0 %v5796_v8, %s5262_s6  ;;  %s6106_s6 = smov 16  }
0x1477   :  { %v2389_v12 = vpop.permute.xlu1 %2388 }
0x1478   :  { %v2312_v9 = vpop.permute.xlu0 %2311 }
0x1479   :  { %4709 = vmatpush3.xpose.msk.msra.mxu0 %vm450_vm6, %v2312_v9 }
0x147a   :  { %4713 = vmatprep.subr.mxu0 %v5260_v22 }
0x147c   :  { %4711 = vmatmul.mubr.msk.f32.vlgmr.msra.gmra.mrb[18].mxu0 %vm450_vm6, %v5796_v8 }
0x147d   :  { %4714 = vmatpush3.xpose.msk.msra.mxu0 %vm450_vm6, %v2389_v12  ;;  %4715 = vmatprep.mubr.msk.f32.mxu0 %vm5261_vm5, %v5260_v22 }
0x147e   :  { %4723 = vmatprep.subr.mxu0 %v5260_v22 }
0x1480   :  { %4716 = vmatmul.mubr.msk.f32.vlgmr.msra.gmra.mrb[20].mxu0 %vm450_vm6, %v5794_v3 }
0x1481   :  { %4725 = vmatprep.mubr.msk.f32.mxu0 %vm5261_vm5, %v5260_v22 }
0x154f   :  { %v2383_v13 = vpop.f32.mrb[18].mxu0 }
0x1550   :  { %v2464_v14 = vmul.f32 0.35355338, %v2383_v13  ;;  %v4712_v15 = vpop.f32.mrb[19].mxu0 }
0x1552   :  { %v2466_v16 = vadd.f32 %v2464_v14, %v5577_v29 }
0x1553   :  { %v2460_v17 = vpop.f32.mrb[20].mxu0 }
0x1554   :  { %v2465_v18 = vmul.f32 0.35355338, %v2460_v17  ;;  %v4717_v0 = vpop.f32.mrb[21].mxu0  ;;  %v2468_v5 = vsel %vm450_vm6, %v2466_v16, -inf }
0x1555   :  { %2469 = vmax.xlane.f32.xlu1 %v2468_v5 }
0x1556   :  { %v2467_v19 = vadd.f32 %v2465_v18, %v5579_v33 }
0x1558   :  { %v2471_v20 = vsel %vm450_vm6, %v2467_v19, -inf }
0x1559   :  { %2472 = vmax.xlane.f32.xlu0 %v2471_v20 }
0x1566   :  { %2566 = vrot.lane.b32.xlu1 %v5794_v3, %s5264_s7 }
0x156a   :  { %2644 = vrot.lane.b32.xlu1 %v5796_v8, %s5265_s3 }
0x156f   :  { %2490 = vrot.lane.b32.xlu0 %v5796_v8, %s5264_s7  ;;  %s6107_s7 = smov 24  }
0x15e2   :  { %v2470_v21 = vpop.xlane.xlu1 %2469 }
0x15e3   :  { %v2474_v24 = vsub.f32 %v2466_v16, %v2470_v21 }
0x15e5   :  { %v2476_v25 = vmul.f32 1.442695, %v2474_v24 }
0x15e6   :  { %v2567_v26 = vpop.permute.xlu1 %2566  ;;  %v2473_v27 = vpop.xlane.xlu0 %2472 }
0x15e7   :  { %5043 = vpow2.f32 %v2476_v25  ;;  %v2475_v28 = vsub.f32 %v2467_v19, %v2473_v27  ;;  %4724 = vmatpush3.msra.mxu0 %v2567_v26 }
0x15e8   :  { %4733 = vmatprep.subr.mxu0 %v5260_v22 }
0x15e9   :  { %v2478_v30 = vmul.f32 1.442695, %v2475_v28 }
0x15ea   :  { %v2491_v31 = vpop.permute.xlu0 %2490  ;;  %v2645_v37 = vpop.permute.xlu1 %2644 }
0x15eb   :  { %5045 = vpow2.f32 %v2478_v30  ;;  %4719 = vmatpush3.msra.mxu1 %v2491_v31 }
0x15ec   :  { %4728 = vmatprep.subr.mxu1 %v5260_v22 }
0x15f1   :  { %v5044_v32 = vpop.eup %5043 }
0x15f2   :  { %v2480_v34 = vsel %vm450_vm6, %v5044_v32, 0.0 }
0x15f3   :  { %2481 = vadd.xlane.f32.xlu0 %v2480_v34 }
0x15f5   :  { %v5046_v35 = vpop.eup %5045 }
0x15f6   :  { %v2483_v36 = vsel %vm450_vm6, %v5046_v35, 0.0 }
0x15f7   :  { %2484 = vadd.xlane.f32.xlu1 %v2483_v36 }
0x1608   :  { %2642 = vrot.lane.b32.xlu1 %v5796_v8, %s5266_s20 }
0x1609   :  { %2722 = vrot.lane.b32.xlu0 %v5794_v3, %s5265_s3 }
0x160d   :  { %2720 = vrot.lane.b32.xlu0 %v5794_v3, %s5266_s20 }
0x1680   :  { %v2482_v23 = vpop.xlane.xlu0 %2481 }
0x1681   :  { %5047 = vrcp.f32 %v2482_v23 }
0x1684   :  { %v2485_v6 = vpop.xlane.xlu1 %2484  ;;  %v2723_v40 = vpop.permute.xlu0 %2722 }
0x1685   :  { %5049 = vrcp.f32 %v2485_v6 }
0x1688   :  { %v2643_v43 = vpop.permute.xlu1 %2642  ;;  %v2721_v44 = vpop.permute.xlu0 %2720 }
0x168b   :  { %v5048_v4 = vpop.eup %5047 }
0x168c   :  { %v2487_v38 = vmul.f32 %v5048_v4, %v5044_v32 }
0x168e   :  { %4721 = vmatmul.mubr.msk.f32.vlgmr.msra.gmra.mrb[26].mxu1 %vm450_vm6, %v2487_v38 }
0x168f   :  { %v5050_v39 = vpop.eup %5049  ;;  %4729 = vmatpush3.xpose.msk.msra.mxu1 %vm450_vm6, %v2645_v37  ;;  %4730 = vmatprep.mubr.msk.f32.mxu1 %vm5261_vm5, %v5260_v22 }
0x1690   :  { %v2489_v42 = vmul.f32 %v5050_v39, %v5046_v35  ;;  %4738 = vmatprep.subr.mxu1 %v5260_v22 }
0x1692   :  { %4726 = vmatmul.mubr.msk.f32.vlgmr.msra.gmra.mrb[22].mxu0 %vm450_vm6, %v2489_v42  ;;  %4731 = vmatmul.mubr.msk.f32.vlgmr.msra.gmra.mrb[28].mxu1 %vm450_vm6, %v2643_v43 }
0x1693   :  { %4734 = vmatpush3.xpose.msk.msra.mxu0 %vm450_vm6, %v2723_v40  ;;  %4735 = vmatprep.mubr.msk.f32.mxu0 %vm5261_vm5, %v5260_v22 }
0x1694   :  { %4743 = vmatprep.subr.mxu0 %v5260_v22  ;;  %4740 = vmatprep.mubr.msk.f32.mxu1 %vm5261_vm5, %v5260_v22 }
0x1696   :  { %4736 = vmatmul.mubr.msk.f32.vlgmr.msra.gmra.mrb[24].mxu0 %vm450_vm6, %v2721_v44 }
0x1697   :  { %4745 = vmatprep.mubr.msk.f32.mxu0 %vm5261_vm5, %v5260_v22 }
0x1761   :  { %v5850_v45 = vpop.f32.mrb[26].mxu1 }
0x1762   :  { %v4722_v46 = vpop.f32.mrb[27].mxu1 }
0x1765   :  { %v5852_v48 = vpop.f32.mrb[22].mxu0  ;;  %v2716_v49 = vpop.f32.mrb[28].mxu1 }
0x1766   :  { %v2798_v50 = vmul.f32 0.35355338, %v2716_v49  ;;  %v4727_v11 = vpop.f32.mrb[23].mxu0  ;;  %v4732_v51 = vpop.f32.mrb[29].mxu1 }
0x1768   :  { %v2800_v47 = vadd.f32 %v2798_v50, %v5577_v29 }
0x1769   :  { %v2794_v52 = vpop.f32.mrb[24].mxu0 }
0x176a   :  { %v2799_v53 = vmul.f32 0.35355338, %v2794_v52  ;;  %v4737_v10 = vpop.f32.mrb[25].mxu0  ;;  %v2802_v41 = vsel %vm450_vm6, %v2800_v47, -inf }
0x176b   :  { %2803 = vmax.xlane.f32.xlu1 %v2802_v41 }
0x176c   :  { %v2801_v54 = vadd.f32 %v2799_v53, %v5579_v33 }
0x176e   :  { %v2805_v55 = vsel %vm450_vm6, %v2801_v54, -inf }
0x176f   :  { %2806 = vmax.xlane.f32.xlu0 %v2805_v55 }
0x177c   :  { %2900 = vrot.lane.b32.xlu1 %v5794_v3, %s5267_s4 }
0x1780   :  { %2978 = vrot.lane.b32.xlu1 %v5796_v8, %s5268_s26 }
0x1785   :  { %2824 = vrot.lane.b32.xlu0 %v5796_v8, %s5267_s4 }
0x17f8   :  { %v2804_v56 = vpop.xlane.xlu1 %2803 }
0x17f9   :  { %v2808_v57 = vsub.f32 %v2800_v47, %v2804_v56 }
0x17fb   :  { %v2810_v58 = vmul.f32 1.442695, %v2808_v57 }
0x17fc   :  { %v2901_v59 = vpop.permute.xlu1 %2900  ;;  %v2807_v60 = vpop.xlane.xlu0 %2806 }
0x17fd   :  { %5051 = vpow2.f32 %v2810_v58  ;;  %v2809_v61 = vsub.f32 %v2801_v54, %v2807_v60  ;;  %4744 = vmatpush3.msra.mxu0 %v2901_v59 }
0x17fe   :  { %4753 = vmatprep.subr.mxu0 %v5260_v22 }
0x17ff   :  { %v2812_v1 = vmul.f32 1.442695, %v2809_v61 }
0x1800   :  { %v2825_v2 = vpop.permute.xlu0 %2824  ;;  %v2979_v14 = vpop.permute.xlu1 %2978 }
0x1801   :  { %5053 = vpow2.f32 %v2812_v1  ;;  %4739 = vmatpush3.msra.mxu1 %v2825_v2 }
0x1802   :  { %4748 = vmatprep.subr.mxu1 %v5260_v22 }
0x1807   :  { %v5052_v7 = vpop.eup %5051 }
0x1808   :  { %v2814_v9 = vsel %vm450_vm6, %v5052_v7, 0.0 }
0x1809   :  { %2815 = vadd.xlane.f32.xlu0 %v2814_v9 }
0x180b   :  { %v5054_v12 = vpop.eup %5053 }
0x180c   :  { %v2817_v13 = vsel %vm450_vm6, %v5054_v12, 0.0 }
0x180d   :  { %2818 = vadd.xlane.f32.xlu1 %v2817_v13 }
0x181e   :  { %2976 = vrot.lane.b32.xlu1 %v5796_v8, %s5269_s2 }
0x181f   :  { %3056 = vrot.lane.b32.xlu0 %v5794_v3, %s5268_s26 }
0x1823   :  { %3054 = vrot.lane.b32.xlu0 %v5794_v3, %s5269_s2 }
0x1896   :  { %v2816_v15 = vpop.xlane.xlu0 %2815 }
0x1897   :  { %5055 = vrcp.f32 %v2816_v15 }
0x189a   :  { %v2819_v16 = vpop.xlane.xlu1 %2818  ;;  %v3057_v5 = vpop.permute.xlu0 %3056 }
0x189b   :  { %5057 = vrcp.f32 %v2819_v16 }
0x189e   :  { %v2977_v20 = vpop.permute.xlu1 %2976  ;;  %v3055_v21 = vpop.permute.xlu0 %3054 }
0x18a1   :  { %v5056_v17 = vpop.eup %5055 }
0x18a2   :  { %v2821_v18 = vmul.f32 %v5056_v17, %v5052_v7 }
0x18a4   :  { %4741 = vmatmul.mubr.msk.f32.vlgmr.msra.gmra.mrb[30].mxu1 %vm450_vm6, %v2821_v18 }
0x18a5   :  { %v5058_v0 = vpop.eup %5057  ;;  %4749 = vmatpush3.xpose.msk.msra.mxu1 %vm450_vm6, %v2979_v14  ;;  %4750 = vmatprep.mubr.msk.f32.mxu1 %vm5261_vm5, %v5260_v22 }
0x18a6   :  { %v2823_v19 = vmul.f32 %v5058_v0, %v5054_v12  ;;  %4758 = vmatprep.subr.mxu1 %v5260_v22 }
0x18a8   :  { %4746 = vmatmul.mubr.msk.f32.vlgmr.msra.gmra.mrb[26].mxu0 %vm450_vm6, %v2823_v19  ;;  %4751 = vmatmul.mubr.msk.f32.vlgmr.msra.gmra.mrb[32].mxu1 %vm450_vm6, %v2977_v20 }
0x18a9   :  { %4754 = vmatpush3.xpose.msk.msra.mxu0 %vm450_vm6, %v3057_v5  ;;  %4755 = vmatprep.mubr.msk.f32.mxu0 %vm5261_vm5, %v5260_v22 }
0x18aa   :  { %4763 = vmatprep.subr.mxu0 %v5260_v22  ;;  %4760 = vmatprep.mubr.msk.f32.mxu1 %vm5261_vm5, %v5260_v22 }
0x18ac   :  { %4756 = vmatmul.mubr.msk.f32.vlgmr.msra.gmra.mrb[28].mxu0 %vm450_vm6, %v3055_v21 }
0x18ad   :  { %4765 = vmatprep.mubr.msk.f32.mxu0 %vm5261_vm5, %v5260_v22 }
0x1977   :  { %v5890_v24 = vpop.f32.mrb[30].mxu1 }
0x1978   :  { %v4742_v25 = vpop.f32.mrb[31].mxu1 }
0x197b   :  { %v5892_v26 = vpop.f32.mrb[26].mxu0  ;;  %v3050_v27 = vpop.f32.mrb[32].mxu1 }
0x197c   :  { %v3132_v28 = vmul.f32 0.35355338, %v3050_v27  ;;  %v4747_v30 = vpop.f32.mrb[27].mxu0  ;;  %v4752_v31 = vpop.f32.mrb[33].mxu1 }
0x197e   :  { %v3134_v32 = vadd.f32 %v3132_v28, %v5577_v29 }
0x197f   :  { %v3128_v34 = vpop.f32.mrb[28].mxu0 }
0x1980   :  { %v3133_v35 = vmul.f32 0.35355338, %v3128_v34  ;;  %v4757_v36 = vpop.f32.mrb[29].mxu0  ;;  %v3136_v37 = vsel %vm450_vm6, %v3134_v32, -inf }
0x1981   :  { %3137 = vmax.xlane.f32.xlu1 %v3136_v37  ;;  %v3686_v36 = vld [vmem:[#allocation8 + $0x28] sm:$0xff] }
0x1982   :  { %v3135_v23 = vadd.f32 %v3133_v35, %v5579_v33 }
0x1984   :  { %v3139_v6 = vsel %vm450_vm6, %v3135_v23, -inf }
0x1985   :  { %3140 = vmax.xlane.f32.xlu0 %v3139_v6  ;;  %v3688_v6 = vld [vmem:[#allocation8 + $0x38] sm:$0xff] }
0x1992   :  { %3234 = vrot.lane.b32.xlu1 %v5794_v3, %s5270_s23 }
0x1996   :  { %3312 = vrot.lane.b32.xlu1 %v5796_v8, %s5271_s25 }
0x199b   :  { %3158 = vrot.lane.b32.xlu0 %v5796_v8, %s5270_s23 }
0x1a0e   :  { %v3138_v4 = vpop.xlane.xlu1 %3137 }
0x1a0f   :  { %v3142_v38 = vsub.f32 %v3134_v32, %v3138_v4 }
0x1a11   :  { %v3144_v39 = vmul.f32 1.442695, %v3142_v38 }
0x1a12   :  { %v3235_v40 = vpop.permute.xlu1 %3234  ;;  %v3141_v42 = vpop.xlane.xlu0 %3140 }
0x1a13   :  { %5059 = vpow2.f32 %v3144_v39  ;;  %v3143_v43 = vsub.f32 %v3135_v23, %v3141_v42  ;;  %4764 = vmatpush3.msra.mxu0 %v3235_v40  ;;  %v3687_v23 = vld [vmem:[#allocation8 + $0x30] sm:$0xff] }
0x1a14   :  { %4773 = vmatprep.subr.mxu0 %v5260_v22  ;;  %v4927_v4 = vpack.c.bf16 %v3688_v6, %v3687_v23  ;;  %v3931_v23 = vld [vmem:[#allocation10 + $0x40] sm:$0xff]  ;;  %v3932_v6 = vld [vmem:[#allocation10 + $0x48] sm:$0xff] }
0x1a15   :  { %v3146_v44 = vmul.f32 1.442695, %v3143_v43 }
0x1a16   :  { %v3159_v46 = vpop.permute.xlu0 %3158  ;;  %v3313_v47 = vpop.permute.xlu1 %3312 }
0x1a17   :  { %5061 = vpow2.f32 %v3146_v44  ;;  %4759 = vmatpush3.msra.mxu1 %v3159_v46 }
0x1a18   :  { %4768 = vmatprep.subr.mxu1 %v5260_v22 }
0x1a1d   :  { %v5060_v49 = vpop.eup %5059 }
0x1a1e   :  { %v3148_v50 = vsel %vm450_vm6, %v5060_v49, 0.0 }
0x1a1f   :  { %3149 = vadd.xlane.f32.xlu0 %v3148_v50  ;;  %v4362_v50 = vld [vmem:[%s6104_s24 + $0x1] ss:$0 sm:$0xff] }
0x1a21   :  { %v5062_v11 = vpop.eup %5061 }
0x1a22   :  { %v3151_v51 = vsel %vm450_vm6, %v5062_v11, 0.0 }
0x1a23   :  { %3152 = vadd.xlane.f32.xlu1 %v3151_v51 }
0x1a34   :  { %3310 = vrot.lane.b32.xlu1 %v5796_v8, %s5272_s27 }
0x1a35   :  { %3390 = vrot.lane.b32.xlu0 %v5794_v3, %s5271_s25  ;;  %s6108_s25 = sld [smem:[#allocation28_spill]] }
0x1a39   :  { %3388 = vrot.lane.b32.xlu0 %v5794_v3, %s5272_s27  ;;  %s5277_s27 = smov [#allocation13]  }
0x1aac   :  { %v3150_v52 = vpop.xlane.xlu0 %3149 }
0x1aad   :  { %5063 = vrcp.f32 %v3150_v52 }
0x1ab0   :  { %v3153_v53 = vpop.xlane.xlu1 %3152  ;;  %v3391_v55 = vpop.permute.xlu0 %3390 }
0x1ab1   :  { %5065 = vrcp.f32 %v3153_v53 }
0x1ab4   :  { %v3311_v57 = vpop.permute.xlu1 %3310  ;;  %v3389_v58 = vpop.permute.xlu0 %3388 }
0x1ab7   :  { %v5064_v10 = vpop.eup %5063 }
0x1ab8   :  { %v3155_v41 = vmul.f32 %v5064_v10, %v5060_v49 }
0x1aba   :  { %4761 = vmatmul.mubr.msk.f32.vlgmr.msra.gmra.mrb[34].mxu1 %vm450_vm6, %v3155_v41 }
0x1abb   :  { %v5066_v54 = vpop.eup %5065  ;;  %4769 = vmatpush3.xpose.msk.msra.mxu1 %vm450_vm6, %v3313_v47  ;;  %4770 = vmatprep.mubr.msk.f32.mxu1 %vm5261_vm5, %v5260_v22 }
0x1abc   :  { %v3157_v56 = vmul.f32 %v5066_v54, %v5062_v11  ;;  %4778 = vmatprep.subr.mxu1 %v5260_v22 }
0x1abe   :  { %4766 = vmatmul.mubr.msk.f32.vlgmr.msra.gmra.mrb[30].mxu0 %vm450_vm6, %v3157_v56  ;;  %4771 = vmatmul.mubr.msk.f32.vlgmr.msra.gmra.mrb[36].mxu1 %vm450_vm6, %v3311_v57  ;;  %v4364_v56 = vld [vmem:[%s6059_s11 + $0x1] ss:$0 sm:$0xff] }
0x1abf   :  { %4774 = vmatpush3.xpose.msk.msra.mxu0 %vm450_vm6, %v3391_v55  ;;  %4775 = vmatprep.mubr.msk.f32.mxu0 %vm5261_vm5, %v5260_v22 }
0x1ac0   :  { %4783 = vmatprep.subr.mxu0 %v5260_v22  ;;  %4780 = vmatprep.mubr.msk.f32.mxu1 %vm5261_vm5, %v5260_v22 }
0x1ac2   :  { %4776 = vmatmul.mubr.msk.f32.vlgmr.msra.gmra.mrb[32].mxu0 %vm450_vm6, %v3389_v58 }
0x1ac3   :  { %4785 = vmatprep.mubr.msk.f32.mxu0 %vm5261_vm5, %v5260_v22 }
0x1b8d   :  { %v3230_v59 = vpop.f32.mrb[34].mxu1 }
0x1b8e   :  { %v4762_v60 = vpop.f32.mrb[35].mxu1 }
0x1b91   :  { %v3306_v61 = vpop.f32.mrb[30].mxu0  ;;  %v3384_v1 = vpop.f32.mrb[36].mxu1 }
0x1b92   :  { %v3466_v2 = vmul.f32 0.35355338, %v3384_v1  ;;  %v4767_v7 = vpop.f32.mrb[31].mxu0  ;;  %v4772_v9 = vpop.f32.mrb[37].mxu1 }
0x1b94   :  { %v3468_v12 = vadd.f32 %v3466_v2, %v5577_v29 }
0x1b95   :  { %v3462_v13 = vpop.f32.mrb[32].mxu0 }
0x1b96   :  { %v3467_v14 = vmul.f32 0.35355338, %v3462_v13  ;;  %v4777_v15 = vpop.f32.mrb[33].mxu0  ;;  %v3470_v16 = vsel %vm450_vm6, %v3468_v12, -inf }
0x1b97   :  { %3471 = vmax.xlane.f32.xlu1 %v3470_v16 }
0x1b98   :  { %v3469_v17 = vadd.f32 %v3467_v14, %v5579_v33 }
0x1b9a   :  { %v3473_v18 = vsel %vm450_vm6, %v3469_v17, -inf }
0x1b9b   :  { %3474 = vmax.xlane.f32.xlu0 %v3473_v18 }
0x1c24   :  { %v3472_v0 = vpop.xlane.xlu1 %3471 }
0x1c25   :  { %v3476_v5 = vsub.f32 %v3468_v12, %v3472_v0  ;;  %v4372_v0 = vld [vmem:[%s6062_s14 + $0x28] sm:$0xff] }
0x1c27   :  { %v3478_v19 = vmul.f32 1.442695, %v3476_v5 }
0x1c28   :  { %v3475_v20 = vpop.xlane.xlu0 %3474 }
0x1c29   :  { %5067 = vpow2.f32 %v3478_v19  ;;  %v3477_v21 = vsub.f32 %v3469_v17, %v3475_v20  ;;  %v4373_v19 = vld [vmem:[%s6062_s14 + $0x30] sm:$0xff]  ;;  %v4374_v20 = vld [vmem:[%s6062_s14 + $0x38] sm:$0xff] }
0x1c2b   :  { %v3480_v25 = vmul.f32 1.442695, %v3477_v21  ;;  %v4935_v21 = vpack.c.bf16 %v4374_v20, %v4373_v19 }
0x1c2d   :  { %5069 = vpow2.f32 %v3480_v25 }
0x1c33   :  { %v5068_v29 = vpop.eup %5067 }
0x1c34   :  { %v3482_v27 = vsel %vm450_vm6, %v5068_v29, 0.0 }
0x1c35   :  { %3483 = vadd.xlane.f32.xlu0 %v3482_v27 }
0x1c37   :  { %v5070_v28 = vpop.eup %5069 }
0x1c38   :  { %v3485_v30 = vsel %vm450_vm6, %v5070_v28, 0.0 }
0x1c39   :  { %3486 = vadd.xlane.f32.xlu1 %v3485_v30 }
0x1c4a   :  { %3568 = vrot.lane.b32.xlu1 %v5794_v3, %s5273_s30 }
0x1c4b   :  { %3492 = vrot.lane.b32.xlu0 %v5796_v8, %s5273_s30  ;;  %s4272_s30 = sshll.u32 %s5277_s27, 4  ;;  %s4273_s30 = int_to_ptr.vmem [resolvable:$true] %s4272_s30 }
0x1c4c   :  { %p5224_p7 = scmp.lt.s32.totalorder %s4273_s30, %s4273_s30 }
0x1c4e   :  { %3646 = vrot.lane.b32.xlu1 %v5890_v24, %s6105_s9 }
0x1c4f   :  { %3648 = vrot.lane.b32.xlu0 %v5892_v26, %s6105_s9  ;;  %v3685_v26 = vld [vmem:[#allocation8 + $0x20] sm:$0xff] }
0x1c50   :  { %v4923_v37 = vpack.c.bf16 %v3686_v36, %v3685_v26 }
0x1c52   :  { %3654 = vrot.lane.b32.xlu1 %v3230_v59, %s6106_s6 }
0x1c53   :  { %3656 = vrot.lane.b32.xlu0 %v3306_v61, %s6106_s6 }
0x1cc2   :  { %v3484_v33 = vpop.xlane.xlu0 %3483 }
0x1cc3   :  { %5071 = vrcp.f32 %v3484_v33 }
0x1cc6   :  { %v3487_v31 = vpop.xlane.xlu1 %3486  ;;  %v3493_v32 = vpop.permute.xlu0 %3492 }
0x1cc7   :  { %5073 = vrcp.f32 %v3487_v31  ;;  %4779 = vmatpush3.msra.mxu1 %v3493_v32  ;;  %v4369_v32 = vld [vmem:[%s6060_s12 + $0x1] ss:$0 sm:$0xff] }
0x1cc8   :  { %4924 = vmatprep.subr.bf16.mxu1 %v4923_v37 }
0x1cca   :  { %v3569_v3 = vpop.permute.xlu1 %3568  ;;  %v3649_v44 = vpop.permute.xlu0 %3648 }
0x1ccb   :  { %4784 = vmatpush3.msra.mxu0 %v3569_v3  ;;  %v3669_v10 = vsel %vm450_vm6, %v5852_v48, %v3649_v44 }
0x1ccd   :  { %v5072_v34 = vpop.eup %5071 }
0x1cce   :  { %v3489_v8 = vmul.f32 %v5072_v34, %v5068_v29  ;;  %v3647_v43 = vpop.permute.xlu1 %3646  ;;  %v3657_v11 = vpop.permute.xlu0 %3656 }
0x1ccf   :  { %v3668_v49 = vsel %vm450_vm6, %v5850_v45, %v3647_v43  ;;  %v3671_v41 = vsel %vm1818_vm7, %v3669_v10, %v3657_v11  ;;  %v3936_v43 = vld [vmem:[#allocation10 + $0x68] sm:$0xff] }
0x1cd0   :  { %4781 = vmatmul.mubr.msk.f32.vlgmr.msra.gmra.mrb[38].mxu1 %vm450_vm6, %v3489_v8  ;;  %v4376_v11 = vld [vmem:[%s6063_s15 + $0x1] ss:$0 sm:$0xff] }
0x1cd1   :  { %v5074_v24 = vpop.eup %5073  ;;  %4926 = vmatpush3.bf16.msra.mxu1 %v4923_v37 }
0x1cd2   :  { %v3491_v35 = vmul.f32 %v5074_v24, %v5070_v28  ;;  %4928 = vmatprep.subr.bf16.mxu1 %v4927_v4  ;;  %v3655_v46 = vpop.permute.xlu1 %3654  ;;  %v4370_v24 = vld [vmem:[%s6061_s13 + $0x1] ss:$0 sm:$0xff] }
0x1cd3   :  { %v3670_v51 = vsel %vm1818_vm7, %v3668_v49, %v3655_v46  ;;  %v3937_v46 = vld [vmem:[#allocation10 + $0x70] sm:$0xff]  ;;  %v3938_v49 = vld [vmem:[#allocation10 + $0x78] sm:$0xff] }
0x1cd4   :  { %4786 = vmatmul.mubr.msk.f32.vlgmr.msra.gmra.mrb[34].mxu0 %vm450_vm6, %v3491_v35 }
0x1cd5   :  { %4930 = vmatpush3.bf16.msra.mxu1 %v4927_v4  ;;  %v4939_v4 = vpack.c.bf16 %v3932_v6, %v3931_v23  ;;  %v4386_v23 = vld [vmem:[%s6067_s19 + $0x1] ss:$0 sm:$0xff] }
0x1cd7   :  { %4940 = vmatprep.subr.bf16.mxu1 %v4939_v4 }
0x1da3   :  { %v3564_v38 = vpop.f32.mrb[38].mxu1 }
0x1da4   :  { %3662 = vrot.lane.b32.xlu1 %v3564_v38, %s6107_s7  ;;  %v4782_v39 = vpop.f32.mrb[39].mxu1  ;;  %v3933_v38 = vld [vmem:[#allocation10 + $0x50] sm:$0xff] }
0x1da5   :  { %v3934_v39 = vld [vmem:[#allocation10 + $0x58] sm:$0xff] }
0x1da7   :  { %v3640_v40 = vpop.f32.mrb[34].mxu0 }
0x1da8   :  { %3664 = vrot.lane.b32.xlu0 %v3640_v40, %s6107_s7  ;;  %v4787_v42 = vpop.f32.mrb[35].mxu0  ;;  %v4943_v40 = vpack.c.bf16 %v3934_v39, %v3933_v38 }
0x1da9   :  { %v3935_v42 = vld [vmem:[#allocation10 + $0x60] sm:$0xff] }
0x1daa   :  { %v4947_v44 = vpack.c.bf16 %v3936_v43, %v3935_v42 }
0x1e16   :  { %v3663_v47 = vpop.permute.xlu1 %3662 }
0x1e17   :  { %v3672_v52 = vsel %vm1821_vm8, %v3670_v51, %v3663_v47 }
0x1e18   :  { %v3682_v53 = vmul.f32 %v4362_v50, %v3672_v52 }
0x1e1a   :  { %4796 = vmatprep.mubr.msk.f32.mxu1 %vm285_vm4, %v3682_v53  ;;  %v3665_v54 = vpop.permute.xlu0 %3664 }
0x1e1b   :  { %v3673_v45 = vsel %vm1821_vm8, %v3671_v41, %v3665_v54 }
0x1e1c   :  { %v3683_v55 = vmul.f32 %v4362_v50, %v3673_v45  ;;  %v4951_v50 = vpack.c.bf16 %v3938_v49, %v3937_v46 }
0x1e1e   :  { %4797 = vmatmul.mubr.msk.f32.vlgmr.msra.gmra.mrb[40].mxu1 %vm285_vm4, %v3683_v55 }
0x1e1f   :  { %4942 = vmatpush3.bf16.msra.mxu1 %v4939_v4 }
0x1e20   :  { %4944 = vmatprep.subr.bf16.mxu1 %v4943_v40 }
0x1e23   :  { %4946 = vmatpush3.bf16.msra.mxu1 %v4943_v40 }
0x1e24   :  { %4948 = vmatprep.subr.bf16.mxu1 %v4947_v44 }
0x1e27   :  { %4950 = vmatpush3.bf16.msra.mxu1 %v4947_v44 }
0x1e28   :  { %4952 = vmatprep.subr.bf16.mxu1 %v4951_v50 }
0x1e2b   :  { %4954 = vmatpush3.bf16.msra.mxu1 %v4951_v50 }
0x1ef1   :  { %v4798_v57 = vpop.f32.mrb[40].mxu1 }
0x1ef2   :  { %v3775_v58 = vadd.f32 %v4798_v57, %v4364_v56  ;;  %v3769_v59 = vpop.f32.mrb[41].mxu1 }
0x1ef3   :  { %v3770_v60 = vadd.f32 %v4364_v56, %v3769_v59 }
0x1ef4   :  { %v3779_v48 = vadd.f32 %v3775_v58, %v5783_v63 }
0x1ef5   :  { %v3778_v61 = vadd.f32 %v3770_v60, %v5781_v62  ;;  %v4371_v62 = vld [vmem:[%s6062_s14 + $0x20] sm:$0xff] }
0x1ef6   :  { %v3787_v1 = vsel %vm285_vm4, %v3779_v48, 0.0  ;;  %v4931_v5 = vpack.c.bf16 %v4372_v0, %v4371_v62 }
0x1ef7   :  { %3788 = vadd.xlane.f32.xlu0 %v3787_v1  ;;  %v3784_v2 = vsel %vm285_vm4, %v3778_v61, 0.0 }
0x1ef8   :  { %3785 = vadd.xlane.f32.xlu1 %v3784_v2  ;;  %4932 = vmatprep.subr.bf16.mxu0 %v4931_v5 }
0x1ef9   :  { %4934 = vmatpush3.bf16.msra.mxu0 %v4931_v5 }
0x1efa   :  { %4936 = vmatprep.subr.bf16.mxu0 %v4935_v21 }
0x1efd   :  { %4938 = vmatpush3.bf16.msra.mxu0 %v4935_v21  ;;  %v4093_v21 = vld [vmem:[#allocation11] sm:$0xff] }
0x1f84   :  { %v3789_v7 = vpop.xlane.xlu0 %3788 }
0x1f85   :  { %v3791_v9 = vmul.f32 0.03125, %v3789_v7  ;;  %v3786_v12 = vpop.xlane.xlu1 %3785 }
0x1f86   :  { %v3790_v13 = vmul.f32 0.03125, %v3786_v12 }
0x1f87   :  { %v3793_v14 = vsub.f32 %v3779_v48, %v3791_v9  ;;  %v4380_v48 = vld [vmem:[%s6065_s17 + $0x1] ss:$0 sm:$0xff] }
0x1f88   :  { %v3792_v15 = vsub.f32 %v3778_v61, %v3790_v13 }
0x1f89   :  { %v3795_v16 = vmul.f32 %v3793_v14, %v3793_v14 }
0x1f8a   :  { %v3794_v17 = vmul.f32 %v3792_v15, %v3792_v15 }
0x1f8b   :  { %v3799_v18 = vsel %vm285_vm4, %v3795_v16, 0.0 }
0x1f8c   :  { %3800 = vadd.xlane.f32.xlu1 %v3799_v18  ;;  %v3796_v63 = vsel %vm285_vm4, %v3794_v17, 0.0 }
0x1f8d   :  { %3797 = vadd.xlane.f32.xlu0 %v3796_v63 }
0x2019   :  { %v3801_v25 = vpop.xlane.xlu1 %3800 }
0x201a   :  { %v3803_v29 = vmul.f32 0.03125, %v3801_v25  ;;  %v3798_v27 = vpop.xlane.xlu0 %3797  ;;  %v4094_v25 = vld [vmem:[#allocation11 + $0x8] sm:$0xff] }
0x201b   :  { %v3802_v28 = vmul.f32 0.03125, %v3798_v27  ;;  %v5276_v27 = vmov 0.0|0.0  }
0x201c   :  { %v3805_v30 = vadd.f32 1e-12, %v3803_v29  ;;  %v4095_v29 = vld [vmem:[#allocation11 + $0x10] sm:$0xff]  ;;  %4955 = vmatprep.subr.bf16.mxu0 %v5276_v27 }
0x201d   :  { %v3804_v33 = vadd.f32 1e-12, %v3802_v28  ;;  %v4956_v28 = vpack.c.bf16 %v4094_v25, %v4093_v21 }
0x201e   :  { %5075 = vrsqrt.f32 %v3805_v30  ;;  %v4096_v30 = vld [vmem:[#allocation11 + $0x18] sm:$0xff] }
0x201f   :  { %5077 = vrsqrt.f32 %v3804_v33  ;;  %v4959_v33 = vpack.c.bf16 %v4096_v30, %v4095_v29 }
0x2028   :  { %v5076_v31 = vpop.eup %5075 }
0x2029   :  { %v5078_v3 = vpop.eup %5077  ;;  %v3809_v34 = vmul.f32 %v5076_v31, %v3793_v14 }
0x202a   :  { %v3808_v8 = vmul.f32 %v5078_v3, %v3792_v15 }
0x202b   :  { %v3817_v35 = vmul.f32 %v4369_v32, %v3809_v34 }
0x202c   :  { %v3816_v26 = vmul.f32 %v4369_v32, %v3808_v8 }
0x202d   :  { %v3825_v37 = vadd.f32 %v4370_v24, %v3817_v35 }
0x202e   :  { %v3824_v36 = vadd.f32 %v4370_v24, %v3816_v26  ;;  %v4385_v26 = vld [vmem:[%s6066_s18 + $0x1] ss:$0 sm:$0xff] }
0x2030   :  { %4807 = vmatprep.mubr.msk.f32.mxu0 %vm285_vm4, %v3824_v36 }
0x2031   :  { %4808 = vmatmul.mubr.msk.f32.vlgmr.msra.gmra.mrb[36].mxu0 %vm285_vm4, %v3825_v37 }
0x2032   :  { %4837 = vmatprep.mubr.msk.f32.mxu0 %vm5261_vm5, %v5260_v22  ;;  %4957 = vmatpush3.bf16.msra.mxu0 %v4956_v28 }
0x2033   :  { %4958 = vmatprep.subr.bf16.mxu0 %v5276_v27 }
0x2036   :  { %4960 = vmatpush3.bf16.msra.mxu0 %v4959_v33 }
0x2037   :  { %4961 = vmatprep.subr.bf16.mxu0 %v5276_v27 }
0x2104   :  { %v4809_v51 = vpop.f32.mrb[36].mxu0 }
0x2105   :  { %v3917_v47 = vadd.f32 %v4809_v51, %v4376_v11  ;;  %v3911_v52 = vpop.f32.mrb[37].mxu0 }
0x2106   :  { %v3912_v53 = vadd.f32 %v4376_v11, %v3911_v52 }
0x2107   :  { %v3923_v10 = vmul.f32 0.70710677, %v3917_v47  ;;  %v3921_v58 = vmul.f32 0.5, %v3917_v47 }
0x2108   :  { %v3922_v41 = vmul.f32 0.70710677, %v3912_v53  ;;  %v3920_v56 = vmul.f32 0.5, %v3912_v53 }
0x2109   :  { %5079 = verf.f32 %v3923_v10 }
0x210a   :  { %5081 = verf.f32 %v3922_v41 }
0x2113   :  { %v5080_v54 = vpop.eup %5079 }
0x2114   :  { %v5082_v45 = vpop.eup %5081  ;;  %v3927_v55 = vadd.f32 1.0, %v5080_v54  ;;  %v4180_v54 = vld [vmem:[%s6070_s22] sm:$0xff] }
0x2115   :  { %v3926_v57 = vadd.f32 1.0, %v5082_v45  ;;  %v4181_v45 = vld [vmem:[%s6070_s22 + $0x8] sm:$0xff] }
0x2116   :  { %v3929_v60 = vmul.f32 %v3927_v55, %v3921_v58  ;;  %v4962_v58 = vpack.c.bf16 %v4181_v45, %v4180_v54 }
0x2117   :  { %v3928_v59 = vmul.f32 %v3926_v57, %v3920_v56 }
0x2119   :  { %4826 = vmatprep.mubr.msk.f32.mxu1 %vm2088_vm9, %v3928_v59 }
0x211a   :  { %4827 = vmatmul.mubr.msk.f32.vlgmr.msra.gmra.mrb[42].mxu1 %vm2088_vm9, %v3929_v60  ;;  %v4182_v60 = vld [vmem:[%s6070_s22 + $0x10] sm:$0xff] }
0x21ed   :  { %v4828_v61 = vpop.f32.mrb[42].mxu1 }
0x21ee   :  { %v4025_v1 = vadd.f32 %v4828_v61, %v4380_v48  ;;  %v4019_v2 = vpop.f32.mrb[43].mxu1 }
0x21ef   :  { %v4020_v7 = vadd.f32 %v4380_v48, %v4019_v2  ;;  %v4183_v48 = vld [vmem:[%s6070_s22 + $0x18] sm:$0xff]  ;;  %s5219_s22 = scalar_lea.vmem %s4273_s30, 32 }
0x21f0   :  { %v4029_v9 = vadd.f32 %v4025_v1, %v3825_v37  ;;  %v4965_v61 = vpack.c.bf16 %v4183_v48, %v4182_v60  ;;  %v4387_v1 = vld [vmem:[%s6069_s21] ss:$0 sm:$0xff]  ;;  %p5220_p6 = scmp.ne.s32.totalorder %s4273_s30, %s5219_s22  ;;  %p5225_p8 = scmp.lt.s32.totalorder %s5219_s22, %s5219_s22 }
0x21f1   :  { %v4028_v12 = vadd.f32 %v4020_v7, %v3824_v36 }
0x21f2   :  { %v4037_v13 = vsel %vm285_vm4, %v4029_v9, 0.0  ;;  %p5226_p9 = por %p5225_p8, %p5224_p7 }
0x21f3   :  { %4038 = vadd.xlane.f32.xlu1 %v4037_v13  ;;  %v4034_v14 = vsel %vm285_vm4, %v4028_v12, 0.0 }
0x21f4   :  { %4035 = vadd.xlane.f32.xlu0 %v4034_v14  ;;  %p5227_p10 = pnand %p5226_p9, %p5220_p6 }
0x2280   :  { %v4039_v15 = vpop.xlane.xlu1 %4038 }
0x2281   :  { %v4041_v16 = vmul.f32 0.03125, %v4039_v15  ;;  %v4036_v17 = vpop.xlane.xlu0 %4035 }
0x2282   :  { %v4040_v18 = vmul.f32 0.03125, %v4036_v17 }
0x2283   :  { %v4043_v63 = vsub.f32 %v4029_v9, %v4041_v16 }
0x2284   :  { %v4042_v62 = vsub.f32 %v4028_v12, %v4040_v18 }
0x2285   :  { %v4045_v0 = vmul.f32 %v4043_v63, %v4043_v63 }
0x2286   :  { %v4044_v5 = vmul.f32 %v4042_v62, %v4042_v62 }
0x2287   :  { %v4049_v19 = vsel %vm285_vm4, %v4045_v0, 0.0 }
0x2288   :  { %4050 = vadd.xlane.f32.xlu1 %v4049_v19  ;;  %v4046_v20 = vsel %vm285_vm4, %v4044_v5, 0.0 }
0x2289   :  { %4047 = vadd.xlane.f32.xlu0 %v4046_v20 }
0x2315   :  { %v4051_v31 = vpop.xlane.xlu1 %4050 }
0x2316   :  { %v4053_v32 = vmul.f32 0.03125, %v4051_v31  ;;  %v4048_v3 = vpop.xlane.xlu0 %4047 }
0x2317   :  { %v4052_v34 = vmul.f32 0.03125, %v4048_v3 }
0x2318   :  { %v4055_v8 = vadd.f32 1e-12, %v4053_v32 }
0x2319   :  { %v4054_v24 = vadd.f32 1e-12, %v4052_v34 }
0x231a   :  { %5083 = vrsqrt.f32 %v4055_v8 }
0x231b   :  { %5085 = vrsqrt.f32 %v4054_v24 }
0x2324   :  { %v5084_v35 = vpop.eup %5083 }
0x2325   :  { %v5086_v36 = vpop.eup %5085  ;;  %v4059_v37 = vmul.f32 %v5084_v35, %v4043_v63 }
0x2326   :  { %v4058_v6 = vmul.f32 %v5086_v36, %v4042_v62 }
0x2327   :  { %v4067_v4 = vmul.f32 %v4385_v26, %v4059_v37 }
0x2328   :  { %v4066_v38 = vmul.f32 %v4385_v26, %v4058_v6 }
0x2329   :  { %v4075_v39 = vadd.f32 %v4386_v23, %v4067_v4 }
0x232a   :  { %v4074_v40 = vadd.f32 %v4386_v23, %v4066_v38 }
0x232b   :  { %v4083_v42 = vsel %vm285_vm4, %v4075_v39, 0.0 }
0x232c   :  { %v4076_v43 = vsel %vm285_vm4, %v4074_v40, 0.0  ;;  %v4084_v44 = vrot.slane %v4083_v42, 4 }
0x232d   :  { %v4077_v46 = vrot.slane %v4076_v43, 4 }
0x232e   :  { %v4085_v49 = vadd.f32 %v4084_v44, %v4083_v42 }
0x232f   :  { %v4078_v50 = vadd.f32 %v4077_v46, %v4076_v43 }
0x2330   :  { %v4086_v11 = vrot.slane %v4085_v49, 2 }
0x2331   :  { %v4079_v51 = vrot.slane %v4078_v50, 2 }
0x2332   :  { %v4087_v47 = vadd.f32 %v4086_v11, %v4085_v49 }
0x2333   :  { %v4080_v52 = vadd.f32 %v4079_v51, %v4078_v50 }
0x2334   :  { %v4088_v53 = vrot.slane %v4087_v47, 1 }
0x2335   :  { %v4081_v10 = vrot.slane %v4080_v52, 1 }
0x2336   :  { %v4089_v41 = vadd.f32 %v4088_v53, %v4087_v47 }
0x2337   :  { %v4082_v55 = vadd.f32 %v4081_v10, %v4080_v52 }
0x2338   :  { %v4092_v56 = vmul.f32 0.125, %v4089_v41 }
0x2339   :  { %v4091_v57 = vmul.f32 0.125, %v4082_v55 }
0x233b   :  { %v4107_v59 = vsel %vm4106_vm10, %v4092_v56, %v4091_v57 }
0x233c   :  { %4838 = vmatmul.mubr.msk.f32.vlgmr.msra.gmra.mrb[38].mxu0 %vm285_vm4, %v4107_v59 }
0x233d   :  { %4963 = vmatpush3.bf16.msra.mxu0 %v4962_v58  ;;  %4848 = vmatprep.mubr.msk.f32.mxu0 %vm5261_vm5, %v5260_v22  ;;  %v4389_v22 = vld [vmem:[%s6108_s25] ss:$0 sm:$0xff] }
0x233e   :  { %4964 = vmatprep.subr.bf16.mxu0 %v5276_v27 }
0x2341   :  { %4966 = vmatpush3.bf16.msra.mxu0 %v4965_v61 }
0x240f   :  { %v4176_v2 = vpop.f32.mrb[38].mxu0 }
0x2410   :  { %v4177_v7 = vadd.f32 %v4387_v1, %v4176_v2  ;;  %v4839_v9 = vpop.f32.mrb[39].mxu0 }
0x2412   :  { %4849 = vmatmul.mubr.msk.f32.vlgmr.msra.gmra.mrb[40].mxu0 %vm285_vm4, %v4177_v7 }
0x24e5   :  { %v4260_v12 = vpop.f32.mrb[40].mxu0 }
0x24e6   :  { %v4261_v13 = vadd.f32 %v4389_v22, %v4260_v12  ;;  %v4850_v14 = vpop.f32.mrb[41].mxu0 }
0x24e8   :  { %4265 = vst.msk [vmem:[#allocation13] sm:$0x3] %vm4264_vm11, %v4261_v13 }
0x24e9   :  { %5230 = shalt.err (!%p5227_p10)
}
0x24ea   :  { %s6109_s16 = sld [smem:[#allocation29_spill]] }
0x24f0   :  { %s5231_s10 = scalar_lea.hbm %s6109_s16, 32 }
0x24f1   :  { %p5232_p11 = scmp.ne.s32.totalorder %s6109_s16, %s5231_s10  ;;  %p5235_p12 = scmp.lt.u32.totalorder %s5231_s10, %s6109_s16 }
0x24f3   :  { %p5237_p13 = pnand %p5235_p12, %p5232_p11 }
0x24f5   :  { %5240 = shalt.err (!%p5237_p13)
}
0x24f6   :  { %4275 = dma.vmem_to_hbm [thread:$0]  %s4273_s30, 32, %s6109_s16, [#allocation4]  }
0x24f7   :  { %5249 = dma.done.wait [#allocation4], 32  }
0x24f8   :  { %5250 = vsyncadd [#allocation4], 4294967264 }
0x24f9   :  { %4279 = vsyncpa [#allocation3], 1 }
0x24fa   :  { %4280 = vsyncpa [#allocation6], 1 }
0x24fb   :  { %4281 = vsyncpa [#allocation9], 1 }
0x24fc   :  { %4282 = vsyncpa [#allocation12], 1 }
0x24fd   :  { %4283 = vsyncpa [#allocation4], 1 }

</bundles_post_ra>
